<compile_context>
chip_gen: v5e
topology: v5e:2x2
jax: 0.10.0
libtpu: 0.0.40
codegen_flags: <defaults>
</compile_context>

<pallas_src>
import functools

import jax
import jax.numpy as jnp
import numpy as np
from jax import lax
from jax.experimental import pallas as pl
from jax.experimental.pallas import tpu as pltpu

WEIGHTS = (0.32, 0.08, 0.02, 0.01, 0.005)
_EPS = 1e-8
_VMEM_LIMIT = 32 * 1024 * 1024  # v7x-safe (64 MiB physical); fine on v5e/v6e


def _adaptive_avg_matrix(out_size, in_size):
    """1-D adaptive-average-pool matrix (out_size, in_size), numpy float32.

    Exactly matches torch.nn.functional.adaptive_avg_pool2d along one axis:
    window i = [floor(i*in/out), ceil((i+1)*in/out)).  The 2-D pool is the
    separable product Dh @ X @ Dw^T.
    """
    m = np.zeros((out_size, in_size), dtype=np.float32)
    for i in range(out_size):
        start = (i * in_size) // out_size
        end = -((-(i + 1) * in_size) // out_size)  # ceil((i+1)*in/out)
        m[i, start:end] = 1.0 / (end - start)
    return m


def _pick_row_tile(h, bytes_per_row, max_rows=512, budget_bytes=12 << 20):
    """Row-tile height: sublane-aligned, <=512 rows, double-buffer fits budget."""
    th = min(max_rows, max(8, budget_bytes // max(1, bytes_per_row)))
    if th >= h:
        return h                      # single tile; full-dim block is always legal
    return max(8, (th // 8) * 8)      # multiple of 8 satisfies the (8,128) rule


# ---------------------------------------------------------------------------
# Training kernel: grid=(B, H-row-tiles).  Row stage of the downsample is
# accumulated every step; column stage + losses run at the last row tile.
# ---------------------------------------------------------------------------
def _train_kernel(tgt_ref, tocc_ref, *rest, n_levels, n_dw,
                  f_hs, f_hoff, f_wi, o_hs, o_hoff, o_wi,
                  div_flow, H, TH):
    flow_refs = rest[:n_levels]
    occ_refs = rest[n_levels:2 * n_levels]
    dh_ref = rest[2 * n_levels]                                  # (1, sum_hs, TH)
    dw_refs = rest[2 * n_levels + 1:2 * n_levels + 1 + n_dw]     # (W, ws) each
    flow_out_ref = rest[2 * n_levels + 1 + n_dw]
    occ_out_ref = rest[2 * n_levels + 2 + n_dw]
    mid0_ref, mid1_ref, mido_ref = rest[2 * n_levels + 3 + n_dw:]

    k = pl.program_id(1)
    nk = pl.num_programs(1)

    @pl.when(k == 0)
    def _():
        mid0_ref[...] = jnp.zeros_like(mid0_ref)
        mid1_ref[...] = jnp.zeros_like(mid1_ref)
        mido_ref[...] = jnp.zeros_like(mido_ref)

    # ---- streaming row stage: mid_c += Dh[:, rows_k] @ X_rows  (one matmul
    #      per channel, all pyramid heights stacked into the Dh rows)
    dh_blk = dh_ref[0]                # (sum_hs, TH)
    t0 = tgt_ref[0, 0]                # (TH, W) target flow u rows
    t1 = tgt_ref[0, 1]                # (TH, W) target flow v rows
    to = tocc_ref[0, 0]               # (TH, W) target occlusion rows
    if H % TH != 0:                   # ragged last tile: mask padded rows
        rows = k * TH + lax.broadcasted_iota(jnp.int32, (TH, 1), 0)
        valid = rows < H
        t0 = jnp.where(valid, t0, 0.0)
        t1 = jnp.where(valid, t1, 0.0)
        to = jnp.where(valid, to, 0.0)
    mid0_ref[...] += jnp.dot(dh_blk, t0, preferred_element_type=jnp.float32)
    mid1_ref[...] += jnp.dot(dh_blk, t1, preferred_element_type=jnp.float32)
    mido_ref[...] += jnp.dot(dh_blk, to, preferred_element_type=jnp.float32)

    # ---- finalize: column stage of the pool + per-level loss terms
    @pl.when(k == nk - 1)
    def _():
        m0 = mid0_ref[...]            # (sum_hs, W)
        m1 = mid1_ref[...]
        mo = mido_ref[...]
        dw_vals = [dw_refs[i][...] for i in range(n_dw)]   # hoisted loads

        lane = lax.broadcasted_iota(jnp.int32, (1, 128), 1)
        flow_row = jnp.zeros((1, 128), jnp.float32)
        occ_row = jnp.zeros((1, 128), jnp.float32)
        flow_cache = {}   # (h_offset, w_index) -> (down u, down v); trace-time reuse
        occ_cache = {}    # (h_offset, w_index) -> down occ

        for l in range(n_levels):
            # flow term: sum_{hw} || div_flow * down(target1) - flow_l ||_2
            hs, hoff, wi = f_hs[l], f_hoff[l], f_wi[l]
            key = (hoff, wi)
            if key not in flow_cache:
                d0 = jnp.dot(m0[hoff:hoff + hs, :], dw_vals[wi],
                             preferred_element_type=jnp.float32)
                d1 = jnp.dot(m1[hoff:hoff + hs, :], dw_vals[wi],
                             preferred_element_type=jnp.float32)
                flow_cache[key] = (d0, d1)
            d0, d1 = flow_cache[key]
            r0 = d0 * div_flow - flow_refs[l][0, 0]
            r1 = d1 * div_flow - flow_refs[l][0, 1]
            flow_sum = jnp.sum(jnp.sqrt(r0 * r0 + r1 * r1),
                               axis=(0, 1), keepdims=True)          # (1, 1)

            # balanced-F1 occlusion term (per image): tp/d_tp + fn/d_fn
            ohs, ohoff, owi = o_hs[l], o_hoff[l], o_wi[l]
            okey = (ohoff, owi)
            if okey not in occ_cache:
                occ_cache[okey] = jnp.dot(mo[ohoff:ohoff + ohs, :],
                                          dw_vals[owi],
                                          preferred_element_type=jnp.float32)
            yt = occ_cache[okey]
            p = 1.0 / (1.0 + jnp.exp(-occ_refs[l][0, 0]))            # sigmoid
            tp = -jnp.sum(yt * jnp.log(p + _EPS), axis=(0, 1), keepdims=True)
            fn = -jnp.sum((1.0 - yt) * jnp.log(1.0 - p + _EPS),
                          axis=(0, 1), keepdims=True)
            d_tp = (jnp.sum(yt, axis=(0, 1), keepdims=True)
                    + jnp.sum(p, axis=(0, 1), keepdims=True) + _EPS)
            d_fn = (jnp.sum(1.0 - yt, axis=(0, 1), keepdims=True)
                    + jnp.sum(1.0 - p, axis=(0, 1), keepdims=True) + _EPS)
            occ_val = tp / d_tp + fn / d_fn                          # (1, 1)

            # scatter the per-level scalars into lanes [0..n_levels)
            flow_row = jnp.where(lane == l, flow_sum, flow_row)
            occ_row = jnp.where(lane == l, occ_val, occ_row)

        flow_out_ref[0] = flow_row
        occ_out_ref[0] = occ_row


# ---------------------------------------------------------------------------
# Eval kernel: grid=(B, H-row-tiles); EPE sum + F1 counting stats accumulate
# in a (1,128) VMEM scratch, written out at the last row tile.
# ---------------------------------------------------------------------------
def _eval_kernel(flow_ref, tgt_ref, occ_ref, tocc_ref, out_ref, acc_ref, *, H, TH):
    k = pl.program_id(1)
    nk = pl.num_programs(1)

    @pl.when(k == 0)
    def _():
        acc_ref[...] = jnp.zeros_like(acc_ref)

    r0 = tgt_ref[0, 0] - flow_ref[0, 0]
    r1 = tgt_ref[0, 1] - flow_ref[0, 1]
    epe = jnp.sqrt(r0 * r0 + r1 * r1)

    # round(sigmoid(x)) == (x > 0): sigmoid(x) > 0.5 <=> x > 0 and the exact
    # 0.5 tie rounds to 0 under round-half-even.  Saves sigmoid+round (EUP).
    y_pred = (occ_ref[0, 0] > 0.0).astype(jnp.float32)
    y_true = tocc_ref[0, 0]

    if H % TH != 0:                   # ragged last tile: mask padded rows
        rows = k * TH + lax.broadcasted_iota(jnp.int32, (TH, 1), 0)
        valid = rows < H
        epe = jnp.where(valid, epe, 0.0)
        y_pred = jnp.where(valid, y_pred, 0.0)
        y_true = jnp.where(valid, y_true, 0.0)

    epe_sum = jnp.sum(epe, axis=(0, 1), keepdims=True)
    tp = jnp.sum(y_pred * y_true, axis=(0, 1), keepdims=True)
    ps = jnp.sum(y_pred, axis=(0, 1), keepdims=True)
    ts = jnp.sum(y_true, axis=(0, 1), keepdims=True)

    lane = lax.broadcasted_iota(jnp.int32, (1, 128), 1)
    part = jnp.where(lane == 0, epe_sum, jnp.zeros((1, 128), jnp.float32))
    part = jnp.where(lane == 1, tp, part)
    part = jnp.where(lane == 2, ps, part)
    part = jnp.where(lane == 3, ts, part)
    acc_ref[...] += part

    @pl.when(k == nk - 1)
    def _():
        out_ref[0] = acc_ref[...]


# ---------------------------------------------------------------------------
# Wrappers (glue + tiny scalar reductions in plain JAX)
# ---------------------------------------------------------------------------
def multiscale_epe_pwc_occ_train(flows, occs, target1, target_occ1, *,
                                 model_div_flow, batch_size, weights=WEIGHTS):
    n_levels = len(flows)
    B, _, H, W = (int(s) for s in target1.shape)

    f_hs = [int(f.shape[2]) for f in flows]
    f_ws = [int(f.shape[3]) for f in flows]
    o_hs = [int(o.shape[2]) for o in occs]
    o_ws = [int(o.shape[3]) for o in occs]
    uniq_hs = sorted(set(f_hs + o_hs))
    uniq_ws = sorted(set(f_ws + o_ws))
    hoff = {}
    off = 0
    for h in uniq_hs:
        hoff[h] = off
        off += h
    sum_hs = off

    # Row tile: ~12 B/pixel streamed (target flow uv + occ), double-buffered.
    TH = _pick_row_tile(H, 3 * W * 4)
    K = -(-H // TH)

    # Stacked Dh, split along H into K row tiles (zero-padded past H so the
    # ragged tile contributes nothing even before the in-kernel row mask).
    dh_full = np.zeros((sum_hs, K * TH), dtype=np.float32)
    for h in uniq_hs:
        dh_full[hoff[h]:hoff[h] + h, :H] = _adaptive_avg_matrix(h, H)
    dh_split = jnp.asarray(
        dh_full.reshape(sum_hs, K, TH).transpose(1, 0, 2))          # (K, sum_hs, TH)
    dw_mats = [jnp.asarray(_adaptive_avg_matrix(w, W).T) for w in uniq_ws]  # (W, ws)

    kernel = functools.partial(
        _train_kernel,
        n_levels=n_levels, n_dw=len(dw_mats),
        f_hs=tuple(f_hs), f_hoff=tuple(hoff[h] for h in f_hs),
        f_wi=tuple(uniq_ws.index(w) for w in f_ws),
        o_hs=tuple(o_hs), o_hoff=tuple(hoff[h] for h in o_hs),
        o_wi=tuple(uniq_ws.index(w) for w in o_ws),
        div_flow=float(model_div_flow), H=H, TH=TH)

    in_specs = [
        pl.BlockSpec((1, 2, TH, W), lambda b, k: (b, 0, k, 0)),     # target1 rows
        pl.BlockSpec((1, 1, TH, W), lambda b, k: (b, 0, k, 0)),     # target_occ1 rows
    ]
    for hs, ws in zip(f_hs, f_ws):                                  # resident across k
        in_specs.append(pl.BlockSpec((1, 2, hs, ws), lambda b, k: (b, 0, 0, 0)))
    for hs, ws in zip(o_hs, o_ws):
        in_specs.append(pl.BlockSpec((1, 1, hs, ws), lambda b, k: (b, 0, 0, 0)))
    in_specs.append(pl.BlockSpec((1, sum_hs, TH), lambda b, k: (k, 0, 0)))  # Dh rows
    for w in uniq_ws:
        in_specs.append(pl.BlockSpec((W, int(w)), lambda b, k: (0, 0)))     # Dw (const)

    flow_part, occ_part = pl.pallas_call(
        kernel,
        out_shape=(jax.ShapeDtypeStruct((B, 1, 128), jnp.float32),
                   jax.ShapeDtypeStruct((B, 1, 128), jnp.float32)),
        grid=(B, K),
        in_specs=in_specs,
        out_specs=(pl.BlockSpec((1, 1, 128), lambda b, k: (b, 0, 0)),
                   pl.BlockSpec((1, 1, 128), lambda b, k: (b, 0, 0))),
        scratch_shapes=[pltpu.VMEM((sum_hs, W), jnp.float32) for _ in range(3)],
        compiler_params=pltpu.CompilerParams(
            dimension_semantics=("parallel", "arbitrary"),
            vmem_limit_bytes=_VMEM_LIMIT),
    )(target1, target_occ1, *flows, *occs, dh_split, *dw_mats)

    w = jnp.asarray(weights[:n_levels], jnp.float32)                 # (L,)
    hw = jnp.asarray([o_hs[l] * o_ws[l] for l in range(n_levels)], jnp.float32)
    flow_loss = jnp.sum(flow_part[:, 0, :n_levels] * w[None, :])
    occ_loss = jnp.sum(occ_part[:, 0, :n_levels] * (w * hw * 0.5)[None, :])

    # PyTorch: `if (f_loss.data > o_loss.data).numpy:` -- `.numpy` is a bound
    # method (always truthy), so the original module ALWAYS takes the first
    # branch (f_l_w = 1, o_l_w = f_loss / o_loss).  Reproduced faithfully.
    f_loss = lax.stop_gradient(flow_loss)
    o_loss = lax.stop_gradient(occ_loss)
    f_l_w = 1.0
    o_l_w = f_loss / o_loss
    total = (flow_loss * f_l_w + occ_loss * o_l_w) / batch_size
    return {"flow_loss": flow_loss / batch_size,
            "occ_loss": occ_loss / batch_size,
            "total_loss": total}


def multiscale_epe_pwc_occ_eval(flow, occ, target1, target_occ1):
    B, _, H, W = (int(s) for s in target1.shape)
    TH = _pick_row_tile(H, 6 * W * 4)        # ~24 B/pixel streamed per step
    K = -(-H // TH)

    out = pl.pallas_call(
        functools.partial(_eval_kernel, H=H, TH=TH),
        out_shape=jax.ShapeDtypeStruct((B, 1, 128), jnp.float32),
        grid=(B, K),
        in_specs=[
            pl.BlockSpec((1, 2, TH, W), lambda b, k: (b, 0, k, 0)),  # flow
            pl.BlockSpec((1, 2, TH, W), lambda b, k: (b, 0, k, 0)),  # target1
            pl.BlockSpec((1, 1, TH, W), lambda b, k: (b, 0, k, 0)),  # occ logits
            pl.BlockSpec((1, 1, TH, W), lambda b, k: (b, 0, k, 0)),  # target_occ1
        ],
        out_specs=pl.BlockSpec((1, 1, 128), lambda b, k: (b, 0, 0)),
        scratch_shapes=[pltpu.VMEM((1, 128), jnp.float32)],
        compiler_params=pltpu.CompilerParams(
            dimension_semantics=("parallel", "arbitrary"),
            vmem_limit_bytes=_VMEM_LIMIT),
    )(flow, target1, occ, target_occ1)

    epe = jnp.sum(out[:, 0, 0]) / (B * H * W)
    tp, ps, ts = out[:, 0, 1], out[:, 0, 2], out[:, 0, 3]
    precision = tp / (ps + _EPS)
    recall = tp / (ts + _EPS)
    f1 = jnp.mean(precision * recall / (precision + recall + _EPS) * 2.0)
    return {"epe": epe, "F1": f1}


# ---------------------------------------------------------------------------
# Pure-JAX references (independent math path) for quiet correctness checks.
# ---------------------------------------------------------------------------
def _pool_ref(x, hs, ws):
    # exact adaptive_avg_pool2d when H % hs == 0 and W % ws == 0 (true in test)
    b, c, h, w = x.shape
    return x.reshape(b, c, hs, h // hs, ws, w // ws).mean(axis=(3, 5))


def _ref_train(flows, occs, target1, target_occ1, div_flow, batch_size,
               weights=WEIGHTS):
    tgt_flo = div_flow * target1
    flow_loss = jnp.zeros((), jnp.float32)
    occ_loss = jnp.zeros((), jnp.float32)
    for i, (flow, occ) in enumerate(zip(flows, occs)):
        hs, ws = int(flow.shape[2]), int(flow.shape[3])
        res = _pool_ref(tgt_flo, hs, ws) - flow
        epe = jnp.sqrt(jnp.sum(res * res, axis=1, keepdims=True))
        flow_loss = flow_loss + weights[i] * jnp.sum(epe)

        ohs, ows = int(occ.shape[2]), int(occ.shape[3])
        p = jax.nn.sigmoid(occ)
        yt = _pool_ref(target_occ1, ohs, ows)
        tp = -jnp.sum(yt * jnp.log(p + _EPS), axis=(1, 2, 3))
        fn = -jnp.sum((1 - yt) * jnp.log(1 - p + _EPS), axis=(1, 2, 3))
        d_tp = jnp.sum(yt, axis=(1, 2, 3)) + jnp.sum(p, axis=(1, 2, 3)) + _EPS
        d_fn = (jnp.sum(1 - yt, axis=(1, 2, 3))
                + jnp.sum(1 - p, axis=(1, 2, 3)) + _EPS)
        occ_loss = occ_loss + weights[i] * \
            (jnp.sum(tp / d_tp) + jnp.sum(fn / d_fn)) * ohs * ows * 0.5

    total = (flow_loss * 1.0 + occ_loss * (flow_loss / occ_loss)) / batch_size
    return flow_loss / batch_size, occ_loss / batch_size, total


def _ref_eval(flow, occ, target1, target_occ1):
    res = target1 - flow
    epe = jnp.sqrt(jnp.sum(res * res, axis=1, keepdims=True)).mean()
    y_pred = jnp.round(jax.nn.sigmoid(occ))
    y_true = target_occ1
    tp = jnp.sum(y_pred * y_true, axis=(2, 3))
    precision = tp / (jnp.sum(y_pred, axis=(2, 3)) + _EPS)
    recall = tp / (jnp.sum(y_true, axis=(2, 3)) + _EPS)
    f1 = jnp.mean(precision * recall / (precision + recall + _EPS) * 2.0)
    return epe, f1


if __name__ == "__main__":
    key = jax.random.PRNGKey(0)
    ks = jax.random.split(key, 16)

    B, H, W = 2, 32, 32
    level_sizes = [(8, 8), (8, 8), (16, 16), (16, 16), (32, 32)]
    model_div_flow = 0.05

    flows = [jax.random.normal(ks[i], (B, 2, hs, ws), jnp.float32) * 2.0
             for i, (hs, ws) in enumerate(level_sizes)]
    occs = [jax.random.normal(ks[5 + i], (B, 1, hs, ws), jnp.float32)
            for i, (hs, ws) in enumerate(level_sizes)]
    target1 = jax.random.normal(ks[10], (B, 2, H, W), jnp.float32) * 3.0
    target_occ1 = (jax.random.uniform(ks[11], (B, 1, H, W)) > 0.5
                   ).astype(jnp.float32)

    # eval-branch inputs: full-resolution flow prediction + occ logits
    flow_full = jax.random.normal(ks[12], (B, 2, H, W), jnp.float32) * 2.0
    occ_full = jax.random.normal(ks[13], (B, 1, H, W), jnp.float32)

    # training-mode forward
    train_out = multiscale_epe_pwc_occ_train(
        flows, occs, target1, target_occ1,
        model_div_flow=model_div_flow, batch_size=B)
    jax.block_until_ready(train_out["total_loss"])

    # eval-mode forward
    eval_out = multiscale_epe_pwc_occ_eval(flow_full, occ_full,
                                           target1, target_occ1)
    jax.block_until_ready(eval_out["F1"])

    # quiet correctness checks against pure-JAX references
    ref_fl, ref_ol, ref_tot = _ref_train(flows, occs, target1, target_occ1,
                                         model_div_flow, B)
    ref_epe, ref_f1 = _ref_eval(flow_full, occ_full, target1, target_occ1)

    np.testing.assert_allclose(np.asarray(train_out["flow_loss"]),
                               np.asarray(ref_fl), rtol=2e-3, atol=2e-3)
    np.testing.assert_allclose(np.asarray(train_out["occ_loss"]),
                               np.asarray(ref_ol), rtol=2e-3, atol=2e-3)
    np.testing.assert_allclose(np.asarray(train_out["total_loss"]),
                               np.asarray(ref_tot), rtol=2e-3, atol=2e-3)
    np.testing.assert_allclose(np.asarray(eval_out["epe"]),
                               np.asarray(ref_epe), rtol=1e-4, atol=1e-4)
    np.testing.assert_allclose(np.asarray(eval_out["F1"]),
                               np.asarray(ref_f1), rtol=1e-4, atol=1e-4)

    print("KERNEL_OK")
</pallas_src>

<mosaic_0001>
module attributes {stable_mosaic.version = 11 : i64} {
  func.func @_train_kernel(%arg0: i32, %arg1: i32, %arg2: memref<1x2x32x32xf32, #tpu.memory_space<vmem>>, %arg3: memref<1x1x32x32xf32, #tpu.memory_space<vmem>>, %arg4: memref<1x2x8x8xf32, #tpu.memory_space<vmem>>, %arg5: memref<1x2x8x8xf32, #tpu.memory_space<vmem>>, %arg6: memref<1x2x16x16xf32, #tpu.memory_space<vmem>>, %arg7: memref<1x2x16x16xf32, #tpu.memory_space<vmem>>, %arg8: memref<1x2x32x32xf32, #tpu.memory_space<vmem>>, %arg9: memref<1x1x8x8xf32, #tpu.memory_space<vmem>>, %arg10: memref<1x1x8x8xf32, #tpu.memory_space<vmem>>, %arg11: memref<1x1x16x16xf32, #tpu.memory_space<vmem>>, %arg12: memref<1x1x16x16xf32, #tpu.memory_space<vmem>>, %arg13: memref<1x1x32x32xf32, #tpu.memory_space<vmem>>, %arg14: memref<1x56x32xf32, #tpu.memory_space<vmem>>, %arg15: memref<32x8xf32, #tpu.memory_space<vmem>>, %arg16: memref<32x16xf32, #tpu.memory_space<vmem>>, %arg17: memref<32x32xf32, #tpu.memory_space<vmem>>, %arg18: memref<1x1x128xf32, #tpu.memory_space<vmem>>, %arg19: memref<1x1x128xf32, #tpu.memory_space<vmem>>, %arg20: memref<56x32xf32, #tpu.memory_space<vmem>>, %arg21: memref<56x32xf32, #tpu.memory_space<vmem>>, %arg22: memref<56x32xf32, #tpu.memory_space<vmem>>) attributes {dimension_semantics = [#tpu.dimension_semantics<parallel>, #tpu.dimension_semantics<arbitrary>], iteration_bounds = array<i64: 2, 1>, scalar_prefetch = 0 : i64, scratch_operands = 3 : i64, tpu.core_type = #tpu.core_type<tc>, window_params = [{transform_indices = @transform_0, window_bounds = array<i64: 1, 2, 32, 32>}, {transform_indices = @transform_1, window_bounds = array<i64: 1, 1, 32, 32>}, {transform_indices = @transform_2, window_bounds = array<i64: 1, 2, 8, 8>}, {transform_indices = @transform_3, window_bounds = array<i64: 1, 2, 8, 8>}, {transform_indices = @transform_4, window_bounds = array<i64: 1, 2, 16, 16>}, {transform_indices = @transform_5, window_bounds = array<i64: 1, 2, 16, 16>}, {transform_indices = @transform_6, window_bounds = array<i64: 1, 2, 32, 32>}, {transform_indices = @transform_7, window_bounds = array<i64: 1, 1, 8, 8>}, {transform_indices = @transform_8, window_bounds = array<i64: 1, 1, 8, 8>}, {transform_indices = @transform_9, window_bounds = array<i64: 1, 1, 16, 16>}, {transform_indices = @transform_10, window_bounds = array<i64: 1, 1, 16, 16>}, {transform_indices = @transform_11, window_bounds = array<i64: 1, 1, 32, 32>}, {transform_indices = @transform_12, window_bounds = array<i64: 1, 56, 32>}, {pipeline_mode = #tpu.pipeline_mode<synchronous>, transform_indices = @transform_13, window_bounds = array<i64: 32, 8>}, {pipeline_mode = #tpu.pipeline_mode<synchronous>, transform_indices = @transform_14, window_bounds = array<i64: 32, 16>}, {pipeline_mode = #tpu.pipeline_mode<synchronous>, transform_indices = @transform_15, window_bounds = array<i64: 32, 32>}, {transform_indices = @transform_16, window_bounds = array<i64: 1, 1, 128>}, {transform_indices = @transform_17, window_bounds = array<i64: 1, 1, 128>}]} {
    %c0_i32 = arith.constant 0 : i32
    %0 = arith.cmpi eq, %arg1, %c0_i32 : i32
    %1 = arith.extui %0 : i1 to i32
    %c0_i32_0 = arith.constant 0 : i32
    %2 = arith.cmpi ne, %1, %c0_i32_0 : i32
    scf.if %2 {
      %cst_30 = arith.constant 0.000000e+00 : f32
      %26 = vector.broadcast %cst_30 : f32 to vector<56x32xf32>
      %c0_31 = arith.constant 0 : index
      %c0_32 = arith.constant 0 : index
      %27 = vector.load %arg20[%c0_31, %c0_32] : memref<56x32xf32, #tpu.memory_space<vmem>>, vector<56x32xf32>
      tpu.vector_store %arg20[%c0_31, %c0_32], %26 {strides = array<i32>} : memref<56x32xf32, #tpu.memory_space<vmem>>, vector<56x32xf32>,
      %cst_33 = arith.constant 0.000000e+00 : f32
      %28 = vector.broadcast %cst_33 : f32 to vector<56x32xf32>
      %c0_34 = arith.constant 0 : index
      %c0_35 = arith.constant 0 : index
      %29 = vector.load %arg21[%c0_34, %c0_35] : memref<56x32xf32, #tpu.memory_space<vmem>>, vector<56x32xf32>
      tpu.vector_store %arg21[%c0_34, %c0_35], %28 {strides = array<i32>} : memref<56x32xf32, #tpu.memory_space<vmem>>, vector<56x32xf32>,
      %cst_36 = arith.constant 0.000000e+00 : f32
      %30 = vector.broadcast %cst_36 : f32 to vector<56x32xf32>
      %c0_37 = arith.constant 0 : index
      %c0_38 = arith.constant 0 : index
      %31 = vector.load %arg22[%c0_37, %c0_38] : memref<56x32xf32, #tpu.memory_space<vmem>>, vector<56x32xf32>
      tpu.vector_store %arg22[%c0_37, %c0_38], %30 {strides = array<i32>} : memref<56x32xf32, #tpu.memory_space<vmem>>, vector<56x32xf32>,
    } else {
    }
    %c0 = arith.constant 0 : index
    %c0_1 = arith.constant 0 : index
    %c0_2 = arith.constant 0 : index
    %3 = vector.load %arg14[%c0, %c0_1, %c0_2] : memref<1x56x32xf32, #tpu.memory_space<vmem>>, vector<1x56x32xf32>
    %4 = vector.shape_cast %3 : vector<1x56x32xf32> to vector<56x32xf32>
    %c0_3 = arith.constant 0 : index
    %c0_4 = arith.constant 0 : index
    %c0_5 = arith.constant 0 : index
    %c0_6 = arith.constant 0 : index
    %5 = vector.load %arg2[%c0_3, %c0_4, %c0_5, %c0_6] : memref<1x2x32x32xf32, #tpu.memory_space<vmem>>, vector<1x1x32x32xf32>
    %6 = vector.shape_cast %5 : vector<1x1x32x32xf32> to vector<32x32xf32>
    %c0_7 = arith.constant 0 : index
    %c1 = arith.constant 1 : index
    %c0_8 = arith.constant 0 : index
    %c0_9 = arith.constant 0 : index
    %7 = vector.load %arg2[%c0_7, %c1, %c0_8, %c0_9] : memref<1x2x32x32xf32, #tpu.memory_space<vmem>>, vector<1x1x32x32xf32>
    %8 = vector.shape_cast %7 : vector<1x1x32x32xf32> to vector<32x32xf32>
    %c0_10 = arith.constant 0 : index
    %c0_11 = arith.constant 0 : index
    %c0_12 = arith.constant 0 : index
    %c0_13 = arith.constant 0 : index
    %9 = vector.load %arg3[%c0_10, %c0_11, %c0_12, %c0_13] : memref<1x1x32x32xf32, #tpu.memory_space<vmem>>, vector<1x1x32x32xf32>
    %10 = vector.shape_cast %9 : vector<1x1x32x32xf32> to vector<32x32xf32>
    %c0_14 = arith.constant 0 : index
    %c0_15 = arith.constant 0 : index
    %11 = vector.load %arg20[%c0_14, %c0_15] : memref<56x32xf32, #tpu.memory_space<vmem>>, vector<56x32xf32>
    %cst = arith.constant dense<0.000000e+00> : vector<56x32xf32>
    %12 = tpu.matmul %4, %6, %cst {dimension_numbers = #tpu.dot_dimension_numbers<[1], [0], [0], [1], [0, 0, 1, 1], [], []>} : vector<56x32xf32>, vector<32x32xf32>, vector<56x32xf32> -> vector<56x32xf32>
    %13 = arith.addf %11, %12 : vector<56x32xf32>
    %c0_16 = arith.constant 0 : index
    %c0_17 = arith.constant 0 : index
    %14 = vector.load %arg20[%c0_16, %c0_17] : memref<56x32xf32, #tpu.memory_space<vmem>>, vector<56x32xf32>
    tpu.vector_store %arg20[%c0_16, %c0_17], %13 {strides = array<i32>} : memref<56x32xf32, #tpu.memory_space<vmem>>, vector<56x32xf32>,
    %c0_18 = arith.constant 0 : index
    %c0_19 = arith.constant 0 : index
    %15 = vector.load %arg21[%c0_18, %c0_19] : memref<56x32xf32, #tpu.memory_space<vmem>>, vector<56x32xf32>
    %cst_20 = arith.constant dense<0.000000e+00> : vector<56x32xf32>
    %16 = tpu.matmul %4, %8, %cst_20 {dimension_numbers = #tpu.dot_dimension_numbers<[1], [0], [0], [1], [0, 0, 1, 1], [], []>} : vector<56x32xf32>, vector<32x32xf32>, vector<56x32xf32> -> vector<56x32xf32>
    %17 = arith.addf %15, %16 : vector<56x32xf32>
    %c0_21 = arith.constant 0 : index
    %c0_22 = arith.constant 0 : index
    %18 = vector.load %arg21[%c0_21, %c0_22] : memref<56x32xf32, #tpu.memory_space<vmem>>, vector<56x32xf32>
    tpu.vector_store %arg21[%c0_21, %c0_22], %17 {strides = array<i32>} : memref<56x32xf32, #tpu.memory_space<vmem>>, vector<56x32xf32>,
    %c0_23 = arith.constant 0 : index
    %c0_24 = arith.constant 0 : index
    %19 = vector.load %arg22[%c0_23, %c0_24] : memref<56x32xf32, #tpu.memory_space<vmem>>, vector<56x32xf32>
    %cst_25 = arith.constant dense<0.000000e+00> : vector<56x32xf32>
    %20 = tpu.matmul %4, %10, %cst_25 {dimension_numbers = #tpu.dot_dimension_numbers<[1], [0], [0], [1], [0, 0, 1, 1], [], []>} : vector<56x32xf32>, vector<32x32xf32>, vector<56x32xf32> -> vector<56x32xf32>
    %21 = arith.addf %19, %20 : vector<56x32xf32>
    %c0_26 = arith.constant 0 : index
    %c0_27 = arith.constant 0 : index
    %22 = vector.load %arg22[%c0_26, %c0_27] : memref<56x32xf32, #tpu.memory_space<vmem>>, vector<56x32xf32>
    tpu.vector_store %arg22[%c0_26, %c0_27], %21 {strides = array<i32>} : memref<56x32xf32, #tpu.memory_space<vmem>>, vector<56x32xf32>,
    %c0_i32_28 = arith.constant 0 : i32
    %23 = arith.cmpi eq, %arg1, %c0_i32_28 : i32
    %24 = arith.extui %23 : i1 to i32
    %c0_i32_29 = arith.constant 0 : i32
    %25 = arith.cmpi ne, %24, %c0_i32_29 : i32
    scf.if %25 {
      %c0_30 = arith.constant 0 : index
      %c0_31 = arith.constant 0 : index
      %26 = vector.load %arg20[%c0_30, %c0_31] : memref<56x32xf32, #tpu.memory_space<vmem>>, vector<56x32xf32>
      %c0_32 = arith.constant 0 : index
      %c0_33 = arith.constant 0 : index
      %27 = vector.load %arg21[%c0_32, %c0_33] : memref<56x32xf32, #tpu.memory_space<vmem>>, vector<56x32xf32>
      %c0_34 = arith.constant 0 : index
      %c0_35 = arith.constant 0 : index
      %28 = vector.load %arg22[%c0_34, %c0_35] : memref<56x32xf32, #tpu.memory_space<vmem>>, vector<56x32xf32>
      %c0_36 = arith.constant 0 : index
      %c0_37 = arith.constant 0 : index
      %29 = vector.load %arg15[%c0_36, %c0_37] : memref<32x8xf32, #tpu.memory_space<vmem>>, vector<32x8xf32>
      %c0_38 = arith.constant 0 : index
      %c0_39 = arith.constant 0 : index
      %30 = vector.load %arg16[%c0_38, %c0_39] : memref<32x16xf32, #tpu.memory_space<vmem>>, vector<32x16xf32>
      %c0_40 = arith.constant 0 : index
      %c0_41 = arith.constant 0 : index
      %31 = vector.load %arg17[%c0_40, %c0_41] : memref<32x32xf32, #tpu.memory_space<vmem>>, vector<32x32xf32>
      %32 = tpu.iota {dimensions = array<i32: 1>} : vector<1x128xi32>
      %cst_42 = arith.constant 0.000000e+00 : f32
      %33 = vector.broadcast %cst_42 : f32 to vector<1x128xf32>
      %cst_43 = arith.constant 0.000000e+00 : f32
      %34 = vector.broadcast %cst_43 : f32 to vector<1x128xf32>
      %35 = vector.extract_strided_slice %26 {offsets = [0, 0], sizes = [8, 32], strides = [1, 1]} : vector<56x32xf32> to vector<8x32xf32>
      %cst_44 = arith.constant dense<0.000000e+00> : vector<8x8xf32>
      %36 = tpu.matmul %35, %29, %cst_44 {dimension_numbers = #tpu.dot_dimension_numbers<[1], [0], [0], [1], [0, 0, 1, 1], [], []>} : vector<8x32xf32>, vector<32x8xf32>, vector<8x8xf32> -> vector<8x8xf32>
      %37 = vector.extract_strided_slice %27 {offsets = [0, 0], sizes = [8, 32], strides = [1, 1]} : vector<56x32xf32> to vector<8x32xf32>
      %cst_45 = arith.constant dense<0.000000e+00> : vector<8x8xf32>
      %38 = tpu.matmul %37, %29, %cst_45 {dimension_numbers = #tpu.dot_dimension_numbers<[1], [0], [0], [1], [0, 0, 1, 1], [], []>} : vector<8x32xf32>, vector<32x8xf32>, vector<8x8xf32> -> vector<8x8xf32>
      %cst_46 = arith.constant 5.000000e-02 : f32
      %39 = vector.broadcast %cst_46 : f32 to vector<8x8xf32>
      %40 = arith.mulf %36, %39 : vector<8x8xf32>
      %c0_47 = arith.constant 0 : index
      %c0_48 = arith.constant 0 : index
      %c0_49 = arith.constant 0 : index
      %c0_50 = arith.constant 0 : index
      %41 = vector.load %arg4[%c0_47, %c0_48, %c0_49, %c0_50] : memref<1x2x8x8xf32, #tpu.memory_space<vmem>>, vector<1x1x8x8xf32>
      %42 = vector.shape_cast %41 : vector<1x1x8x8xf32> to vector<8x8xf32>
      %43 = arith.subf %40, %42 : vector<8x8xf32>
      %cst_51 = arith.constant 5.000000e-02 : f32
      %44 = vector.broadcast %cst_51 : f32 to vector<8x8xf32>
      %45 = arith.mulf %38, %44 : vector<8x8xf32>
      %c0_52 = arith.constant 0 : index
      %c1_53 = arith.constant 1 : index
      %c0_54 = arith.constant 0 : index
      %c0_55 = arith.constant 0 : index
      %46 = vector.load %arg4[%c0_52, %c1_53, %c0_54, %c0_55] : memref<1x2x8x8xf32, #tpu.memory_space<vmem>>, vector<1x1x8x8xf32>
      %47 = vector.shape_cast %46 : vector<1x1x8x8xf32> to vector<8x8xf32>
      %48 = arith.subf %45, %47 : vector<8x8xf32>
      %49 = arith.mulf %43, %43 : vector<8x8xf32>
      %50 = arith.mulf %48, %48 : vector<8x8xf32>
      %51 = arith.addf %49, %50 : vector<8x8xf32>
      %52 = math.sqrt %51 : vector<8x8xf32>
      %53 = vector.shape_cast %52 : vector<8x8xf32> to vector<1x8x8xf32>
      %cst_56 = arith.constant dense<0.000000e+00> : vector<1xf32>
      %54 = vector.multi_reduction <add>, %53, %cst_56 [1, 2] : vector<1x8x8xf32> to vector<1xf32>
      %55 = vector.shape_cast %54 : vector<1xf32> to vector<1x1x1xf32>
      %56 = vector.extract %55[0, 0, 0] : f32 from vector<1x1x1xf32>
      %57 = vector.broadcast %56 : f32 to vector<1x1xf32>
      %58 = vector.extract_strided_slice %28 {offsets = [0, 0], sizes = [8, 32], strides = [1, 1]} : vector<56x32xf32> to vector<8x32xf32>
      %cst_57 = arith.constant dense<0.000000e+00> : vector<8x8xf32>
      %59 = tpu.matmul %58, %29, %cst_57 {dimension_numbers = #tpu.dot_dimension_numbers<[1], [0], [0], [1], [0, 0, 1, 1], [], []>} : vector<8x32xf32>, vector<32x8xf32>, vector<8x8xf32> -> vector<8x8xf32>
      %c0_58 = arith.constant 0 : index
      %c0_59 = arith.constant 0 : index
      %c0_60 = arith.constant 0 : index
      %c0_61 = arith.constant 0 : index
      %60 = vector.load %arg9[%c0_58, %c0_59, %c0_60, %c0_61] : memref<1x1x8x8xf32, #tpu.memory_space<vmem>>, vector<1x1x8x8xf32>
      %61 = vector.shape_cast %60 : vector<1x1x8x8xf32> to vector<8x8xf32>
      %cst_62 = arith.constant 0.000000e+00 : f32
      %62 = vector.broadcast %cst_62 : f32 to vector<8x8xf32>
      %63 = arith.subf %62, %61 : vector<8x8xf32>
      %64 = math.exp %63 : vector<8x8xf32>
      %cst_63 = arith.constant 1.000000e+00 : f32
      %65 = vector.broadcast %cst_63 : f32 to vector<8x8xf32>
      %66 = arith.addf %65, %64 : vector<8x8xf32>
      %cst_64 = arith.constant 1.000000e+00 : f32
      %67 = vector.broadcast %cst_64 : f32 to vector<8x8xf32>
      %68 = arith.divf %67, %66 : vector<8x8xf32>
      %cst_65 = arith.constant 9.99999993E-9 : f32
      %69 = vector.broadcast %cst_65 : f32 to vector<8x8xf32>
      %70 = arith.addf %68, %69 : vector<8x8xf32>
      %71 = math.log %70 : vector<8x8xf32>
      %72 = arith.mulf %59, %71 : vector<8x8xf32>
      %73 = vector.shape_cast %72 : vector<8x8xf32> to vector<1x8x8xf32>
      %cst_66 = arith.constant dense<0.000000e+00> : vector<1xf32>
      %74 = vector.multi_reduction <add>, %73, %cst_66 [1, 2] : vector<1x8x8xf32> to vector<1xf32>
      %75 = vector.shape_cast %74 : vector<1xf32> to vector<1x1x1xf32>
      %76 = vector.extract %75[0, 0, 0] : f32 from vector<1x1x1xf32>
      %77 = vector.broadcast %76 : f32 to vector<1x1xf32>
      %cst_67 = arith.constant 0.000000e+00 : f32
      %78 = vector.broadcast %cst_67 : f32 to vector<1x1xf32>
      %79 = arith.subf %78, %77 : vector<1x1xf32>
      %cst_68 = arith.constant 1.000000e+00 : f32
      %80 = vector.broadcast %cst_68 : f32 to vector<8x8xf32>
      %81 = arith.subf %80, %59 : vector<8x8xf32>
      %cst_69 = arith.constant 1.000000e+00 : f32
      %82 = vector.broadcast %cst_69 : f32 to vector<8x8xf32>
      %83 = arith.subf %82, %68 : vector<8x8xf32>
      %cst_70 = arith.constant 9.99999993E-9 : f32
      %84 = vector.broadcast %cst_70 : f32 to vector<8x8xf32>
      %85 = arith.addf %83, %84 : vector<8x8xf32>
      %86 = math.log %85 : vector<8x8xf32>
      %87 = arith.mulf %81, %86 : vector<8x8xf32>
      %88 = vector.shape_cast %87 : vector<8x8xf32> to vector<1x8x8xf32>
      %cst_71 = arith.constant dense<0.000000e+00> : vector<1xf32>
      %89 = vector.multi_reduction <add>, %88, %cst_71 [1, 2] : vector<1x8x8xf32> to vector<1xf32>
      %90 = vector.shape_cast %89 : vector<1xf32> to vector<1x1x1xf32>
      %91 = vector.extract %90[0, 0, 0] : f32 from vector<1x1x1xf32>
      %92 = vector.broadcast %91 : f32 to vector<1x1xf32>
      %cst_72 = arith.constant 0.000000e+00 : f32
      %93 = vector.broadcast %cst_72 : f32 to vector<1x1xf32>
      %94 = arith.subf %93, %92 : vector<1x1xf32>
      %95 = vector.shape_cast %59 : vector<8x8xf32> to vector<1x8x8xf32>
      %cst_73 = arith.constant dense<0.000000e+00> : vector<1xf32>
      %96 = vector.multi_reduction <add>, %95, %cst_73 [1, 2] : vector<1x8x8xf32> to vector<1xf32>
      %97 = vector.shape_cast %96 : vector<1xf32> to vector<1x1x1xf32>
      %98 = vector.extract %97[0, 0, 0] : f32 from vector<1x1x1xf32>
      %99 = vector.broadcast %98 : f32 to vector<1x1xf32>
      %100 = vector.shape_cast %68 : vector<8x8xf32> to vector<1x8x8xf32>
      %cst_74 = arith.constant dense<0.000000e+00> : vector<1xf32>
      %101 = vector.multi_reduction <add>, %100, %cst_74 [1, 2] : vector<1x8x8xf32> to vector<1xf32>
      %102 = vector.shape_cast %101 : vector<1xf32> to vector<1x1x1xf32>
      %103 = vector.extract %102[0, 0, 0] : f32 from vector<1x1x1xf32>
      %104 = vector.broadcast %103 : f32 to vector<1x1xf32>
      %105 = arith.addf %99, %104 : vector<1x1xf32>
      %cst_75 = arith.constant 9.99999993E-9 : f32
      %106 = vector.broadcast %cst_75 : f32 to vector<1x1xf32>
      %107 = arith.addf %105, %106 : vector<1x1xf32>
      %cst_76 = arith.constant 1.000000e+00 : f32
      %108 = vector.broadcast %cst_76 : f32 to vector<8x8xf32>
      %109 = arith.subf %108, %59 : vector<8x8xf32>
      %110 = vector.shape_cast %109 : vector<8x8xf32> to vector<1x8x8xf32>
      %cst_77 = arith.constant dense<0.000000e+00> : vector<1xf32>
      %111 = vector.multi_reduction <add>, %110, %cst_77 [1, 2] : vector<1x8x8xf32> to vector<1xf32>
      %112 = vector.shape_cast %111 : vector<1xf32> to vector<1x1x1xf32>
      %113 = vector.extract %112[0, 0, 0] : f32 from vector<1x1x1xf32>
      %114 = vector.broadcast %113 : f32 to vector<1x1xf32>
      %cst_78 = arith.constant 1.000000e+00 : f32
      %115 = vector.broadcast %cst_78 : f32 to vector<8x8xf32>
      %116 = arith.subf %115, %68 : vector<8x8xf32>
      %117 = vector.shape_cast %116 : vector<8x8xf32> to vector<1x8x8xf32>
      %cst_79 = arith.constant dense<0.000000e+00> : vector<1xf32>
      %118 = vector.multi_reduction <add>, %117, %cst_79 [1, 2] : vector<1x8x8xf32> to vector<1xf32>
      %119 = vector.shape_cast %118 : vector<1xf32> to vector<1x1x1xf32>
      %120 = vector.extract %119[0, 0, 0] : f32 from vector<1x1x1xf32>
      %121 = vector.broadcast %120 : f32 to vector<1x1xf32>
      %122 = arith.addf %114, %121 : vector<1x1xf32>
      %cst_80 = arith.constant 9.99999993E-9 : f32
      %123 = vector.broadcast %cst_80 : f32 to vector<1x1xf32>
      %124 = arith.addf %122, %123 : vector<1x1xf32>
      %125 = arith.divf %79, %107 : vector<1x1xf32>
      %126 = arith.divf %94, %124 : vector<1x1xf32>
      %127 = arith.addf %125, %126 : vector<1x1xf32>
      %c0_i32_81 = arith.constant 0 : i32
      %128 = vector.broadcast %c0_i32_81 : i32 to vector<1x128xi32>
      %129 = arith.cmpi eq, %32, %128 : vector<1x128xi32>
      %130 = vector.shape_cast %57 : vector<1x1xf32> to vector<1x1xf32>
      %131 = vector.broadcast %130 : vector<1x1xf32> to vector<1x128xf32>
      %132 = arith.select %129, %131, %33 : vector<1x128xi1>, vector<1x128xf32>
      %c0_i32_82 = arith.constant 0 : i32
      %133 = vector.broadcast %c0_i32_82 : i32 to vector<1x128xi32>
      %134 = arith.cmpi eq, %32, %133 : vector<1x128xi32>
      %135 = vector.shape_cast %127 : vector<1x1xf32> to vector<1x1xf32>
      %136 = vector.broadcast %135 : vector<1x1xf32> to vector<1x128xf32>
      %137 = arith.select %134, %136, %34 : vector<1x128xi1>, vector<1x128xf32>
      %cst_83 = arith.constant 5.000000e-02 : f32
      %138 = vector.broadcast %cst_83 : f32 to vector<8x8xf32>
      %139 = arith.mulf %36, %138 : vector<8x8xf32>
      %c0_84 = arith.constant 0 : index
      %c0_85 = arith.constant 0 : index
      %c0_86 = arith.constant 0 : index
      %c0_87 = arith.constant 0 : index
      %140 = vector.load %arg5[%c0_84, %c0_85, %c0_86, %c0_87] : memref<1x2x8x8xf32, #tpu.memory_space<vmem>>, vector<1x1x8x8xf32>
      %141 = vector.shape_cast %140 : vector<1x1x8x8xf32> to vector<8x8xf32>
      %142 = arith.subf %139, %141 : vector<8x8xf32>
      %cst_88 = arith.constant 5.000000e-02 : f32
      %143 = vector.broadcast %cst_88 : f32 to vector<8x8xf32>
      %144 = arith.mulf %38, %143 : vector<8x8xf32>
      %c0_89 = arith.constant 0 : index
      %c1_90 = arith.constant 1 : index
      %c0_91 = arith.constant 0 : index
      %c0_92 = arith.constant 0 : index
      %145 = vector.load %arg5[%c0_89, %c1_90, %c0_91, %c0_92] : memref<1x2x8x8xf32, #tpu.memory_space<vmem>>, vector<1x1x8x8xf32>
      %146 = vector.shape_cast %145 : vector<1x1x8x8xf32> to vector<8x8xf32>
      %147 = arith.subf %144, %146 : vector<8x8xf32>
      %148 = arith.mulf %142, %142 : vector<8x8xf32>
      %149 = arith.mulf %147, %147 : vector<8x8xf32>
      %150 = arith.addf %148, %149 : vector<8x8xf32>
      %151 = math.sqrt %150 : vector<8x8xf32>
      %152 = vector.shape_cast %151 : vector<8x8xf32> to vector<1x8x8xf32>
      %cst_93 = arith.constant dense<0.000000e+00> : vector<1xf32>
      %153 = vector.multi_reduction <add>, %152, %cst_93 [1, 2] : vector<1x8x8xf32> to vector<1xf32>
      %154 = vector.shape_cast %153 : vector<1xf32> to vector<1x1x1xf32>
      %155 = vector.extract %154[0, 0, 0] : f32 from vector<1x1x1xf32>
      %156 = vector.broadcast %155 : f32 to vector<1x1xf32>
      %c0_94 = arith.constant 0 : index
      %c0_95 = arith.constant 0 : index
      %c0_96 = arith.constant 0 : index
      %c0_97 = arith.constant 0 : index
      %157 = vector.load %arg10[%c0_94, %c0_95, %c0_96, %c0_97] : memref<1x1x8x8xf32, #tpu.memory_space<vmem>>, vector<1x1x8x8xf32>
      %158 = vector.shape_cast %157 : vector<1x1x8x8xf32> to vector<8x8xf32>
      %cst_98 = arith.constant 0.000000e+00 : f32
      %159 = vector.broadcast %cst_98 : f32 to vector<8x8xf32>
      %160 = arith.subf %159, %158 : vector<8x8xf32>
      %161 = math.exp %160 : vector<8x8xf32>
      %cst_99 = arith.constant 1.000000e+00 : f32
      %162 = vector.broadcast %cst_99 : f32 to vector<8x8xf32>
      %163 = arith.addf %162, %161 : vector<8x8xf32>
      %cst_100 = arith.constant 1.000000e+00 : f32
      %164 = vector.broadcast %cst_100 : f32 to vector<8x8xf32>
      %165 = arith.divf %164, %163 : vector<8x8xf32>
      %cst_101 = arith.constant 9.99999993E-9 : f32
      %166 = vector.broadcast %cst_101 : f32 to vector<8x8xf32>
      %167 = arith.addf %165, %166 : vector<8x8xf32>
      %168 = math.log %167 : vector<8x8xf32>
      %169 = arith.mulf %59, %168 : vector<8x8xf32>
      %170 = vector.shape_cast %169 : vector<8x8xf32> to vector<1x8x8xf32>
      %cst_102 = arith.constant dense<0.000000e+00> : vector<1xf32>
      %171 = vector.multi_reduction <add>, %170, %cst_102 [1, 2] : vector<1x8x8xf32> to vector<1xf32>
      %172 = vector.shape_cast %171 : vector<1xf32> to vector<1x1x1xf32>
      %173 = vector.extract %172[0, 0, 0] : f32 from vector<1x1x1xf32>
      %174 = vector.broadcast %173 : f32 to vector<1x1xf32>
      %cst_103 = arith.constant 0.000000e+00 : f32
      %175 = vector.broadcast %cst_103 : f32 to vector<1x1xf32>
      %176 = arith.subf %175, %174 : vector<1x1xf32>
      %cst_104 = arith.constant 1.000000e+00 : f32
      %177 = vector.broadcast %cst_104 : f32 to vector<8x8xf32>
      %178 = arith.subf %177, %59 : vector<8x8xf32>
      %cst_105 = arith.constant 1.000000e+00 : f32
      %179 = vector.broadcast %cst_105 : f32 to vector<8x8xf32>
      %180 = arith.subf %179, %165 : vector<8x8xf32>
      %cst_106 = arith.constant 9.99999993E-9 : f32
      %181 = vector.broadcast %cst_106 : f32 to vector<8x8xf32>
      %182 = arith.addf %180, %181 : vector<8x8xf32>
      %183 = math.log %182 : vector<8x8xf32>
      %184 = arith.mulf %178, %183 : vector<8x8xf32>
      %185 = vector.shape_cast %184 : vector<8x8xf32> to vector<1x8x8xf32>
      %cst_107 = arith.constant dense<0.000000e+00> : vector<1xf32>
      %186 = vector.multi_reduction <add>, %185, %cst_107 [1, 2] : vector<1x8x8xf32> to vector<1xf32>
      %187 = vector.shape_cast %186 : vector<1xf32> to vector<1x1x1xf32>
      %188 = vector.extract %187[0, 0, 0] : f32 from vector<1x1x1xf32>
      %189 = vector.broadcast %188 : f32 to vector<1x1xf32>
      %cst_108 = arith.constant 0.000000e+00 : f32
      %190 = vector.broadcast %cst_108 : f32 to vector<1x1xf32>
      %191 = arith.subf %190, %189 : vector<1x1xf32>
      %192 = vector.shape_cast %59 : vector<8x8xf32> to vector<1x8x8xf32>
      %cst_109 = arith.constant dense<0.000000e+00> : vector<1xf32>
      %193 = vector.multi_reduction <add>, %192, %cst_109 [1, 2] : vector<1x8x8xf32> to vector<1xf32>
      %194 = vector.shape_cast %193 : vector<1xf32> to vector<1x1x1xf32>
      %195 = vector.extract %194[0, 0, 0] : f32 from vector<1x1x1xf32>
      %196 = vector.broadcast %195 : f32 to vector<1x1xf32>
      %197 = vector.shape_cast %165 : vector<8x8xf32> to vector<1x8x8xf32>
      %cst_110 = arith.constant dense<0.000000e+00> : vector<1xf32>
      %198 = vector.multi_reduction <add>, %197, %cst_110 [1, 2] : vector<1x8x8xf32> to vector<1xf32>
      %199 = vector.shape_cast %198 : vector<1xf32> to vector<1x1x1xf32>
      %200 = vector.extract %199[0, 0, 0] : f32 from vector<1x1x1xf32>
      %201 = vector.broadcast %200 : f32 to vector<1x1xf32>
      %202 = arith.addf %196, %201 : vector<1x1xf32>
      %cst_111 = arith.constant 9.99999993E-9 : f32
      %203 = vector.broadcast %cst_111 : f32 to vector<1x1xf32>
      %204 = arith.addf %202, %203 : vector<1x1xf32>
      %cst_112 = arith.constant 1.000000e+00 : f32
      %205 = vector.broadcast %cst_112 : f32 to vector<8x8xf32>
      %206 = arith.subf %205, %59 : vector<8x8xf32>
      %207 = vector.shape_cast %206 : vector<8x8xf32> to vector<1x8x8xf32>
      %cst_113 = arith.constant dense<0.000000e+00> : vector<1xf32>
      %208 = vector.multi_reduction <add>, %207, %cst_113 [1, 2] : vector<1x8x8xf32> to vector<1xf32>
      %209 = vector.shape_cast %208 : vector<1xf32> to vector<1x1x1xf32>
      %210 = vector.extract %209[0, 0, 0] : f32 from vector<1x1x1xf32>
      %211 = vector.broadcast %210 : f32 to vector<1x1xf32>
      %cst_114 = arith.constant 1.000000e+00 : f32
      %212 = vector.broadcast %cst_114 : f32 to vector<8x8xf32>
      %213 = arith.subf %212, %165 : vector<8x8xf32>
      %214 = vector.shape_cast %213 : vector<8x8xf32> to vector<1x8x8xf32>
      %cst_115 = arith.constant dense<0.000000e+00> : vector<1xf32>
      %215 = vector.multi_reduction <add>, %214, %cst_115 [1, 2] : vector<1x8x8xf32> to vector<1xf32>
      %216 = vector.shape_cast %215 : vector<1xf32> to vector<1x1x1xf32>
      %217 = vector.extract %216[0, 0, 0] : f32 from vector<1x1x1xf32>
      %218 = vector.broadcast %217 : f32 to vector<1x1xf32>
      %219 = arith.addf %211, %218 : vector<1x1xf32>
      %cst_116 = arith.constant 9.99999993E-9 : f32
      %220 = vector.broadcast %cst_116 : f32 to vector<1x1xf32>
      %221 = arith.addf %219, %220 : vector<1x1xf32>
      %222 = arith.divf %176, %204 : vector<1x1xf32>
      %223 = arith.divf %191, %221 : vector<1x1xf32>
      %224 = arith.addf %222, %223 : vector<1x1xf32>
      %c1_i32 = arith.constant 1 : i32
      %225 = vector.broadcast %c1_i32 : i32 to vector<1x128xi32>
      %226 = arith.cmpi eq, %32, %225 : vector<1x128xi32>
      %227 = vector.shape_cast %156 : vector<1x1xf32> to vector<1x1xf32>
      %228 = vector.broadcast %227 : vector<1x1xf32> to vector<1x128xf32>
      %229 = arith.select %226, %228, %132 : vector<1x128xi1>, vector<1x128xf32>
      %c1_i32_117 = arith.constant 1 : i32
      %230 = vector.broadcast %c1_i32_117 : i32 to vector<1x128xi32>
      %231 = arith.cmpi eq, %32, %230 : vector<1x128xi32>
      %232 = vector.shape_cast %224 : vector<1x1xf32> to vector<1x1xf32>
      %233 = vector.broadcast %232 : vector<1x1xf32> to vector<1x128xf32>
      %234 = arith.select %231, %233, %137 : vector<1x128xi1>, vector<1x128xf32>
      %235 = vector.extract_strided_slice %26 {offsets = [8, 0], sizes = [16, 32], strides = [1, 1]} : vector<56x32xf32> to vector<16x32xf32>
      %cst_118 = arith.constant dense<0.000000e+00> : vector<16x16xf32>
      %236 = tpu.matmul %235, %30, %cst_118 {dimension_numbers = #tpu.dot_dimension_numbers<[1], [0], [0], [1], [0, 0, 1, 1], [], []>} : vector<16x32xf32>, vector<32x16xf32>, vector<16x16xf32> -> vector<16x16xf32>
      %237 = vector.extract_strided_slice %27 {offsets = [8, 0], sizes = [16, 32], strides = [1, 1]} : vector<56x32xf32> to vector<16x32xf32>
      %cst_119 = arith.constant dense<0.000000e+00> : vector<16x16xf32>
      %238 = tpu.matmul %237, %30, %cst_119 {dimension_numbers = #tpu.dot_dimension_numbers<[1], [0], [0], [1], [0, 0, 1, 1], [], []>} : vector<16x32xf32>, vector<32x16xf32>, vector<16x16xf32> -> vector<16x16xf32>
      %cst_120 = arith.constant 5.000000e-02 : f32
      %239 = vector.broadcast %cst_120 : f32 to vector<16x16xf32>
      %240 = arith.mulf %236, %239 : vector<16x16xf32>
      %c0_121 = arith.constant 0 : index
      %c0_122 = arith.constant 0 : index
      %c0_123 = arith.constant 0 : index
      %c0_124 = arith.constant 0 : index
      %241 = vector.load %arg6[%c0_121, %c0_122, %c0_123, %c0_124] : memref<1x2x16x16xf32, #tpu.memory_space<vmem>>, vector<1x1x16x16xf32>
      %242 = vector.shape_cast %241 : vector<1x1x16x16xf32> to vector<16x16xf32>
      %243 = arith.subf %240, %242 : vector<16x16xf32>
      %cst_125 = arith.constant 5.000000e-02 : f32
      %244 = vector.broadcast %cst_125 : f32 to vector<16x16xf32>
      %245 = arith.mulf %238, %244 : vector<16x16xf32>
      %c0_126 = arith.constant 0 : index
      %c1_127 = arith.constant 1 : index
      %c0_128 = arith.constant 0 : index
      %c0_129 = arith.constant 0 : index
      %246 = vector.load %arg6[%c0_126, %c1_127, %c0_128, %c0_129] : memref<1x2x16x16xf32, #tpu.memory_space<vmem>>, vector<1x1x16x16xf32>
      %247 = vector.shape_cast %246 : vector<1x1x16x16xf32> to vector<16x16xf32>
      %248 = arith.subf %245, %247 : vector<16x16xf32>
      %249 = arith.mulf %243, %243 : vector<16x16xf32>
      %250 = arith.mulf %248, %248 : vector<16x16xf32>
      %251 = arith.addf %249, %250 : vector<16x16xf32>
      %252 = math.sqrt %251 : vector<16x16xf32>
      %253 = vector.shape_cast %252 : vector<16x16xf32> to vector<1x16x16xf32>
      %cst_130 = arith.constant dense<0.000000e+00> : vector<1xf32>
      %254 = vector.multi_reduction <add>, %253, %cst_130 [1, 2] : vector<1x16x16xf32> to vector<1xf32>
      %255 = vector.shape_cast %254 : vector<1xf32> to vector<1x1x1xf32>
      %256 = vector.extract %255[0, 0, 0] : f32 from vector<1x1x1xf32>
      %257 = vector.broadcast %256 : f32 to vector<1x1xf32>
      %258 = vector.extract_strided_slice %28 {offsets = [8, 0], sizes = [16, 32], strides = [1, 1]} : vector<56x32xf32> to vector<16x32xf32>
      %cst_131 = arith.constant dense<0.000000e+00> : vector<16x16xf32>
      %259 = tpu.matmul %258, %30, %cst_131 {dimension_numbers = #tpu.dot_dimension_numbers<[1], [0], [0], [1], [0, 0, 1, 1], [], []>} : vector<16x32xf32>, vector<32x16xf32>, vector<16x16xf32> -> vector<16x16xf32>
      %c0_132 = arith.constant 0 : index
      %c0_133 = arith.constant 0 : index
      %c0_134 = arith.constant 0 : index
      %c0_135 = arith.constant 0 : index
      %260 = vector.load %arg11[%c0_132, %c0_133, %c0_134, %c0_135] : memref<1x1x16x16xf32, #tpu.memory_space<vmem>>, vector<1x1x16x16xf32>
      %261 = vector.shape_cast %260 : vector<1x1x16x16xf32> to vector<16x16xf32>
      %cst_136 = arith.constant 0.000000e+00 : f32
      %262 = vector.broadcast %cst_136 : f32 to vector<16x16xf32>
      %263 = arith.subf %262, %261 : vector<16x16xf32>
      %264 = math.exp %263 : vector<16x16xf32>
      %cst_137 = arith.constant 1.000000e+00 : f32
      %265 = vector.broadcast %cst_137 : f32 to vector<16x16xf32>
      %266 = arith.addf %265, %264 : vector<16x16xf32>
      %cst_138 = arith.constant 1.000000e+00 : f32
      %267 = vector.broadcast %cst_138 : f32 to vector<16x16xf32>
      %268 = arith.divf %267, %266 : vector<16x16xf32>
      %cst_139 = arith.constant 9.99999993E-9 : f32
      %269 = vector.broadcast %cst_139 : f32 to vector<16x16xf32>
      %270 = arith.addf %268, %269 : vector<16x16xf32>
      %271 = math.log %270 : vector<16x16xf32>
      %272 = arith.mulf %259, %271 : vector<16x16xf32>
      %273 = vector.shape_cast %272 : vector<16x16xf32> to vector<1x16x16xf32>
      %cst_140 = arith.constant dense<0.000000e+00> : vector<1xf32>
      %274 = vector.multi_reduction <add>, %273, %cst_140 [1, 2] : vector<1x16x16xf32> to vector<1xf32>
      %275 = vector.shape_cast %274 : vector<1xf32> to vector<1x1x1xf32>
      %276 = vector.extract %275[0, 0, 0] : f32 from vector<1x1x1xf32>
      %277 = vector.broadcast %276 : f32 to vector<1x1xf32>
      %cst_141 = arith.constant 0.000000e+00 : f32
      %278 = vector.broadcast %cst_141 : f32 to vector<1x1xf32>
      %279 = arith.subf %278, %277 : vector<1x1xf32>
      %cst_142 = arith.constant 1.000000e+00 : f32
      %280 = vector.broadcast %cst_142 : f32 to vector<16x16xf32>
      %281 = arith.subf %280, %259 : vector<16x16xf32>
      %cst_143 = arith.constant 1.000000e+00 : f32
      %282 = vector.broadcast %cst_143 : f32 to vector<16x16xf32>
      %283 = arith.subf %282, %268 : vector<16x16xf32>
      %cst_144 = arith.constant 9.99999993E-9 : f32
      %284 = vector.broadcast %cst_144 : f32 to vector<16x16xf32>
      %285 = arith.addf %283, %284 : vector<16x16xf32>
      %286 = math.log %285 : vector<16x16xf32>
      %287 = arith.mulf %281, %286 : vector<16x16xf32>
      %288 = vector.shape_cast %287 : vector<16x16xf32> to vector<1x16x16xf32>
      %cst_145 = arith.constant dense<0.000000e+00> : vector<1xf32>
      %289 = vector.multi_reduction <add>, %288, %cst_145 [1, 2] : vector<1x16x16xf32> to vector<1xf32>
      %290 = vector.shape_cast %289 : vector<1xf32> to vector<1x1x1xf32>
      %291 = vector.extract %290[0, 0, 0] : f32 from vector<1x1x1xf32>
      %292 = vector.broadcast %291 : f32 to vector<1x1xf32>
      %cst_146 = arith.constant 0.000000e+00 : f32
      %293 = vector.broadcast %cst_146 : f32 to vector<1x1xf32>
      %294 = arith.subf %293, %292 : vector<1x1xf32>
      %295 = vector.shape_cast %259 : vector<16x16xf32> to vector<1x16x16xf32>
      %cst_147 = arith.constant dense<0.000000e+00> : vector<1xf32>
      %296 = vector.multi_reduction <add>, %295, %cst_147 [1, 2] : vector<1x16x16xf32> to vector<1xf32>
      %297 = vector.shape_cast %296 : vector<1xf32> to vector<1x1x1xf32>
      %298 = vector.extract %297[0, 0, 0] : f32 from vector<1x1x1xf32>
      %299 = vector.broadcast %298 : f32 to vector<1x1xf32>
      %300 = vector.shape_cast %268 : vector<16x16xf32> to vector<1x16x16xf32>
      %cst_148 = arith.constant dense<0.000000e+00> : vector<1xf32>
      %301 = vector.multi_reduction <add>, %300, %cst_148 [1, 2] : vector<1x16x16xf32> to vector<1xf32>
      %302 = vector.shape_cast %301 : vector<1xf32> to vector<1x1x1xf32>
      %303 = vector.extract %302[0, 0, 0] : f32 from vector<1x1x1xf32>
      %304 = vector.broadcast %303 : f32 to vector<1x1xf32>
      %305 = arith.addf %299, %304 : vector<1x1xf32>
      %cst_149 = arith.constant 9.99999993E-9 : f32
      %306 = vector.broadcast %cst_149 : f32 to vector<1x1xf32>
      %307 = arith.addf %305, %306 : vector<1x1xf32>
      %cst_150 = arith.constant 1.000000e+00 : f32
      %308 = vector.broadcast %cst_150 : f32 to vector<16x16xf32>
      %309 = arith.subf %308, %259 : vector<16x16xf32>
      %310 = vector.shape_cast %309 : vector<16x16xf32> to vector<1x16x16xf32>
      %cst_151 = arith.constant dense<0.000000e+00> : vector<1xf32>
      %311 = vector.multi_reduction <add>, %310, %cst_151 [1, 2] : vector<1x16x16xf32> to vector<1xf32>
      %312 = vector.shape_cast %311 : vector<1xf32> to vector<1x1x1xf32>
      %313 = vector.extract %312[0, 0, 0] : f32 from vector<1x1x1xf32>
      %314 = vector.broadcast %313 : f32 to vector<1x1xf32>
      %cst_152 = arith.constant 1.000000e+00 : f32
      %315 = vector.broadcast %cst_152 : f32 to vector<16x16xf32>
      %316 = arith.subf %315, %268 : vector<16x16xf32>
      %317 = vector.shape_cast %316 : vector<16x16xf32> to vector<1x16x16xf32>
      %cst_153 = arith.constant dense<0.000000e+00> : vector<1xf32>
      %318 = vector.multi_reduction <add>, %317, %cst_153 [1, 2] : vector<1x16x16xf32> to vector<1xf32>
      %319 = vector.shape_cast %318 : vector<1xf32> to vector<1x1x1xf32>
      %320 = vector.extract %319[0, 0, 0] : f32 from vector<1x1x1xf32>
      %321 = vector.broadcast %320 : f32 to vector<1x1xf32>
      %322 = arith.addf %314, %321 : vector<1x1xf32>
      %cst_154 = arith.constant 9.99999993E-9 : f32
      %323 = vector.broadcast %cst_154 : f32 to vector<1x1xf32>
      %324 = arith.addf %322, %323 : vector<1x1xf32>
      %325 = arith.divf %279, %307 : vector<1x1xf32>
      %326 = arith.divf %294, %324 : vector<1x1xf32>
      %327 = arith.addf %325, %326 : vector<1x1xf32>
      %c2_i32 = arith.constant 2 : i32
      %328 = vector.broadcast %c2_i32 : i32 to vector<1x128xi32>
      %329 = arith.cmpi eq, %32, %328 : vector<1x128xi32>
      %330 = vector.shape_cast %257 : vector<1x1xf32> to vector<1x1xf32>
      %331 = vector.broadcast %330 : vector<1x1xf32> to vector<1x128xf32>
      %332 = arith.select %329, %331, %229 : vector<1x128xi1>, vector<1x128xf32>
      %c2_i32_155 = arith.constant 2 : i32
      %333 = vector.broadcast %c2_i32_155 : i32 to vector<1x128xi32>
      %334 = arith.cmpi eq, %32, %333 : vector<1x128xi32>
      %335 = vector.shape_cast %327 : vector<1x1xf32> to vector<1x1xf32>
      %336 = vector.broadcast %335 : vector<1x1xf32> to vector<1x128xf32>
      %337 = arith.select %334, %336, %234 : vector<1x128xi1>, vector<1x128xf32>
      %cst_156 = arith.constant 5.000000e-02 : f32
      %338 = vector.broadcast %cst_156 : f32 to vector<16x16xf32>
      %339 = arith.mulf %236, %338 : vector<16x16xf32>
      %c0_157 = arith.constant 0 : index
      %c0_158 = arith.constant 0 : index
      %c0_159 = arith.constant 0 : index
      %c0_160 = arith.constant 0 : index
      %340 = vector.load %arg7[%c0_157, %c0_158, %c0_159, %c0_160] : memref<1x2x16x16xf32, #tpu.memory_space<vmem>>, vector<1x1x16x16xf32>
      %341 = vector.shape_cast %340 : vector<1x1x16x16xf32> to vector<16x16xf32>
      %342 = arith.subf %339, %341 : vector<16x16xf32>
      %cst_161 = arith.constant 5.000000e-02 : f32
      %343 = vector.broadcast %cst_161 : f32 to vector<16x16xf32>
      %344 = arith.mulf %238, %343 : vector<16x16xf32>
      %c0_162 = arith.constant 0 : index
      %c1_163 = arith.constant 1 : index
      %c0_164 = arith.constant 0 : index
      %c0_165 = arith.constant 0 : index
      %345 = vector.load %arg7[%c0_162, %c1_163, %c0_164, %c0_165] : memref<1x2x16x16xf32, #tpu.memory_space<vmem>>, vector<1x1x16x16xf32>
      %346 = vector.shape_cast %345 : vector<1x1x16x16xf32> to vector<16x16xf32>
      %347 = arith.subf %344, %346 : vector<16x16xf32>
      %348 = arith.mulf %342, %342 : vector<16x16xf32>
      %349 = arith.mulf %347, %347 : vector<16x16xf32>
      %350 = arith.addf %348, %349 : vector<16x16xf32>
      %351 = math.sqrt %350 : vector<16x16xf32>
      %352 = vector.shape_cast %351 : vector<16x16xf32> to vector<1x16x16xf32>
      %cst_166 = arith.constant dense<0.000000e+00> : vector<1xf32>
      %353 = vector.multi_reduction <add>, %352, %cst_166 [1, 2] : vector<1x16x16xf32> to vector<1xf32>
      %354 = vector.shape_cast %353 : vector<1xf32> to vector<1x1x1xf32>
      %355 = vector.extract %354[0, 0, 0] : f32 from vector<1x1x1xf32>
      %356 = vector.broadcast %355 : f32 to vector<1x1xf32>
      %c0_167 = arith.constant 0 : index
      %c0_168 = arith.constant 0 : index
      %c0_169 = arith.constant 0 : index
      %c0_170 = arith.constant 0 : index
      %357 = vector.load %arg12[%c0_167, %c0_168, %c0_169, %c0_170] : memref<1x1x16x16xf32, #tpu.memory_space<vmem>>, vector<1x1x16x16xf32>
      %358 = vector.shape_cast %357 : vector<1x1x16x16xf32> to vector<16x16xf32>
      %cst_171 = arith.constant 0.000000e+00 : f32
      %359 = vector.broadcast %cst_171 : f32 to vector<16x16xf32>
      %360 = arith.subf %359, %358 : vector<16x16xf32>
      %361 = math.exp %360 : vector<16x16xf32>
      %cst_172 = arith.constant 1.000000e+00 : f32
      %362 = vector.broadcast %cst_172 : f32 to vector<16x16xf32>
      %363 = arith.addf %362, %361 : vector<16x16xf32>
      %cst_173 = arith.constant 1.000000e+00 : f32
      %364 = vector.broadcast %cst_173 : f32 to vector<16x16xf32>
      %365 = arith.divf %364, %363 : vector<16x16xf32>
      %cst_174 = arith.constant 9.99999993E-9 : f32
      %366 = vector.broadcast %cst_174 : f32 to vector<16x16xf32>
      %367 = arith.addf %365, %366 : vector<16x16xf32>
      %368 = math.log %367 : vector<16x16xf32>
      %369 = arith.mulf %259, %368 : vector<16x16xf32>
      %370 = vector.shape_cast %369 : vector<16x16xf32> to vector<1x16x16xf32>
      %cst_175 = arith.constant dense<0.000000e+00> : vector<1xf32>
      %371 = vector.multi_reduction <add>, %370, %cst_175 [1, 2] : vector<1x16x16xf32> to vector<1xf32>
      %372 = vector.shape_cast %371 : vector<1xf32> to vector<1x1x1xf32>
      %373 = vector.extract %372[0, 0, 0] : f32 from vector<1x1x1xf32>
      %374 = vector.broadcast %373 : f32 to vector<1x1xf32>
      %cst_176 = arith.constant 0.000000e+00 : f32
      %375 = vector.broadcast %cst_176 : f32 to vector<1x1xf32>
      %376 = arith.subf %375, %374 : vector<1x1xf32>
      %cst_177 = arith.constant 1.000000e+00 : f32
      %377 = vector.broadcast %cst_177 : f32 to vector<16x16xf32>
      %378 = arith.subf %377, %259 : vector<16x16xf32>
      %cst_178 = arith.constant 1.000000e+00 : f32
      %379 = vector.broadcast %cst_178 : f32 to vector<16x16xf32>
      %380 = arith.subf %379, %365 : vector<16x16xf32>
      %cst_179 = arith.constant 9.99999993E-9 : f32
      %381 = vector.broadcast %cst_179 : f32 to vector<16x16xf32>
      %382 = arith.addf %380, %381 : vector<16x16xf32>
      %383 = math.log %382 : vector<16x16xf32>
      %384 = arith.mulf %378, %383 : vector<16x16xf32>
      %385 = vector.shape_cast %384 : vector<16x16xf32> to vector<1x16x16xf32>
      %cst_180 = arith.constant dense<0.000000e+00> : vector<1xf32>
      %386 = vector.multi_reduction <add>, %385, %cst_180 [1, 2] : vector<1x16x16xf32> to vector<1xf32>
      %387 = vector.shape_cast %386 : vector<1xf32> to vector<1x1x1xf32>
      %388 = vector.extract %387[0, 0, 0] : f32 from vector<1x1x1xf32>
      %389 = vector.broadcast %388 : f32 to vector<1x1xf32>
      %cst_181 = arith.constant 0.000000e+00 : f32
      %390 = vector.broadcast %cst_181 : f32 to vector<1x1xf32>
      %391 = arith.subf %390, %389 : vector<1x1xf32>
      %392 = vector.shape_cast %259 : vector<16x16xf32> to vector<1x16x16xf32>
      %cst_182 = arith.constant dense<0.000000e+00> : vector<1xf32>
      %393 = vector.multi_reduction <add>, %392, %cst_182 [1, 2] : vector<1x16x16xf32> to vector<1xf32>
      %394 = vector.shape_cast %393 : vector<1xf32> to vector<1x1x1xf32>
      %395 = vector.extract %394[0, 0, 0] : f32 from vector<1x1x1xf32>
      %396 = vector.broadcast %395 : f32 to vector<1x1xf32>
      %397 = vector.shape_cast %365 : vector<16x16xf32> to vector<1x16x16xf32>
      %cst_183 = arith.constant dense<0.000000e+00> : vector<1xf32>
      %398 = vector.multi_reduction <add>, %397, %cst_183 [1, 2] : vector<1x16x16xf32> to vector<1xf32>
      %399 = vector.shape_cast %398 : vector<1xf32> to vector<1x1x1xf32>
      %400 = vector.extract %399[0, 0, 0] : f32 from vector<1x1x1xf32>
      %401 = vector.broadcast %400 : f32 to vector<1x1xf32>
      %402 = arith.addf %396, %401 : vector<1x1xf32>
      %cst_184 = arith.constant 9.99999993E-9 : f32
      %403 = vector.broadcast %cst_184 : f32 to vector<1x1xf32>
      %404 = arith.addf %402, %403 : vector<1x1xf32>
      %cst_185 = arith.constant 1.000000e+00 : f32
      %405 = vector.broadcast %cst_185 : f32 to vector<16x16xf32>
      %406 = arith.subf %405, %259 : vector<16x16xf32>
      %407 = vector.shape_cast %406 : vector<16x16xf32> to vector<1x16x16xf32>
      %cst_186 = arith.constant dense<0.000000e+00> : vector<1xf32>
      %408 = vector.multi_reduction <add>, %407, %cst_186 [1, 2] : vector<1x16x16xf32> to vector<1xf32>
      %409 = vector.shape_cast %408 : vector<1xf32> to vector<1x1x1xf32>
      %410 = vector.extract %409[0, 0, 0] : f32 from vector<1x1x1xf32>
      %411 = vector.broadcast %410 : f32 to vector<1x1xf32>
      %cst_187 = arith.constant 1.000000e+00 : f32
      %412 = vector.broadcast %cst_187 : f32 to vector<16x16xf32>
      %413 = arith.subf %412, %365 : vector<16x16xf32>
      %414 = vector.shape_cast %413 : vector<16x16xf32> to vector<1x16x16xf32>
      %cst_188 = arith.constant dense<0.000000e+00> : vector<1xf32>
      %415 = vector.multi_reduction <add>, %414, %cst_188 [1, 2] : vector<1x16x16xf32> to vector<1xf32>
      %416 = vector.shape_cast %415 : vector<1xf32> to vector<1x1x1xf32>
      %417 = vector.extract %416[0, 0, 0] : f32 from vector<1x1x1xf32>
      %418 = vector.broadcast %417 : f32 to vector<1x1xf32>
      %419 = arith.addf %411, %418 : vector<1x1xf32>
      %cst_189 = arith.constant 9.99999993E-9 : f32
      %420 = vector.broadcast %cst_189 : f32 to vector<1x1xf32>
      %421 = arith.addf %419, %420 : vector<1x1xf32>
      %422 = arith.divf %376, %404 : vector<1x1xf32>
      %423 = arith.divf %391, %421 : vector<1x1xf32>
      %424 = arith.addf %422, %423 : vector<1x1xf32>
      %c3_i32 = arith.constant 3 : i32
      %425 = vector.broadcast %c3_i32 : i32 to vector<1x128xi32>
      %426 = arith.cmpi eq, %32, %425 : vector<1x128xi32>
      %427 = vector.shape_cast %356 : vector<1x1xf32> to vector<1x1xf32>
      %428 = vector.broadcast %427 : vector<1x1xf32> to vector<1x128xf32>
      %429 = arith.select %426, %428, %332 : vector<1x128xi1>, vector<1x128xf32>
      %c3_i32_190 = arith.constant 3 : i32
      %430 = vector.broadcast %c3_i32_190 : i32 to vector<1x128xi32>
      %431 = arith.cmpi eq, %32, %430 : vector<1x128xi32>
      %432 = vector.shape_cast %424 : vector<1x1xf32> to vector<1x1xf32>
      %433 = vector.broadcast %432 : vector<1x1xf32> to vector<1x128xf32>
      %434 = arith.select %431, %433, %337 : vector<1x128xi1>, vector<1x128xf32>
      %435 = vector.extract_strided_slice %26 {offsets = [24, 0], sizes = [32, 32], strides = [1, 1]} : vector<56x32xf32> to vector<32x32xf32>
      %cst_191 = arith.constant dense<0.000000e+00> : vector<32x32xf32>
      %436 = tpu.matmul %435, %31, %cst_191 {dimension_numbers = #tpu.dot_dimension_numbers<[1], [0], [0], [1], [0, 0, 1, 1], [], []>} : vector<32x32xf32>, vector<32x32xf32>, vector<32x32xf32> -> vector<32x32xf32>
      %437 = vector.extract_strided_slice %27 {offsets = [24, 0], sizes = [32, 32], strides = [1, 1]} : vector<56x32xf32> to vector<32x32xf32>
      %cst_192 = arith.constant dense<0.000000e+00> : vector<32x32xf32>
      %438 = tpu.matmul %437, %31, %cst_192 {dimension_numbers = #tpu.dot_dimension_numbers<[1], [0], [0], [1], [0, 0, 1, 1], [], []>} : vector<32x32xf32>, vector<32x32xf32>, vector<32x32xf32> -> vector<32x32xf32>
      %cst_193 = arith.constant 5.000000e-02 : f32
      %439 = vector.broadcast %cst_193 : f32 to vector<32x32xf32>
      %440 = arith.mulf %436, %439 : vector<32x32xf32>
      %c0_194 = arith.constant 0 : index
      %c0_195 = arith.constant 0 : index
      %c0_196 = arith.constant 0 : index
      %c0_197 = arith.constant 0 : index
      %441 = vector.load %arg8[%c0_194, %c0_195, %c0_196, %c0_197] : memref<1x2x32x32xf32, #tpu.memory_space<vmem>>, vector<1x1x32x32xf32>
      %442 = vector.shape_cast %441 : vector<1x1x32x32xf32> to vector<32x32xf32>
      %443 = arith.subf %440, %442 : vector<32x32xf32>
      %cst_198 = arith.constant 5.000000e-02 : f32
      %444 = vector.broadcast %cst_198 : f32 to vector<32x32xf32>
      %445 = arith.mulf %438, %444 : vector<32x32xf32>
      %c0_199 = arith.constant 0 : index
      %c1_200 = arith.constant 1 : index
      %c0_201 = arith.constant 0 : index
      %c0_202 = arith.constant 0 : index
      %446 = vector.load %arg8[%c0_199, %c1_200, %c0_201, %c0_202] : memref<1x2x32x32xf32, #tpu.memory_space<vmem>>, vector<1x1x32x32xf32>
      %447 = vector.shape_cast %446 : vector<1x1x32x32xf32> to vector<32x32xf32>
      %448 = arith.subf %445, %447 : vector<32x32xf32>
      %449 = arith.mulf %443, %443 : vector<32x32xf32>
      %450 = arith.mulf %448, %448 : vector<32x32xf32>
      %451 = arith.addf %449, %450 : vector<32x32xf32>
      %452 = math.sqrt %451 : vector<32x32xf32>
      %453 = vector.shape_cast %452 : vector<32x32xf32> to vector<1x32x32xf32>
      %cst_203 = arith.constant dense<0.000000e+00> : vector<1xf32>
      %454 = vector.multi_reduction <add>, %453, %cst_203 [1, 2] : vector<1x32x32xf32> to vector<1xf32>
      %455 = vector.shape_cast %454 : vector<1xf32> to vector<1x1x1xf32>
      %456 = vector.extract %455[0, 0, 0] : f32 from vector<1x1x1xf32>
      %457 = vector.broadcast %456 : f32 to vector<1x1xf32>
      %458 = vector.extract_strided_slice %28 {offsets = [24, 0], sizes = [32, 32], strides = [1, 1]} : vector<56x32xf32> to vector<32x32xf32>
      %cst_204 = arith.constant dense<0.000000e+00> : vector<32x32xf32>
      %459 = tpu.matmul %458, %31, %cst_204 {dimension_numbers = #tpu.dot_dimension_numbers<[1], [0], [0], [1], [0, 0, 1, 1], [], []>} : vector<32x32xf32>, vector<32x32xf32>, vector<32x32xf32> -> vector<32x32xf32>
      %c0_205 = arith.constant 0 : index
      %c0_206 = arith.constant 0 : index
      %c0_207 = arith.constant 0 : index
      %c0_208 = arith.constant 0 : index
      %460 = vector.load %arg13[%c0_205, %c0_206, %c0_207, %c0_208] : memref<1x1x32x32xf32, #tpu.memory_space<vmem>>, vector<1x1x32x32xf32>
      %461 = vector.shape_cast %460 : vector<1x1x32x32xf32> to vector<32x32xf32>
      %cst_209 = arith.constant 0.000000e+00 : f32
      %462 = vector.broadcast %cst_209 : f32 to vector<32x32xf32>
      %463 = arith.subf %462, %461 : vector<32x32xf32>
      %464 = math.exp %463 : vector<32x32xf32>
      %cst_210 = arith.constant 1.000000e+00 : f32
      %465 = vector.broadcast %cst_210 : f32 to vector<32x32xf32>
      %466 = arith.addf %465, %464 : vector<32x32xf32>
      %cst_211 = arith.constant 1.000000e+00 : f32
      %467 = vector.broadcast %cst_211 : f32 to vector<32x32xf32>
      %468 = arith.divf %467, %466 : vector<32x32xf32>
      %cst_212 = arith.constant 9.99999993E-9 : f32
      %469 = vector.broadcast %cst_212 : f32 to vector<32x32xf32>
      %470 = arith.addf %468, %469 : vector<32x32xf32>
      %471 = math.log %470 : vector<32x32xf32>
      %472 = arith.mulf %459, %471 : vector<32x32xf32>
      %473 = vector.shape_cast %472 : vector<32x32xf32> to vector<1x32x32xf32>
      %cst_213 = arith.constant dense<0.000000e+00> : vector<1xf32>
      %474 = vector.multi_reduction <add>, %473, %cst_213 [1, 2] : vector<1x32x32xf32> to vector<1xf32>
      %475 = vector.shape_cast %474 : vector<1xf32> to vector<1x1x1xf32>
      %476 = vector.extract %475[0, 0, 0] : f32 from vector<1x1x1xf32>
      %477 = vector.broadcast %476 : f32 to vector<1x1xf32>
      %cst_214 = arith.constant 0.000000e+00 : f32
      %478 = vector.broadcast %cst_214 : f32 to vector<1x1xf32>
      %479 = arith.subf %478, %477 : vector<1x1xf32>
      %cst_215 = arith.constant 1.000000e+00 : f32
      %480 = vector.broadcast %cst_215 : f32 to vector<32x32xf32>
      %481 = arith.subf %480, %459 : vector<32x32xf32>
      %cst_216 = arith.constant 1.000000e+00 : f32
      %482 = vector.broadcast %cst_216 : f32 to vector<32x32xf32>
      %483 = arith.subf %482, %468 : vector<32x32xf32>
      %cst_217 = arith.constant 9.99999993E-9 : f32
      %484 = vector.broadcast %cst_217 : f32 to vector<32x32xf32>
      %485 = arith.addf %483, %484 : vector<32x32xf32>
      %486 = math.log %485 : vector<32x32xf32>
      %487 = arith.mulf %481, %486 : vector<32x32xf32>
      %488 = vector.shape_cast %487 : vector<32x32xf32> to vector<1x32x32xf32>
      %cst_218 = arith.constant dense<0.000000e+00> : vector<1xf32>
      %489 = vector.multi_reduction <add>, %488, %cst_218 [1, 2] : vector<1x32x32xf32> to vector<1xf32>
      %490 = vector.shape_cast %489 : vector<1xf32> to vector<1x1x1xf32>
      %491 = vector.extract %490[0, 0, 0] : f32 from vector<1x1x1xf32>
      %492 = vector.broadcast %491 : f32 to vector<1x1xf32>
      %cst_219 = arith.constant 0.000000e+00 : f32
      %493 = vector.broadcast %cst_219 : f32 to vector<1x1xf32>
      %494 = arith.subf %493, %492 : vector<1x1xf32>
      %495 = vector.shape_cast %459 : vector<32x32xf32> to vector<1x32x32xf32>
      %cst_220 = arith.constant dense<0.000000e+00> : vector<1xf32>
      %496 = vector.multi_reduction <add>, %495, %cst_220 [1, 2] : vector<1x32x32xf32> to vector<1xf32>
      %497 = vector.shape_cast %496 : vector<1xf32> to vector<1x1x1xf32>
      %498 = vector.extract %497[0, 0, 0] : f32 from vector<1x1x1xf32>
      %499 = vector.broadcast %498 : f32 to vector<1x1xf32>
      %500 = vector.shape_cast %468 : vector<32x32xf32> to vector<1x32x32xf32>
      %cst_221 = arith.constant dense<0.000000e+00> : vector<1xf32>
      %501 = vector.multi_reduction <add>, %500, %cst_221 [1, 2] : vector<1x32x32xf32> to vector<1xf32>
      %502 = vector.shape_cast %501 : vector<1xf32> to vector<1x1x1xf32>
      %503 = vector.extract %502[0, 0, 0] : f32 from vector<1x1x1xf32>
      %504 = vector.broadcast %503 : f32 to vector<1x1xf32>
      %505 = arith.addf %499, %504 : vector<1x1xf32>
      %cst_222 = arith.constant 9.99999993E-9 : f32
      %506 = vector.broadcast %cst_222 : f32 to vector<1x1xf32>
      %507 = arith.addf %505, %506 : vector<1x1xf32>
      %cst_223 = arith.constant 1.000000e+00 : f32
      %508 = vector.broadcast %cst_223 : f32 to vector<32x32xf32>
      %509 = arith.subf %508, %459 : vector<32x32xf32>
      %510 = vector.shape_cast %509 : vector<32x32xf32> to vector<1x32x32xf32>
      %cst_224 = arith.constant dense<0.000000e+00> : vector<1xf32>
      %511 = vector.multi_reduction <add>, %510, %cst_224 [1, 2] : vector<1x32x32xf32> to vector<1xf32>
      %512 = vector.shape_cast %511 : vector<1xf32> to vector<1x1x1xf32>
      %513 = vector.extract %512[0, 0, 0] : f32 from vector<1x1x1xf32>
      %514 = vector.broadcast %513 : f32 to vector<1x1xf32>
      %cst_225 = arith.constant 1.000000e+00 : f32
      %515 = vector.broadcast %cst_225 : f32 to vector<32x32xf32>
      %516 = arith.subf %515, %468 : vector<32x32xf32>
      %517 = vector.shape_cast %516 : vector<32x32xf32> to vector<1x32x32xf32>
      %cst_226 = arith.constant dense<0.000000e+00> : vector<1xf32>
      %518 = vector.multi_reduction <add>, %517, %cst_226 [1, 2] : vector<1x32x32xf32> to vector<1xf32>
      %519 = vector.shape_cast %518 : vector<1xf32> to vector<1x1x1xf32>
      %520 = vector.extract %519[0, 0, 0] : f32 from vector<1x1x1xf32>
      %521 = vector.broadcast %520 : f32 to vector<1x1xf32>
      %522 = arith.addf %514, %521 : vector<1x1xf32>
      %cst_227 = arith.constant 9.99999993E-9 : f32
      %523 = vector.broadcast %cst_227 : f32 to vector<1x1xf32>
      %524 = arith.addf %522, %523 : vector<1x1xf32>
      %525 = arith.divf %479, %507 : vector<1x1xf32>
      %526 = arith.divf %494, %524 : vector<1x1xf32>
      %527 = arith.addf %525, %526 : vector<1x1xf32>
      %c4_i32 = arith.constant 4 : i32
      %528 = vector.broadcast %c4_i32 : i32 to vector<1x128xi32>
      %529 = arith.cmpi eq, %32, %528 : vector<1x128xi32>
      %530 = vector.shape_cast %457 : vector<1x1xf32> to vector<1x1xf32>
      %531 = vector.broadcast %530 : vector<1x1xf32> to vector<1x128xf32>
      %532 = arith.select %529, %531, %429 : vector<1x128xi1>, vector<1x128xf32>
      %c4_i32_228 = arith.constant 4 : i32
      %533 = vector.broadcast %c4_i32_228 : i32 to vector<1x128xi32>
      %534 = arith.cmpi eq, %32, %533 : vector<1x128xi32>
      %535 = vector.shape_cast %527 : vector<1x1xf32> to vector<1x1xf32>
      %536 = vector.broadcast %535 : vector<1x1xf32> to vector<1x128xf32>
      %537 = arith.select %534, %536, %434 : vector<1x128xi1>, vector<1x128xf32>
      %c0_229 = arith.constant 0 : index
      %c0_230 = arith.constant 0 : index
      %c0_231 = arith.constant 0 : index
      %538 = vector.load %arg18[%c0_229, %c0_230, %c0_231] : memref<1x1x128xf32, #tpu.memory_space<vmem>>, vector<1x1x128xf32>
      %539 = vector.shape_cast %538 : vector<1x1x128xf32> to vector<1x128xf32>
      %540 = vector.shape_cast %532 : vector<1x128xf32> to vector<1x1x128xf32>
      tpu.vector_store %arg18[%c0_229, %c0_230, %c0_231], %540 {strides = array<i32>} : memref<1x1x128xf32, #tpu.memory_space<vmem>>, vector<1x1x128xf32>,
      %c0_232 = arith.constant 0 : index
      %c0_233 = arith.constant 0 : index
      %c0_234 = arith.constant 0 : index
      %541 = vector.load %arg19[%c0_232, %c0_233, %c0_234] : memref<1x1x128xf32, #tpu.memory_space<vmem>>, vector<1x1x128xf32>
      %542 = vector.shape_cast %541 : vector<1x1x128xf32> to vector<1x128xf32>
      %543 = vector.shape_cast %537 : vector<1x128xf32> to vector<1x1x128xf32>
      tpu.vector_store %arg19[%c0_232, %c0_233, %c0_234], %543 {strides = array<i32>} : memref<1x1x128xf32, #tpu.memory_space<vmem>>, vector<1x1x128xf32>,
    } else {
    }
    return
  }
  func.func @transform_0(%arg0: i32, %arg1: i32) -> (i32, i32, i32, i32) {
    %c0_i32 = arith.constant 0 : i32
    %c0_i32_0 = arith.constant 0 : i32
    %c0_i32_1 = arith.constant 0 : i32
    return %arg0, %c0_i32, %arg1, %c0_i32_0 : i32, i32, i32, i32
  }
  func.func @transform_1(%arg0: i32, %arg1: i32) -> (i32, i32, i32, i32) {
    %c0_i32 = arith.constant 0 : i32
    %c0_i32_0 = arith.constant 0 : i32
    %c0_i32_1 = arith.constant 0 : i32
    return %arg0, %c0_i32, %arg1, %c0_i32_0 : i32, i32, i32, i32
  }
  func.func @transform_2(%arg0: i32, %arg1: i32) -> (i32, i32, i32, i32) {
    %c0_i32 = arith.constant 0 : i32
    %c0_i32_0 = arith.constant 0 : i32
    %c0_i32_1 = arith.constant 0 : i32
    %c0_i32_2 = arith.constant 0 : i32
    return %arg0, %c0_i32, %c0_i32_0, %c0_i32_1 : i32, i32, i32, i32
  }
  func.func @transform_3(%arg0: i32, %arg1: i32) -> (i32, i32, i32, i32) {
    %c0_i32 = arith.constant 0 : i32
    %c0_i32_0 = arith.constant 0 : i32
    %c0_i32_1 = arith.constant 0 : i32
    %c0_i32_2 = arith.constant 0 : i32
    return %arg0, %c0_i32, %c0_i32_0, %c0_i32_1 : i32, i32, i32, i32
  }
  func.func @transform_4(%arg0: i32, %arg1: i32) -> (i32, i32, i32, i32) {
    %c0_i32 = arith.constant 0 : i32
    %c0_i32_0 = arith.constant 0 : i32
    %c0_i32_1 = arith.constant 0 : i32
    %c0_i32_2 = arith.constant 0 : i32
    return %arg0, %c0_i32, %c0_i32_0, %c0_i32_1 : i32, i32, i32, i32
  }
  func.func @transform_5(%arg0: i32, %arg1: i32) -> (i32, i32, i32, i32) {
    %c0_i32 = arith.constant 0 : i32
    %c0_i32_0 = arith.constant 0 : i32
    %c0_i32_1 = arith.constant 0 : i32
    %c0_i32_2 = arith.constant 0 : i32
    return %arg0, %c0_i32, %c0_i32_0, %c0_i32_1 : i32, i32, i32, i32
  }
  func.func @transform_6(%arg0: i32, %arg1: i32) -> (i32, i32, i32, i32) {
    %c0_i32 = arith.constant 0 : i32
    %c0_i32_0 = arith.constant 0 : i32
    %c0_i32_1 = arith.constant 0 : i32
    %c0_i32_2 = arith.constant 0 : i32
    return %arg0, %c0_i32, %c0_i32_0, %c0_i32_1 : i32, i32, i32, i32
  }
  func.func @transform_7(%arg0: i32, %arg1: i32) -> (i32, i32, i32, i32) {
    %c0_i32 = arith.constant 0 : i32
    %c0_i32_0 = arith.constant 0 : i32
    %c0_i32_1 = arith.constant 0 : i32
    %c0_i32_2 = arith.constant 0 : i32
    return %arg0, %c0_i32, %c0_i32_0, %c0_i32_1 : i32, i32, i32, i32
  }
  func.func @transform_8(%arg0: i32, %arg1: i32) -> (i32, i32, i32, i32) {
    %c0_i32 = arith.constant 0 : i32
    %c0_i32_0 = arith.constant 0 : i32
    %c0_i32_1 = arith.constant 0 : i32
    %c0_i32_2 = arith.constant 0 : i32
    return %arg0, %c0_i32, %c0_i32_0, %c0_i32_1 : i32, i32, i32, i32
  }
  func.func @transform_9(%arg0: i32, %arg1: i32) -> (i32, i32, i32, i32) {
    %c0_i32 = arith.constant 0 : i32
    %c0_i32_0 = arith.constant 0 : i32
    %c0_i32_1 = arith.constant 0 : i32
    %c0_i32_2 = arith.constant 0 : i32
    return %arg0, %c0_i32, %c0_i32_0, %c0_i32_1 : i32, i32, i32, i32
  }
  func.func @transform_10(%arg0: i32, %arg1: i32) -> (i32, i32, i32, i32) {
    %c0_i32 = arith.constant 0 : i32
    %c0_i32_0 = arith.constant 0 : i32
    %c0_i32_1 = arith.constant 0 : i32
    %c0_i32_2 = arith.constant 0 : i32
    return %arg0, %c0_i32, %c0_i32_0, %c0_i32_1 : i32, i32, i32, i32
  }
  func.func @transform_11(%arg0: i32, %arg1: i32) -> (i32, i32, i32, i32) {
    %c0_i32 = arith.constant 0 : i32
    %c0_i32_0 = arith.constant 0 : i32
    %c0_i32_1 = arith.constant 0 : i32
    %c0_i32_2 = arith.constant 0 : i32
    return %arg0, %c0_i32, %c0_i32_0, %c0_i32_1 : i32, i32, i32, i32
  }
  func.func @transform_12(%arg0: i32, %arg1: i32) -> (i32, i32, i32) {
    %c0_i32 = arith.constant 0 : i32
    %c0_i32_0 = arith.constant 0 : i32
    %c0_i32_1 = arith.constant 0 : i32
    return %arg1, %c0_i32, %c0_i32_0 : i32, i32, i32
  }
  func.func @transform_13(%arg0: i32, %arg1: i32) -> (i32, i32) {
    %c0_i32 = arith.constant 0 : i32
    %c0_i32_0 = arith.constant 0 : i32
    %c0_i32_1 = arith.constant 0 : i32
    return %c0_i32, %c0_i32_0 : i32, i32
  }
  func.func @transform_14(%arg0: i32, %arg1: i32) -> (i32, i32) {
    %c0_i32 = arith.constant 0 : i32
    %c0_i32_0 = arith.constant 0 : i32
    %c0_i32_1 = arith.constant 0 : i32
    return %c0_i32, %c0_i32_0 : i32, i32
  }
  func.func @transform_15(%arg0: i32, %arg1: i32) -> (i32, i32) {
    %c0_i32 = arith.constant 0 : i32
    %c0_i32_0 = arith.constant 0 : i32
    %c0_i32_1 = arith.constant 0 : i32
    return %c0_i32, %c0_i32_0 : i32, i32
  }
  func.func @transform_16(%arg0: i32, %arg1: i32) -> (i32, i32, i32) {
    %c0_i32 = arith.constant 0 : i32
    %c0_i32_0 = arith.constant 0 : i32
    %c0_i32_1 = arith.constant 0 : i32
    return %arg0, %c0_i32, %c0_i32_0 : i32, i32, i32
  }
  func.func @transform_17(%arg0: i32, %arg1: i32) -> (i32, i32, i32) {
    %c0_i32 = arith.constant 0 : i32
    %c0_i32_0 = arith.constant 0 : i32
    %c0_i32_1 = arith.constant 0 : i32
    return %arg0, %c0_i32, %c0_i32_0 : i32, i32, i32
  }
}

</mosaic_0001>

<bundles_post_ra>
// kernel: tpu_custom_call.1
= control target key start
LH: loop header
LB: loop body
LE: loop exit
PB: predicated region body
PF: predicated region fallthrough
CT: control target
= control target key end

     0   :  { %s5337_s0 = inlined_call_operand.hbm [shape: f32[2,2,32,32], index: 0, kind: input, shape index: {}]   ;;  %s5338_s1 = inlined_call_operand.vmem [shape: f32[2,1,32,32], index: 1, kind: input, shape index: {}]   ;;  %s5339_s2 = inlined_call_operand.vmem [shape: f32[2,2,8,8], index: 2, kind: input, shape index: {}]   ;;  %s5340_s3 = inlined_call_operand.vmem [shape: f32[2,2,8,8], index: 3, kind: input, shape index: {}]   ;;  %s5341_s4 = inlined_call_operand.hbm [shape: f32[2,2,16,16], index: 4, kind: input, shape index: {}]   ;;  %s5342_s5 = inlined_call_operand.hbm [shape: f32[2,2,16,16], index: 5, kind: input, shape index: {}]   ;;  %s5343_s6 = inlined_call_operand.hbm [shape: f32[2,2,32,32], index: 6, kind: input, shape index: {}]   ;;  %s5344_s7 = inlined_call_operand.hbm [shape: f32[2,1,8,8], index: 7, kind: input, shape index: {}]   ;;  %s5345_s8 = inlined_call_operand.hbm [shape: f32[2,1,8,8], index: 8, kind: input, shape index: {}]   ;;  %s5346_s9 = inlined_call_operand.hbm [shape: f32[2,1,16,16], index: 9, kind: input, shape index: {}]   ;;  %s5347_s10 = inlined_call_operand.hbm [shape: f32[2,1,16,16], index: 10, kind: input, shape index: {}]   ;;  %s5348_s11 = inlined_call_operand.hbm [shape: f32[2,1,32,32], index: 11, kind: input, shape index: {}]   ;;  %s5349_s12 = inlined_call_operand.vmem [shape: f32[1,56,32], index: 12, kind: input, shape index: {}]   ;;  %s5350_s13 = inlined_call_operand.vmem [shape: f32[32,8], index: 13, kind: input, shape index: {}]   ;;  %s5351_s14 = inlined_call_operand.vmem [shape: f32[32,16], index: 14, kind: input, shape index: {}]   ;;  %s5352_s15 = inlined_call_operand.hbm [shape: f32[32,32], index: 15, kind: input, shape index: {}]   ;;  %s5353_s16 = inlined_call_operand.hbm [shape: f32[2,1,128], index: 16, kind: output, shape index: {0}]   ;;  %s5354_s17 = inlined_call_operand.hbm [shape: f32[2,1,128], index: 17, kind: output, shape index: {1}]  }
   0x1   :  { %5377 = sst [smem:[#allocation39_spill]] %s5337_s0 }
   0x2   :  { %5378 = sst [smem:[#allocation40_spill]] %s5338_s1 }
   0x3   :  { %5379 = sst [smem:[#allocation41_spill]] %s5339_s2 }
   0x4   :  { %5380 = sst [smem:[#allocation42_spill]] %s5340_s3 }
   0x5   :  { %5381 = sst [smem:[#allocation43_spill]] %s5341_s4 }
   0x6   :  { %5382 = sst [smem:[#allocation44_spill]] %s5342_s5 }
   0x7   :  { %5383 = sst [smem:[#allocation45_spill]] %s5343_s6 }
   0x8   :  { %5384 = sst [smem:[#allocation46_spill]] %s5344_s7 }
   0x9   :  { %5385 = sst [smem:[#allocation47_spill]] %s5345_s8 }
   0xa   :  { %5386 = sst [smem:[#allocation48_spill]] %s5346_s9 }
   0xb   :  { %5387 = sst [smem:[#allocation49_spill]] %s5347_s10 }
   0xc   :  { %5388 = sst [smem:[#allocation50_spill]] %s5348_s11 }
   0xd   :  { %5389 = sst [smem:[#allocation51_spill]] %s5349_s12 }
   0xe   :  { %5390 = sst [smem:[#allocation52_spill]] %s5350_s13 }
   0xf   :  { %5391 = sst [smem:[#allocation53_spill]] %s5351_s14 }
  0x10   :  { %5392 = sst [smem:[#allocation54_spill]] %s5352_s15 }
  0x11   :  { %5393 = sst [smem:[#allocation55_spill]] %s5353_s16 }
  0x12   :  { %5394 = sst [smem:[#allocation56_spill]] %s5354_s17 }
  0x13   :  { %23 = vsyncpa [#allocation6], 0 }
  0x14   :  { %25 = vsyncpa [#allocation6 + $0x1], 0 }
  0x15   :  { %26 = vsyncpa [#allocation9], 0 }
  0x16   :  { %28 = vsyncpa [#allocation9 + $0x1], 0 }
  0x17   :  { %29 = vsyncpa [#allocation12], 0 }
  0x18   :  { %31 = vsyncpa [#allocation12 + $0x1], 0 }
  0x19   :  { %32 = vsyncpa [#allocation15], 0 }
  0x1a   :  { %34 = vsyncpa [#allocation15 + $0x1], 0 }
  0x1b   :  { %35 = vsyncpa [#allocation18], 0 }
  0x1c   :  { %37 = vsyncpa [#allocation18 + $0x1], 0 }
  0x1d   :  { %38 = vsyncpa [#allocation21], 0 }
  0x1e   :  { %39 = vsyncpa [#allocation7], 0 }
  0x1f   :  { %41 = vsyncpa [#allocation7 + $0x1], 0 }
  0x20   :  { %42 = vsyncpa [#allocation24], 0 }
  0x21   :  { %44 = vsyncpa [#allocation24 + $0x1], 0  ;;  %s4028_s24 = smov 0   ;;  %s4030_s25 = smov 0  }
  0x22   :  { %s4032_s26 = smov 0   ;;  %s4034_s27 = smov 0  }
  0x23   :  { %s4036_s28 = smov 0   ;;  %s4038_s29 = smov 0  }
  0x24 LB: > { %5395 = sst [smem:[#allocation33_spill]] %s3920_s26  ;;  %s62_s0 = sadd.s32 1, %s3928_s28  ;;  %s3932_s29 = sphi %s4038_s29, %s50_s29   ;;  %s3928_s28 = sphi %s4036_s28, %s5474_s28   ;;  %s3924_s27 = sphi %s4034_s27, %s5477_s27   ;;  %s3920_s26 = sphi %s4032_s26, %s5472_s26   ;;  %s3916_s25 = sphi %s4030_s25, %s5476_s25   ;;  %s3912_s24 = sphi %s4028_s24, %s5475_s24  }
  0x25   : > { %5396 = sst [smem:[#allocation34_spill]] %s3924_s27  ;;  %s71_s30 = sadd.s32 1, %s3920_s26 }
  0x26   : > { %5397 = sst [smem:[#allocation35_spill]] %s3928_s28  ;;  %p64_p0 = scmp.ge.s32.totalorder %s62_s0, 2 }
  0x27   : > { %p78_p1 = scmp.ne.s32.totalorder %s3920_s26, %s3916_s25  ;;  %p79_p2 = scmp.eq.s32.totalorder %s3932_s29, 0 }
  0x28   : > { %s5479_s0 = smov (%p64_p0, %s62_s0), 0  ;;  %p3084_p4 = scmp.ge.s32.totalorder %s3932_s29, 2 }
  0x29   : > { %5398 = sst [smem:[#allocation36_spill]] %s5479_s0  ;;  %p80_p3 = por %p79_p2, %p78_p1 }
  0x2a   : > { %s66_s18 = ssub.s32 %s3928_s28, %s5479_s0  ;;  %p3323_p6 = scmp.lt.s32.totalorder %s3932_s29, 2 }
  0x2b   : > { %p69_p5 = scmp.eq.s32.totalorder %s66_s18, 0  ;;  %s4073_s19 = sand.u32 1, %s3920_s26  }
  0x2c   : > { %s4076_s1 = sand.u32 1, %s3932_s29   ;;  %p4081_p7 = pnand %p3323_p6, %p80_p3 }
  0x2d   : > { %s4079_s20 = scalar_select %p69_p5, %s3920_s26, %s71_s30  }
  0x2e   : > { %s4086_s22 = sshll.u32 %s4073_s19, 5  ;;  %s4089_s23 = sshll.u32 %s3928_s28, 5 }
  0x2f   : > { %5399 = sst [smem:[#allocation37_spill]] %s4079_s20  ;;  %s622_s16 = scalar_lea.vmem [#allocation8], %s4086_s22 }
  0x30   : > { %5401 = sst [smem:[#allocation38_spill]] %s4086_s22  ;;  %s630_s30 = sshll.u32 %s622_s16, 4  ;;  %s631_s30 = int_to_ptr.vmem [resolvable:$true] %s630_s30 }
  0x31   : > { %s5402_s4 = sld [smem:[#allocation43_spill]]  ;;  %s5363_s2 = sshll.u32 %s4073_s19, 6 }
  0x32   : > { %s5362_s3 = scalar_lea.sflag [#allocation9], %s4076_s1  ;;  %s5371_s13 = smov 128  }
  0x33   : > { %s5373_s14 = smov 8   ;;  %s5364_s16 = sshll.u32 %s3928_s28, 6 }
  0x34   : > { %s5403_s6 = sld [smem:[#allocation45_spill]]  ;;  %s666_s12 = scalar_lea.vmem [#allocation11], %s5363_s2 }
  0x35   : > { %s674_s27 = sshll.u32 %s666_s12, 4  ;;  %s5367_s11 = scalar_lea.sflag [#allocation12], %s4076_s1  ;;  %s675_s27 = int_to_ptr.vmem [resolvable:$true] %s674_s27 }
  0x36   : > { %s5404_s7 = sld [smem:[#allocation46_spill]]  ;;  %s3101_s22 = sshll.u32 %s4073_s19, 4 }
  0x37   : > { %s627_s17 = scalar_lea.hbm %s5402_s4, %s4089_s23  ;;  %s5405_s8 = sld [smem:[#allocation47_spill]] }
  0x38   : > { %s628_s20 = sshll.u32 %s627_s17, 4  ;;  %s5406_s9 = sld [smem:[#allocation48_spill]]  ;;  %s629_s20 = int_to_ptr.hbm [resolvable:$true] %s628_s20 }
  0x39   : > { %3293 = dma.hbm_to_vmem [thread:$0]  (!%p4081_p7), %s629_s20, 512, %s631_s30, %s5362_s3, %s5371_s13, %s5371_s13, %s5373_s14  }
  0x3a   : > { %s671_s18 = scalar_lea.hbm %s5403_s6, %s5364_s16  ;;  %s5370_s20 = sshll.u32 %s4073_s19, 3 }
  0x3b   : > { %s672_s4 = sshll.u32 %s671_s18, 4  ;;  %s3098_s30 = sshll.u32 %s3928_s28, 3  ;;  %s673_s4 = int_to_ptr.hbm [resolvable:$true] %s672_s4 }
  0x3c   : > { %3299 = dma.hbm_to_vmem [thread:$0]  (!%p4081_p7), %s673_s4, 1024, %s675_s27, %s5367_s11, %s5371_s13, %s5371_s13, %s5373_s14  }
  0x3d   : > { %s4126_s18 = scalar_lea.hbm %s5404_s7, %s3098_s30  ;;  %s711_s2 = scalar_lea.hbm %s5405_s8, %s3098_s30 }
  0x3e   : > { %s707_s16 = scalar_lea.vmem [#allocation14], %s5370_s20  ;;  %s713_s5 = sshll.u32 %s711_s2, 4  ;;  %s714_s5 = int_to_ptr.hbm [resolvable:$true] %s713_s5 }
  0x3f   : > { %s715_s6 = sshll.u32 %s707_s16, 4  ;;  %s5368_s4 = scalar_lea.sflag [#allocation15], %s4076_s1  ;;  %s716_s6 = int_to_ptr.vmem [resolvable:$true] %s715_s6 }
  0x40   : > { %3305 = dma.hbm_to_vmem [thread:$0]  (!%p4081_p7), %s714_s5, 128, %s716_s6, %s5368_s4  }
  0x41   : > { %s3189_s27 = sshll.u32 %s3928_s28, 4  ;;  %s726_s2 = scalar_lea.vmem [#allocation16], %s3101_s22 }
  0x42   : > { %s731_s3 = scalar_lea.hbm %s5406_s9, %s3189_s27  ;;  %s734_s16 = sshll.u32 %s726_s2, 4  ;;  %s4143_s16 = int_to_ptr.vmem [resolvable:$true] %s734_s16 }
  0x43   : > { %s732_s30 = sshll.u32 %s731_s3, 4  ;;  %s5407_s10 = sld [smem:[#allocation49_spill]]  ;;  %s4145_s30 = int_to_ptr.hbm [resolvable:$true] %s732_s30 }
  0x44   : > { %s748_s17 = scalar_lea.vmem [#allocation17], %s3101_s22  ;;  %s5369_s4 = scalar_lea.sflag [#allocation18], %s4076_s1 }
  0x45   : > { %s756_s0 = sshll.u32 %s748_s17, 4  ;;  %s4159_s3 = sadd.s32 4294967295, %s3932_s29   ;;  %s757_s0 = int_to_ptr.vmem [resolvable:$true] %s756_s0 }
  0x46   : > { %s3080_s11 = sadd.s32 4294967294, %s3932_s29   ;;  %p84_p8 = scmp.ne.s32.totalorder %s3916_s25, %s3912_s24 }
  0x47   : > { %p85_p9 = scmp.eq.s32.totalorder %s4159_s3, 0  ;;  %p485_p10 = scmp.eq.s32.totalorder %s4159_s3, 1 }
  0x48   : > { %p491_p11 = scmp.eq.s32.totalorder %s3080_s11, 1  ;;  %p3081_p13 = scmp.ge.s32.totalorder %s3932_s29, 1 }
  0x49   : > { %s753_s5 = scalar_lea.hbm %s5407_s10, %s3189_s27  ;;  %p4168_p12 = por %p85_p9, %p84_p8 }
  0x4a   : > { %s754_s6 = sshll.u32 %s753_s5, 4  ;;  %p4176_p0 = por %p485_p10, %p78_p1  ;;  %s755_s6 = int_to_ptr.hbm [resolvable:$true] %s754_s6 }
  0x4b   : > { %3311 = dma.hbm_to_vmem [thread:$0]  (!%p4081_p7), %s755_s6, 256, %s757_s0, %s5369_s4, %s5371_s13, %s5371_s13, %s5373_s14  }
  0x4c   : > { %p4180_p2 = por %p491_p11, %p84_p8  ;;  %p524_p3 = scmp.lt.s32.totalorder %s3932_s29, 3 }
  0x4d   : > { %s5411_s15 = sld [smem:[#allocation54_spill]]  ;;  %s3936_s0 = smov [#allocation20]  }
  0x4e   : > { %p4188_p5 = pnand %p3081_p13, %p524_p3  ;;  %s5413_s11 = sld [smem:[#allocation38_spill]] }
  0x4f   : > { %s551_s4 = sshll.u32 %s3936_s0, 4  ;;  %s5414_s20 = sshll.u32 %s3928_s28, 6  ;;  %s552_s4 = int_to_ptr.vmem [resolvable:$true] %s551_s4 }
  0x50   : > { %p3283_p1 = pneg %p4188_p5  ;;  %s5415_s12 = sld [smem:[#allocation39_spill]] }
  0x51   : > { %s5416_s8 = sshll.u32 %s4073_s19, 6  ;;  %s5417_s0 = smov 8  }
  0x52   : > { %p3284_p6 = pnand %p3283_p1, %p85_p9  ;;  %s569_s9 = scalar_lea.vmem [#allocation5], %s5416_s8 }
  0x53   : > { %s549_s6 = sshll.u32 %s5411_s15, 4  ;;  %s579_s10 = sshll.u32 %s569_s9, 4  ;;  %s550_s6 = int_to_ptr.hbm [resolvable:$true] %s549_s6  ;;  %s580_s10 = int_to_ptr.vmem [resolvable:$true] %s579_s10 }
  0x54   : > { %s5418_s15 = smov 128   ;;  %s566_s13 = scalar_lea.sflag [#allocation6], %s4073_s19 }
  0x55   : > { %3286 = dma.hbm_to_vmem [thread:$0]  (!%p3284_p6), %s550_s6, 512, %s552_s4, [#allocation21], %s5418_s15, %s5418_s15, %s5417_s0  }
  0x56   : > { %s576_s5 = scalar_lea.hbm %s5415_s12, %s5414_s20  ;;  %s5419_s14 = sld [smem:[#allocation44_spill]] }
  0x57   : > { %s577_s7 = sshll.u32 %s576_s5, 4  ;;  %s644_s5 = scalar_lea.vmem [#allocation10], %s5413_s11  ;;  %s578_s7 = int_to_ptr.hbm [resolvable:$true] %s577_s7 }
  0x58   : > { %3290 = dma.hbm_to_vmem [thread:$0]  (!%p4081_p7), %s578_s7, 1024, %s580_s10, %s566_s13, %s5418_s15, %s5418_s15, %s5417_s0  }
  0x59   : > { %s652_s28 = sshll.u32 %s644_s5, 4  ;;  %s5420_s4 = scalar_lea.sflag [#allocation9], %s4076_s1  ;;  %s653_s28 = int_to_ptr.vmem [resolvable:$true] %s652_s28 }
  0x5a   : > { %s694_s6 = sshll.u32 %s4126_s18, 4  ;;  %s5421_s7 = sshll.u32 %s4073_s19, 3  ;;  %s695_s6 = int_to_ptr.hbm [resolvable:$true] %s694_s6 }
  0x5b   : > { %s688_s10 = scalar_lea.vmem [#allocation13], %s5421_s7  ;;  %s5422_s8 = scalar_lea.sflag [#allocation12], %s4076_s1 }
  0x5c   : > { %s649_s20 = scalar_lea.hbm %s5419_s14, %s4089_s23  ;;  %s696_s13 = sshll.u32 %s688_s10, 4  ;;  %s697_s13 = int_to_ptr.vmem [resolvable:$true] %s696_s13 }
  0x5d   : > { %s650_s12 = sshll.u32 %s649_s20, 4  ;;  %s5423_s9 = scalar_lea.sflag [#allocation15], %s4076_s1  ;;  %s651_s12 = int_to_ptr.hbm [resolvable:$true] %s650_s12 }
  0x5e   : > { %3296 = dma.hbm_to_vmem [thread:$0]  (!%p4081_p7), %s651_s12, 512, %s653_s28, %s5420_s4, %s5418_s15, %s5418_s15, %s5417_s0  }
  0x5f   : > { %3302 = dma.hbm_to_vmem [thread:$0]  (!%p4081_p7), %s695_s6, 128, %s697_s13, %s5422_s8  }
  0x60   : > { %3308 = dma.hbm_to_vmem [thread:$0]  (!%p4081_p7), %s4145_s30, 256, %s4143_s16, %s5423_s9, %s5418_s15, %s5418_s15, %s5417_s0  }
  0x61   : > { %s5424_s5 = sld [smem:[#allocation50_spill]]  ;;  %s770_s18 = scalar_lea.vmem [#allocation19], %s5413_s11 }
  0x62   : > { %s778_s19 = sshll.u32 %s770_s18, 4  ;;  %s5425_s12 = scalar_lea.sflag [#allocation18], %s4076_s1  ;;  %s779_s19 = int_to_ptr.vmem [resolvable:$true] %s778_s19 }
  0x63   : > { %s4255_s16 = sand.u32 (!%p4188_p5), 1, %s3916_s25  }
  0x65   : > { %790 = sbr.rel (%p4188_p5) target bundleno = 734 (0x2de), region = 84 }
  0x67   : > { %s775_s26 = scalar_lea.hbm %s5424_s5, %s4089_s23  ;;  %s793_s23 = scalar_lea.sflag (!%p4188_p5), [#allocation6], %s4255_s16 }
  0x68   : > { %s776_s28 = sshll.u32 %s775_s26, 4  ;;  %s3111_s26 = sshll.u32 (!%p4188_p5), %s4255_s16, 6  ;;  %s777_s28 = int_to_ptr.hbm [resolvable:$true] %s776_s28 }
  0x69   : > { %3314 = dma.hbm_to_vmem [thread:$0]  (!%p4081_p7), %s777_s28, 512, %s779_s19, %s5425_s12, %s5418_s15, %s5418_s15, %s5417_s0  }
  0x6a   : > { %s4259_s30 = scalar_lea.vmem [#allocation5], %s3111_s26 }
  0x6b   : > { %3879 = dma.done.wait (%p4168_p12), %s793_s23, 1024  }
  0x6c   : > { %3881 = vsyncadd (%p4168_p12), %s793_s23, 4294966272  ;;  %s802_s15 = sand.u32 1, %s4159_s3   ;;  %s3112_s1 = sshll.u32 %s4255_s16, 5 }
  0x6d   : > { %s803_s21 = scalar_lea.sflag [#allocation9], %s802_s15  ;;  %s4267_s17 = scalar_lea.vmem [#allocation8], %s3112_s1 }
  0x6e   : > { %3883 = dma.done.wait (%p4168_p12), %s803_s21, 1024  }
  0x6f   : > { %3885 = vsyncadd (%p4168_p12), %s803_s21, 4294966272  ;;  %s4273_s11 = scalar_lea.vmem [#allocation10], %s3112_s1  ;;  %s823_s0 = scalar_lea.sflag [#allocation12], %s802_s15 }
  0x70   : > { %s4275_s4 = scalar_lea.vmem [#allocation11], %s3111_s26 }
  0x71   : > { %3887 = dma.done.wait (%p4168_p12), %s823_s0, 1152  }
  0x72   : > { %3889 = vsyncadd (%p4168_p12), %s823_s0, 4294966144  ;;  %s3115_s6 = sshll.u32 %s4255_s16, 3  ;;  %s843_s10 = scalar_lea.sflag [#allocation15], %s802_s15 }
  0x73   : > { %s4282_s7 = scalar_lea.vmem [#allocation13], %s3115_s6  ;;  %s4284_s13 = scalar_lea.vmem [#allocation14], %s3115_s6 }
  0x74   : > { %3891 = dma.done.wait (%p4168_p12), %s843_s10, 384  }
  0x75   : > { %3893 = vsyncadd (%p4168_p12), %s843_s10, 4294966912  ;;  %s3117_s8 = sshll.u32 %s4255_s16, 4  ;;  %s863_s14 = scalar_lea.sflag [#allocation18], %s802_s15 }
  0x76   : > { %s4291_s9 = scalar_lea.vmem [#allocation16], %s3117_s8  ;;  %s4293_s20 = scalar_lea.vmem [#allocation17], %s3117_s8 }
  0x77   : > { %3895 = dma.done.wait (%p4168_p12), %s863_s14, 768  }
  0x78   : > { %3897 = vsyncadd (%p4168_p12), %s863_s14, 4294966528  ;;  %s4299_s5 = scalar_lea.vmem [#allocation19], %s3112_s1 }
  0x79   : > { %3899 = dma.done.wait (%p85_p9), [#allocation21], 512  }
  0x7a   : > { %3901 = vsyncadd (%p85_p9), [#allocation21], 4294966784  ;;  %s5426_s28 = sld [smem:[#allocation34_spill]]  ;;  %v1062_v0 = vld [vmem:[%s4259_s30 + $0x18] sm:$0xff]  ;;  %v1061_v2 = vld [vmem:[%s4259_s30 + $0x10] sm:$0xff]  ;;  %vm1030_vm0 = vcmask 261120  }
  0x7b   : > { %v3130_v1 = vld [vmem:[%s4259_s30 + $0x38] sm:$0xff]  ;;  %s5427_s12 = sld [smem:[#allocation40_spill]]  ;;  %1113 = vmatpush.msra.mxu0 %v1062_v0  ;;  %v3129_v3 = vld [vmem:[%s4259_s30 + $0x30] sm:$0xff]  ;;  %v1060_v4 = vld [vmem:[%s4259_s30 + $0x8] sm:$0xff]  ;;  %v3937_v18 = vmov 0.0   ;;  %vm1377_vm8 = vcmask 64512  }
  0x7c   : > { %1172 = vmatpush.msra.mxu1 %v3130_v1  ;;  %v3128_v5 = vld [vmem:[%s4259_s30 + $0x28] sm:$0xff]  ;;  %v1059_v8 = vld [vmem:[%s4259_s30] sm:$0xff]  ;;  %s5428_s1 = sld [smem:[#allocation51_spill]]  ;;  %v4339_v15 = vld [vmem:[#allocation20 + $0x18] sm:$0xff]  ;;  %1031 = vst.msk [vmem:[#allocation2] sm:$0xff] %vm1030_vm0, %v3937_v18 }
  0x7d   : > { %1114 = vmatpush.msra.mxu0 %v1061_v2  ;;  %v3127_v9 = vld [vmem:[%s4259_s30 + $0x20] sm:$0xff]  ;;  %s5429_s14 = sld [smem:[#allocation53_spill]]  ;;  %1032 = vst.msk [vmem:[#allocation2 + $0x8] sm:$0xff] %vm1030_vm0, %v3937_v18  ;;  %v4397_v23 = vld [vmem:[#allocation20 + $0x10] sm:$0xff]  ;;  %v4416_v28 = vld [vmem:[#allocation20 + $0x8] sm:$0xff] }
  0x7e   : > { %1173 = vmatpush.msra.mxu1 %v3129_v3  ;;  %1033 = vst.msk [vmem:[#allocation2 + $0x10] sm:$0xff] %vm1030_vm0, %v3937_v18  ;;  %s5430_s6 = sld [smem:[#allocation52_spill]]  ;;  %v4425_v30 = vld [vmem:[#allocation20] sm:$0xff] }
  0x7f   : > { %1115 = vmatpush.msra.mxu0 %v1060_v4  ;;  %1034 = vst.msk [vmem:[#allocation2 + $0x18] sm:$0xff] %vm1030_vm0, %v3937_v18 }
  0x80   : > { %p1002_p7 = scmp.lt.s32.totalorder %s5426_s28, 1  ;;  %1174 = vmatpush.msra.mxu1 %v3128_v5  ;;  %1035 = vst.msk [vmem:[#allocation2 + $0x20] sm:$0xff] %vm1030_vm0, %v3937_v18 }
  0x81   : > { %1116 = vmatpush.msra.mxu0 %v1059_v8  ;;  %1036 = vst.msk [vmem:[#allocation2 + $0x28] sm:$0xff] %vm1030_vm0, %v3937_v18 }
  0x82   : > { %s4307_s22 = scalar_select %p1002_p7, %s5426_s28, 1  ;;  %v1052_v10 = vld [vmem:[%s5428_s1] sm:$0xff]  ;;  %1175 = vmatpush.msra.mxu1 %v3127_v9  ;;  %v1053_v13 = vld [vmem:[%s5428_s1 + $0x8] sm:$0xff]  ;;  %v1054_v14 = vld [vmem:[%s5428_s1 + $0x10] sm:$0xff]  ;;  %1037 = vst.msk [vmem:[#allocation2 + $0x30] sm:$0xff] %vm1030_vm0, %v3937_v18 }
  0x83   : > { %3131 = vmatmul.msk.f32.vlgmr.msra.gmra.mxu0 %vm1030_vm0, %v1052_v10  ;;  %3138 = vmatmul.msk.f32.vlgmr.msra.gmra.mxu1 %vm1030_vm0, %v1052_v10  ;;  %v4344_v16 = vld [vmem:[%s5429_s14 + $0x18] sm:$0xff]  ;;  %1038 = vst.msk [vmem:[#allocation3] sm:$0xff] %vm1030_vm0, %v3937_v18  ;;  %v1056_v19 = vld [vmem:[%s5428_s1 + $0x20] sm:$0xff]  ;;  %v1057_v20 = vld [vmem:[%s5428_s1 + $0x28] sm:$0xff] }
  0x84   : > { %s3192_s18 = sshll.u32 %s4307_s22, 5  ;;  %v1055_v17 = vld [vmem:[%s5428_s1 + $0x18] sm:$0xff]  ;;  %2240 = vmatpush.msrb.mxu1 %v4339_v15  ;;  %1824 = vmatpush.msrb.mxu0 %v4344_v16  ;;  %1039 = vst.msk [vmem:[#allocation3 + $0x8] sm:$0xff] %vm1030_vm0, %v3937_v18  ;;  %v1058_v21 = vld [vmem:[%s5428_s1 + $0x30] sm:$0xff]  ;;  %v1296_v25 = vld [vmem:[%s5430_s6 + $0x8] sm:$0xff] }
  0x85   : > { %s1009_s26 = scalar_lea.vmem %s5427_s12, %s3192_s18  ;;  %1040 = vst.msk [vmem:[#allocation3 + $0x10] sm:$0xff] %vm1030_vm0, %v3937_v18  ;;  %v1298_v22 = vld [vmem:[%s5430_s6 + $0x18] sm:$0xff]  ;;  %v1297_v24 = vld [vmem:[%s5430_s6 + $0x10] sm:$0xff]  ;;  %v1295_v26 = vld [vmem:[%s5430_s6] sm:$0xff]  ;;  %s5438_s18 = sld [smem:[#allocation41_spill]] }
  0x86   : > { %v1071_v6 = vld [vmem:[%s1009_s26 + $0x18] sm:$0xff]  ;;  %v1070_v7 = vld [vmem:[%s1009_s26 + $0x10] sm:$0xff]  ;;  %v1069_v11 = vld [vmem:[%s1009_s26 + $0x8] sm:$0xff]  ;;  %1041 = vst.msk [vmem:[#allocation3 + $0x18] sm:$0xff] %vm1030_vm0, %v3937_v18  ;;  %1324 = vmatpush.msra.mxu3 %v1298_v22  ;;  %2241 = vmatpush.msrb.mxu1 %v4397_v23 }
  0x87   : > { %1231 = vmatpush.msra.mxu2 %v1071_v6  ;;  %v1068_v12 = vld [vmem:[%s1009_s26] sm:$0xff]  ;;  %1042 = vst.msk [vmem:[#allocation3 + $0x20] sm:$0xff] %vm1030_vm0, %v3937_v18  ;;  %v4413_v27 = vld [vmem:[%s5429_s14 + $0x10] sm:$0xff]  ;;  %v4423_v29 = vld [vmem:[%s5429_s14 + $0x8] sm:$0xff] }
  0x88   : > { %1043 = vst.msk [vmem:[#allocation3 + $0x28] sm:$0xff] %vm1030_vm0, %v3937_v18  ;;  %1325 = vmatpush.msra.mxu3 %v1297_v24  ;;  %1825 = vmatpush.msrb.mxu0 %v4413_v27  ;;  %v1072_v31 = vld [vmem:[#allocation2] sm:$0xff]  ;;  %v1073_v39 = vld [vmem:[#allocation2 + $0x8] sm:$0xff]  ;;  %v1074_v49 = vld [vmem:[#allocation2 + $0x10] sm:$0xff] }
  0x89   : > { %1232 = vmatpush.msra.mxu2 %v1070_v7  ;;  %1044 = vst.msk [vmem:[#allocation3 + $0x30] sm:$0xff] %vm1030_vm0, %v3937_v18  ;;  %2242 = vmatpush.msrb.mxu1 %v4416_v28  ;;  %v4433_v33 = vld [vmem:[%s5429_s14] sm:$0xff]  ;;  %v1075_v59 = vld [vmem:[#allocation2 + $0x18] sm:$0xff] }
  0x8a   : > { %1045 = vst.msk [vmem:[#allocation4] sm:$0xff] %vm1030_vm0, %v3937_v18  ;;  %1326 = vmatpush.msra.mxu3 %v1296_v25  ;;  %1826 = vmatpush.msrb.mxu0 %v4423_v29  ;;  %v1153_v32 = vld [vmem:[#allocation3] sm:$0xff]  ;;  %v1076_v6 = vld [vmem:[#allocation2 + $0x20] sm:$0xff] }
  0x8b   : > { %1233 = vmatpush.msra.mxu2 %v1069_v11  ;;  %3139 = vmatmul.msk.f32.gmra.mxu1 %vm1030_vm0, %v1053_v13  ;;  %1046 = vst.msk [vmem:[#allocation4 + $0x8] sm:$0xff] %vm1030_vm0, %v3937_v18  ;;  %v1154_v38 = vld [vmem:[#allocation3 + $0x8] sm:$0xff] }
  0x8c   : > { %3132 = vmatmul.msk.f32.gmra.mxu0 %vm1030_vm0, %v1053_v13  ;;  %1047 = vst.msk [vmem:[#allocation4 + $0x10] sm:$0xff] %vm1030_vm0, %v3937_v18  ;;  %1327 = vmatpush.msra.mxu3 %v1295_v26  ;;  %v1155_v48 = vld [vmem:[#allocation3 + $0x10] sm:$0xff] }
  0x8d   : > { %1234 = vmatpush.msra.mxu2 %v1068_v12  ;;  %1048 = vst.msk [vmem:[#allocation4 + $0x18] sm:$0xff] %vm1030_vm0, %v3937_v18  ;;  %2243 = vmatpush.msrb.mxu1 %v4425_v30  ;;  %v1156_v58 = vld [vmem:[#allocation3 + $0x18] sm:$0xff] }
  0x8e   : > { %3145 = vmatmul.msk.f32.vlgmr.msra.gmra.mxu2 %vm1030_vm0, %v1052_v10  ;;  %1049 = vst.msk [vmem:[#allocation4 + $0x20] sm:$0xff] %vm1030_vm0, %v3937_v18  ;;  %1347 = vmatpush.msrb.mxu3 %v1298_v22  ;;  %v1157_v5 = vld [vmem:[#allocation3 + $0x20] sm:$0xff] }
  0x8f   : > { %2281 = vmatpush.msrb.mxu2 %v4339_v15  ;;  %1050 = vst.msk [vmem:[#allocation4 + $0x28] sm:$0xff] %vm1030_vm0, %v3937_v18  ;;  %1827 = vmatpush.msrb.mxu0 %v4433_v33 }
  0x90   : > { %1051 = vst.msk [vmem:[#allocation4 + $0x30] sm:$0xff] %vm1030_vm0, %v3937_v18  ;;  %1348 = vmatpush.msrb.mxu3 %v1297_v24 }
  0x91   : > { %2282 = vmatpush.msrb.mxu2 %v4397_v23  ;;  %v1212_v42 = vld [vmem:[#allocation4] sm:$0xff] }
  0x92   : > { %1349 = vmatpush.msrb.mxu3 %v1296_v25  ;;  %v1213_v53 = vld [vmem:[#allocation4 + $0x8] sm:$0xff] }
  0x93   : > { %3140 = vmatmul.msk.f32.gmra.mxu1 %vm1030_vm0, %v1054_v14  ;;  %2283 = vmatpush.msrb.mxu2 %v4416_v28  ;;  %v1214_v63 = vld [vmem:[#allocation4 + $0x10] sm:$0xff] }
  0x94   : > { %3133 = vmatmul.msk.f32.gmra.mxu0 %vm1030_vm0, %v1054_v14  ;;  %1350 = vmatpush.msrb.mxu3 %v1295_v26  ;;  %v1215_v9 = vld [vmem:[#allocation4 + $0x18] sm:$0xff] }
  0x95   : > { %2284 = vmatpush.msrb.mxu2 %v4425_v30 }
  0x96   : > { %3146 = vmatmul.msk.f32.gmra.mxu2 %vm1030_vm0, %v1053_v13 }
  0x9b   : > { %3141 = vmatmul.msk.f32.gmra.mxu1 %vm1030_vm0, %v1055_v17 }
  0x9c   : > { %3134 = vmatmul.msk.f32.gmra.mxu0 %vm1030_vm0, %v1055_v17 }
  0x9e   : > { %3147 = vmatmul.msk.f32.gmra.mxu2 %vm1030_vm0, %v1054_v14 }
  0xa3   : > { %3142 = vmatmul.msk.f32.gmra.mxu1 %vm1030_vm0, %v1056_v19 }
  0xa4   : > { %3135 = vmatmul.msk.f32.gmra.mxu0 %vm1030_vm0, %v1056_v19 }
  0xa6   : > { %3148 = vmatmul.msk.f32.gmra.mxu2 %vm1030_vm0, %v1055_v17 }
  0xab   : > { %3143 = vmatmul.msk.f32.gmra.mxu1 %vm1030_vm0, %v1057_v20 }
  0xac   : > { %3136 = vmatmul.msk.f32.gmra.mxu0 %vm1030_vm0, %v1057_v20 }
  0xae   : > { %3149 = vmatmul.msk.f32.gmra.mxu2 %vm1030_vm0, %v1056_v19  ;;  %v1158_v19 = vld [vmem:[#allocation3 + $0x28] sm:$0xff] }
  0xb3   : > { %3144 = vmatmul.msk.f32.gmra.mxu1 %vm1030_vm0, %v1058_v21 }
  0xb4   : > { %3137 = vmatmul.msk.f32.gmra.mxu0 %vm1030_vm0, %v1058_v21 }
  0xb6   : > { %3150 = vmatmul.msk.f32.gmra.mxu2 %vm1030_vm0, %v1057_v20  ;;  %v1077_v20 = vld [vmem:[#allocation2 + $0x28] sm:$0xff] }
  0xbe   : > { %3151 = vmatmul.msk.f32.gmra.mxu2 %vm1030_vm0, %v1058_v21 }
 0x100   : > { %v1118_v34 = vpop.f32.mrf.mxu0  ;;  %v1177_v35 = vpop.f32.mrf.mxu1 }
 0x101   : > { %v1139_v36 = vadd.f32 %v1118_v34, %v1072_v31  ;;  %v1198_v37 = vadd.f32 %v1177_v35, %v1153_v32  ;;  %v1078_v32 = vld [vmem:[#allocation2 + $0x30] sm:$0xff]  ;;  %v1217_v35 = vld [vmem:[#allocation4 + $0x28] sm:$0xff] }
 0x103   : > { %1146 = vst.msk [vmem:[#allocation2] sm:$0xff] %vm1030_vm0, %v1139_v36 }
 0x104   : > { %1205 = vst.msk [vmem:[#allocation3] sm:$0xff] %vm1030_vm0, %v1198_v37 }
 0x108   : > { %v1180_v40 = vpop.f32.mrf.mxu1 }
 0x109   : > { %v1121_v41 = vpop.f32.mrf.mxu0  ;;  %v1199_v43 = vadd.f32 %v1180_v40, %v1154_v38 }
 0x10a   : > { %v1140_v44 = vadd.f32 %v1121_v41, %v1073_v39  ;;  %v1274_v45 = vld [vmem:[#allocation2] sm:$0xff] }
 0x10b   : > { %1206 = vst.msk [vmem:[#allocation3 + $0x8] sm:$0xff] %vm1030_vm0, %v1199_v43  ;;  %3152 = vmatmul.msk.f32.vlgmr.msra.gmra.mxu3 %vm1030_vm0, %v1274_v45  ;;  %v1281_v51 = vld [vmem:[#allocation3] sm:$0xff] }
 0x10c   : > { %1147 = vst.msk [vmem:[#allocation2 + $0x8] sm:$0xff] %vm1030_vm0, %v1140_v44  ;;  %1403 = vmatpush.msra.mxu3 %v1298_v22 }
 0x10e   : > { %1404 = vmatpush.msra.mxu3 %v1297_v24  ;;  %v1216_v24 = vld [vmem:[#allocation4 + $0x20] sm:$0xff] }
 0x110   : > { %v1183_v50 = vpop.f32.mrf.mxu1  ;;  %1405 = vmatpush.msra.mxu3 %v1296_v25 }
 0x111   : > { %v1236_v46 = vpop.f32.mrf.mxu2  ;;  %v1124_v52 = vpop.f32.mrf.mxu0  ;;  %v1200_v54 = vadd.f32 %v1183_v50, %v1155_v48  ;;  %v1578_v48 = vld [vmem:[%s4284_s13] sm:$0xff]  ;;  %v1411_v50 = vld [vmem:[%s4282_s7] sm:$0xff]  ;;  %s3193_s7 = sshll.u32 %s4307_s22, 4 }
 0x112   : > { %v1257_v47 = vadd.f32 %v1236_v46, %v1212_v42  ;;  %v1141_v55 = vadd.f32 %v1124_v52, %v1074_v49  ;;  %1406 = vmatpush.msra.mxu3 %v1295_v26  ;;  %v1282_v37 = vld [vmem:[#allocation3 + $0x8] sm:$0xff]  ;;  %v1579_v49 = vsub.f32 0.0, %v1578_v48  ;;  %s1015_s3 = scalar_lea.vmem %s5438_s18, %s3193_s7 }
 0x113   : > { %1207 = vst.msk [vmem:[#allocation3 + $0x10] sm:$0xff] %vm1030_vm0, %v1200_v54  ;;  %3153 = vmatmul.msk.f32.vlgmr.msrb.gmra.mxu3 %vm1030_vm0, %v1281_v51  ;;  %v1275_v12 = vld [vmem:[#allocation2 + $0x8] sm:$0xff]  ;;  %v1218_v42 = vld [vmem:[#allocation4 + $0x30] sm:$0xff]  ;;  %v1412_v51 = vsub.f32 0.0, %v1411_v50 }
 0x114   : > { %1264 = vst.msk [vmem:[#allocation4] sm:$0xff] %vm1030_vm0, %v1257_v47  ;;  %1710 = vmatpush.msrb.mxu3 %v4344_v16  ;;  %v1580_v52 = vmul.f32 1.442695, %v1579_v49 }
 0x115   : > { %1148 = vst.msk [vmem:[#allocation2 + $0x10] sm:$0xff] %vm1030_vm0, %v1141_v55 }
 0x116   : > { %1711 = vmatpush.msrb.mxu3 %v4413_v27  ;;  %3378 = vpow2.f32 %v1580_v52 }
 0x118   : > { %v1186_v60 = vpop.f32.mrf.mxu1  ;;  %1712 = vmatpush.msrb.mxu3 %v4423_v29 }
 0x119   : > { %v1239_v56 = vpop.f32.mrf.mxu2  ;;  %v1127_v62 = vpop.f32.mrf.mxu0  ;;  %v1201_v0 = vadd.f32 %v1186_v60, %v1156_v58  ;;  %v1835_v60 = vld [vmem:[%s4291_s9] sm:$0xff] }
 0x11a   : > { %v1258_v57 = vadd.f32 %v1239_v56, %v1213_v53  ;;  %v1142_v1 = vadd.f32 %v1127_v62, %v1075_v59  ;;  %1713 = vmatpush.msrb.mxu3 %v4433_v33  ;;  %v1283_v43 = vld [vmem:[#allocation3 + $0x10] sm:$0xff]  ;;  %v1413_v53 = vmul.f32 1.442695, %v1412_v51 }
 0x11b   : > { %v1288_v61 = vld [vmem:[#allocation4] sm:$0xff]  ;;  %1208 = vst.msk [vmem:[#allocation3 + $0x18] sm:$0xff] %vm1030_vm0, %v1201_v0 }
 0x11c   : > { %1265 = vst.msk [vmem:[#allocation4 + $0x8] sm:$0xff] %vm1030_vm0, %v1258_v57  ;;  %3155 = vmatmul.msk.f32.vlgmr.msra.gmra.mxu3 %vm1030_vm0, %v1288_v61  ;;  %3380 = vpow2.f32 %v1413_v53  ;;  %v3379_v55 = vpop.eup %3378  ;;  %v1836_v61 = vld [vmem:[%s4291_s9 + $0x8] sm:$0xff] }
 0x11d   : > { %1149 = vst.msk [vmem:[#allocation2 + $0x18] sm:$0xff] %vm1030_vm0, %v1142_v1  ;;  %1739 = vmatpush.msra.mxu3 %v4344_v16  ;;  %v1582_v57 = vadd.f32 1.0, %v3379_v55  ;;  %v1838_v0 = vsub.f32 0.0, %v1836_v61 }
 0x11f   : > { %1740 = vmatpush.msra.mxu3 %v4413_v27  ;;  %v1276_v27 = vld [vmem:[#allocation2 + $0x10] sm:$0xff]  ;;  %3382 = vrcp.f32 %v1582_v57  ;;  %vm1588_vm1 = vweird.f32 %v1582_v57 }
 0x120   : > { %v1189_v7 = vpop.f32.mrf.mxu1 }
 0x121   : > { %v1242_v2 = vpop.f32.mrf.mxu2  ;;  %v1130_v8 = vpop.f32.mrf.mxu0  ;;  %1741 = vmatpush.msra.mxu3 %v4423_v29  ;;  %v1202_v10 = vadd.f32 %v1189_v7, %v1157_v5  ;;  %v1594_v5 = vand.u32 2147483648, %v1582_v57 }
 0x122   : > { %v1259_v3 = vadd.f32 %v1242_v2, %v1214_v63  ;;  %v1143_v11 = vadd.f32 %v1130_v8, %v1076_v6  ;;  %v1284_v13 = vld [vmem:[#allocation3 + $0x18] sm:$0xff]  ;;  %v3381_v56 = vpop.eup %3380  ;;  %v1837_v63 = vsub.f32 0.0, %v1835_v60  ;;  %v1841_v8 = vmul.f32 1.442695, %v1838_v0 }
 0x123   : > { %v1289_v4 = vld [vmem:[#allocation4 + $0x8] sm:$0xff]  ;;  %1742 = vmatpush.msra.mxu3 %v4433_v33  ;;  %1209 = vst.msk [vmem:[#allocation3 + $0x20] sm:$0xff] %vm1030_vm0, %v1202_v10  ;;  %3171 = vmatmul.msk.f32.vlgmr.msrb.gmra.mxu2 %vm1030_vm0, %v1284_v13  ;;  %v1415_v59 = vadd.f32 1.0, %v3381_v56 }
 0x124   : > { %1266 = vst.msk [vmem:[#allocation4 + $0x10] sm:$0xff] %vm1030_vm0, %v1259_v3  ;;  %3163 = vmatmul.msk.f32.vlgmr.msrb.gmra.mxu0 %vm1030_vm0, %v1289_v4  ;;  %3157 = vmatmul.msk.f32.vlgmr.msrb.gmra.mxu3 %vm1030_vm0, %v1275_v12  ;;  %v1277_v16 = vld [vmem:[#allocation2 + $0x18] sm:$0xff]  ;;  %v1592_v4 = vand.u32 2147483647, %v1582_v57  ;;  %v1839_v7 = vmul.f32 1.442695, %v1837_v63 }
 0x125   : > { %1150 = vst.msk [vmem:[#allocation2 + $0x20] sm:$0xff] %vm1030_vm0, %v1143_v11  ;;  %3167 = vmatmul.msk.f32.vlgmr.msrb.gmra.mxu1 %vm1030_vm0, %v1277_v16  ;;  %2423 = vmatpush.msrb.mxu3 %v4339_v15  ;;  %3384 = vrcp.f32 %v1415_v59  ;;  %v3383_v62 = vpop.eup %3382  ;;  %vm1421_vm3 = vweird.f32 %v1415_v59  ;;  %v1427_v10 = vand.u32 2147483648, %v1415_v59  ;;  %v1425_v12 = vand.u32 2147483647, %v1415_v59 }
 0x126   : > { %v1584_v3 = vmul.f32 %v3383_v62, %v1582_v57  ;;  %vm1589_vm2 = vweird.f32 %v3383_v62  ;;  %3386 = vpow2.f32 %v1839_v7  ;;  %v1595_v16 = vor.u32 1.1754944e-38, %v1594_v5 }
 0x127   : > { %2424 = vmatpush.msrb.mxu3 %v4397_v23  ;;  %3388 = vpow2.f32 %v1841_v8  ;;  %vm4494_vm5 = vmor %vm1588_vm1, %vm1589_vm2  ;;  %vm1593_vm6 = vcmp.eq.f32.partialorder %v1592_v4, 8.507059e+37  ;;  %vm1426_vm9 = vcmp.eq.f32.partialorder %v1425_v12, 8.507059e+37  ;;  %vm1793_vm2 = vcmask 130048  }
 0x128   : > { %v1192_v21 = vpop.f32.mrf.mxu1 }
 0x129   : > { %v1245_v14 = vpop.f32.mrf.mxu2  ;;  %v1133_v22 = vpop.f32.mrf.mxu0  ;;  %2425 = vmatpush.msrb.mxu3 %v4416_v28  ;;  %v1203_v25 = vadd.f32 %v1192_v21, %v1158_v19  ;;  %v1159_v28 = vld [vmem:[#allocation3 + $0x30] sm:$0xff] }
 0x12a   : > { %v1260_v17 = vadd.f32 %v1245_v14, %v1215_v9  ;;  %v1144_v26 = vadd.f32 %v1133_v22, %v1077_v20  ;;  %v1285_v29 = vld [vmem:[#allocation3 + $0x20] sm:$0xff]  ;;  %v1585_v9 = vsub.f32 1.0, %v1584_v3  ;;  %v1428_v20 = vor.u32 1.1754944e-38, %v1427_v10  ;;  %v2066_v22 = vld [vmem:[%s4293_s20 + $0x8] sm:$0xff] }
 0x12b   : > { %v1290_v18 = vld [vmem:[#allocation4 + $0x10] sm:$0xff]  ;;  %2426 = vmatpush.msrb.mxu3 %v4425_v30  ;;  %1210 = vst.msk [vmem:[#allocation3 + $0x28] sm:$0xff] %vm1030_vm0, %v1203_v25  ;;  %3172 = vmatmul.msk.f32.gmra.mxu2 %vm1030_vm0, %v1285_v29  ;;  %v3385_v1 = vpop.eup %3384  ;;  %v2065_v21 = vld [vmem:[%s4293_s20] sm:$0xff]  ;;  %v2068_v29 = vsub.f32 0.0, %v2066_v22  ;;  %s5437_s20 = sld [smem:[#allocation42_spill]] }
 0x12c   : > { %3164 = vmatmul.msk.f32.gmra.mxu0 %vm1030_vm0, %v1290_v18  ;;  %1267 = vst.msk [vmem:[#allocation4 + $0x18] sm:$0xff] %vm1030_vm0, %v1260_v17  ;;  %3158 = vmatmul.msk.f32.gmra.mxu3 %vm1030_vm0, %v1276_v27  ;;  %v1278_v15 = vld [vmem:[#allocation2 + $0x20] sm:$0xff]  ;;  %v1417_v6 = vmul.f32 %v3385_v1, %v1415_v59  ;;  %vm1422_vm4 = vweird.f32 %v3385_v1  ;;  %v1586_v13 = vmul.f32 %v3383_v62, %v1585_v9  ;;  %v2067_v25 = vsub.f32 0.0, %v2065_v21 }
 0x12d   : > { %1151 = vst.msk [vmem:[#allocation2 + $0x28] sm:$0xff] %vm1030_vm0, %v1144_v26  ;;  %3168 = vmatmul.msk.f32.gmra.mxu1 %vm1030_vm0, %v1278_v15  ;;  %vm4498_vm7 = vmor %vm1421_vm3, %vm1422_vm4 }
 0x12e   : > { %v1418_v11 = vsub.f32 1.0, %v1417_v6  ;;  %v1587_v18 = vadd.f32 %v3383_v62, %v1586_v13 }
 0x130   : > { %v1195_v33 = vpop.f32.mrf.mxu1  ;;  %v1419_v17 = vmul.f32 %v3385_v1, %v1418_v11  ;;  %v1591_v27 = vsel %vm4494_vm5, %v3383_v62, %v1587_v18 }
 0x131   : > { %v1248_v31 = vpop.f32.mrf.mxu2  ;;  %v1136_v34 = vpop.f32.mrf.mxu0  ;;  %v1204_v30 = vadd.f32 %v1195_v33, %v1159_v28  ;;  %v4506_v15 = vsel %vm1593_vm6, %v1595_v16, %v1591_v27  ;;  %v2069_v28 = vmul.f32 1.442695, %v2067_v25  ;;  %s1020_s10 = scalar_lea.vmem %s5437_s20, %s3193_s7 }
 0x132   : > { %v1261_v23 = vadd.f32 %v1248_v31, %v1216_v24  ;;  %v1145_v36 = vadd.f32 %v1136_v34, %v1078_v32  ;;  %v1286_v38 = vld [vmem:[#allocation3 + $0x28] sm:$0xff]  ;;  %v1420_v24 = vadd.f32 %v3385_v1, %v1419_v17  ;;  %v3387_v31 = vpop.eup %3386  ;;  %v1631_v33 = vsel %vm1377_vm8, %v4506_v15, 0.0 }
 0x133   : > { %1211 = vst.msk [vmem:[#allocation3 + $0x30] sm:$0xff] %vm1030_vm0, %v1204_v30  ;;  %3173 = vmatmul.msk.f32.gmra.mxu2 %vm1030_vm0, %v1286_v38  ;;  %v1291_v54 = vld [vmem:[#allocation4 + $0x18] sm:$0xff]  ;;  %v3389_v32 = vpop.eup %3388  ;;  %1632 = vadd.xlane.f32.xlu1 %v1631_v33  ;;  %3390 = vpow2.f32 %v2069_v28  ;;  %v1614_v3 = vsub.f32 1.0, %v4506_v15 }
 0x134   : > { %1268 = vst.msk [vmem:[#allocation4 + $0x20] sm:$0xff] %vm1030_vm0, %v1261_v23  ;;  %3159 = vmatmul.msk.f32.vlgmr.msra.gmra.mxu3 %vm1030_vm0, %v1282_v37  ;;  %v1279_v40 = vld [vmem:[#allocation2 + $0x28] sm:$0xff]  ;;  %v1424_v23 = vsel %vm4498_vm7, %v3385_v1, %v1420_v24  ;;  %v2071_v37 = vmul.f32 1.442695, %v2068_v29 }
 0x135   : > { %1152 = vst.msk [vmem:[#allocation2 + $0x30] sm:$0xff] %vm1030_vm0, %v1145_v36  ;;  %3169 = vmatmul.msk.f32.gmra.mxu1 %vm1030_vm0, %v1279_v40  ;;  %v4512_v34 = vsel %vm1426_vm9, %v1428_v20, %v1424_v23  ;;  %v1844_v36 = vadd.f32 1.0, %v3389_v32  ;;  %v1644_v9 = vsel %vm1377_vm8, %v1614_v3, 0.0 }
 0x136   : > { %v1476_v30 = vsel %vm1377_vm8, %v4512_v34, 0.0  ;;  %v1448_v4 = vsub.f32 1.0, %v4512_v34 }
 0x137   : > { %1477 = vadd.xlane.f32.xlu2 %v1476_v30  ;;  %v1871_v48 = vand.u32 2147483648, %v1844_v36  ;;  %vm1865_vm13 = vweird.f32 %v1844_v36  ;;  %v1869_v57 = vand.u32 2147483647, %v1844_v36 }
 0x138   : > { %v1500_v10 = vsel %vm1377_vm8, %v1448_v4, 0.0 }
 0x139   : > { %v1251_v39 = vpop.f32.mrf.mxu2  ;;  %v3391_v38 = vpop.eup %3390  ;;  %vm1870_vm3 = vcmp.eq.f32.partialorder %v1869_v57, 8.507059e+37  ;;  %1501 = vadd.xlane.f32.xlu0 %v1500_v10 }
 0x13a   : > { %v1262_v41 = vadd.f32 %v1251_v39, %v1217_v35  ;;  %v1287_v44 = vld [vmem:[#allocation3 + $0x30] sm:$0xff]  ;;  %v1843_v35 = vadd.f32 1.0, %v3387_v31  ;;  %v2073_v39 = vadd.f32 1.0, %v3391_v38 }
 0x13b   : > { %3174 = vmatmul.msk.f32.gmra.mxu2 %vm1030_vm0, %v1287_v44  ;;  %v1292_v58 = vld [vmem:[#allocation4 + $0x20] sm:$0xff] }
 0x13c   : > { %1269 = vst.msk [vmem:[#allocation4 + $0x28] sm:$0xff] %vm1030_vm0, %v1262_v41  ;;  %3160 = vmatmul.msk.f32.gmra.mxu3 %vm1030_vm0, %v1283_v43  ;;  %v1280_v46 = vld [vmem:[#allocation2 + $0x30] sm:$0xff]  ;;  %3392 = vrcp.f32 %v1843_v35  ;;  %vm1850_vm10 = vweird.f32 %v1843_v35  ;;  %v1854_v51 = vand.u32 2147483647, %v1843_v35  ;;  %v2086_v7 = vand.u32 2147483648, %v2073_v39 }
 0x13d   : > { %3170 = vmatmul.msk.f32.gmra.mxu1 %vm1030_vm0, %v1280_v46  ;;  %3394 = vrcp.f32 %v1844_v36  ;;  %v1856_v46 = vand.u32 2147483648, %v1843_v35  ;;  %vm2080_vm4 = vweird.f32 %v2073_v39  ;;  %v2084_v13 = vand.u32 2147483647, %v2073_v39 }
 0x13e   : > { %3396 = vpow2.f32 %v2071_v37  ;;  %vm1855_vm15 = vcmp.eq.f32.partialorder %v1854_v51, 8.507059e+37  ;;  %v2087_v14 = vor.u32 1.1754944e-38, %v2086_v7 }
 0x13f   : > { %3398 = vrcp.f32 %v2073_v39  ;;  %1645 = vadd.xlane.f32.xlu2 %v1644_v9  ;;  %vm2085_vm7 = vcmp.eq.f32.partialorder %v2084_v13, 8.507059e+37 }
 0x141   : > { %v1254_v45 = vpop.f32.mrf.mxu2 }
 0x142   : > { %v1263_v47 = vadd.f32 %v1254_v45, %v1218_v42  ;;  %v3393_v40 = vpop.eup %3392 }
 0x143   : > { %v1293_v2 = vld [vmem:[#allocation4 + $0x28] sm:$0xff]  ;;  %v3395_v41 = vpop.eup %3394  ;;  %v1846_v42 = vmul.f32 %v3393_v40, %v1843_v35  ;;  %vm1851_vm11 = vweird.f32 %v3393_v40 }
 0x144   : > { %1270 = vst.msk [vmem:[#allocation4 + $0x30] sm:$0xff] %vm1030_vm0, %v1263_v47  ;;  %3179 = vmatmul.msk.f32.vlgmr.msrb.gmra.mxu3 %vm1030_vm0, %v1291_v54  ;;  %v3397_v43 = vpop.eup %3396  ;;  %v1861_v44 = vmul.f32 %v3395_v41, %v1844_v36  ;;  %vm4517_vm12 = vmor %vm1850_vm10, %vm1851_vm11  ;;  %v1857_v54 = vor.u32 1.1754944e-38, %v1856_v46  ;;  %vm1866_vm14 = vweird.f32 %v3395_v41  ;;  %v2440_v46 = vld [vmem:[%s4299_s5] sm:$0xff] }
 0x145   : > { %v1847_v45 = vsub.f32 1.0, %v1846_v42  ;;  %v2074_v49 = vadd.f32 1.0, %v3397_v43  ;;  %v3399_v52 = vpop.eup %3398  ;;  %vm1867_vm1 = vmor %vm1865_vm13, %vm1866_vm14  ;;  %v1431_v42 = vadd.f32 1e-08, %v4512_v34 }
 0x146   : > { %v1862_v47 = vsub.f32 1.0, %v1861_v44  ;;  %v2076_v60 = vmul.f32 %v3399_v52, %v2073_v39  ;;  %vm2081_vm5 = vweird.f32 %v3399_v52 }
 0x147   : > { %v1848_v50 = vmul.f32 %v3393_v40, %v1847_v45  ;;  %3400 = vrcp.f32 %v2074_v49  ;;  %vm2082_vm6 = vmor %vm2080_vm4, %vm2081_vm5  ;;  %v2101_v18 = vand.u32 2147483648, %v2074_v49  ;;  %vm2095_vm9 = vweird.f32 %v2074_v49 }
 0x148   : > { %v1863_v55 = vmul.f32 %v3395_v41, %v1862_v47  ;;  %v2077_v0 = vsub.f32 1.0, %v2076_v60  ;;  %v2099_v21 = vand.u32 2147483647, %v2074_v49  ;;  %v1615_v45 = vadd.f32 1e-08, %v1614_v3 }
 0x149   : > { %v1849_v56 = vadd.f32 %v3393_v40, %v1848_v50  ;;  %v2102_v25 = vor.u32 1.1754944e-38, %v2101_v18  ;;  %v2444_v47 = vsub.f32 0.0, %v2440_v46 }
 0x14a   : > { %v1864_v59 = vadd.f32 %v3395_v41, %v1863_v55  ;;  %v2078_v6 = vmul.f32 %v3399_v52, %v2077_v0 }
 0x14b   : > { %v1294_v26 = vld [vmem:[#allocation4 + $0x30] sm:$0xff]  ;;  %v1853_v61 = vsel %vm4517_vm12, %v3393_v40, %v1849_v56  ;;  %vm2100_vm12 = vcmp.eq.f32.partialorder %v2099_v21, 8.507059e+37  ;;  %v2448_v50 = vmul.f32 1.442695, %v2444_v47 }
 0x14c   : > { %3180 = vmatmul.msk.f32.gmra.mxu3 %vm1030_vm0, %v1292_v58  ;;  %v1872_v58 = vor.u32 1.1754944e-38, %v1871_v48  ;;  %v4523_v62 = vsel %vm1855_vm15, %v1857_v54, %v1853_v61  ;;  %v1868_v63 = vsel %vm1867_vm1, %v3395_v41, %v1864_v59  ;;  %v2079_v12 = vadd.f32 %v3399_v52, %v2078_v6  ;;  %v3156_v59 = vld [vmem:[%s1020_s10 + $0x8] sm:$0xff] }
 0x14d   : > { %v3401_v11 = vpop.eup %3400  ;;  %v1899_v24 = vsub.f32 1.0, %v4523_v62  ;;  %v1598_v41 = vadd.f32 1e-08, %v4506_v15  ;;  %v1875_v44 = vadd.f32 1e-08, %v4523_v62  ;;  %v2441_v15 = vld [vmem:[%s4299_s5 + $0x8] sm:$0xff] }
 0x14e   : > { %v4525_v1 = vsel %vm1870_vm3, %v1872_v58, %v1868_v63  ;;  %v2091_v16 = vmul.f32 %v3401_v11, %v2074_v49  ;;  %v2083_v17 = vsel %vm2082_vm6, %v3399_v52, %v2079_v12  ;;  %vm2096_vm10 = vweird.f32 %v3401_v11  ;;  %v1548_v52 = vld [vmem:[%s1020_s10] sm:$0xff]  ;;  %v3154_v58 = vld [vmem:[%s1015_s3 + $0x8] sm:$0xff] }
 0x14f   : > { %v1937_v5 = vsel %vm1793_vm2, %v4525_v1, 0.0  ;;  %v2088_v20 = vsel %vm2085_vm7, %v2087_v14, %v2083_v17  ;;  %vm2097_vm11 = vmor %vm2095_vm9, %vm2096_vm10  ;;  %v1964_v31 = vsel %vm1793_vm2, %v1899_v24, 0.0  ;;  %3402 = vlog2.f32 %v1598_v41 }
 0x150   : > { %v2092_v19 = vsub.f32 1.0, %v2091_v16  ;;  %v2127_v29 = vsub.f32 1.0, %v2088_v20  ;;  %v2151_v32 = vsel %vm1793_vm2, %v2088_v20, 0.0  ;;  %3404 = vlog2.f32 %v1431_v42 }
 0x151   : > { %v1449_v48 = vadd.f32 1e-08, %v1448_v4  ;;  %3406 = vlog2.f32 %v1875_v44  ;;  %v2105_v49 = vadd.f32 1e-08, %v2088_v20  ;;  %v1876_v34 = vadd.f32 1e-08, %v4525_v1 }
 0x152   : > { %v2093_v22 = vmul.f32 %v3401_v11, %v2092_v19  ;;  %v2166_v37 = vsel %vm1793_vm2, %v2127_v29, 0.0  ;;  %3408 = vlog2.f32 %v1615_v45  ;;  %v2129_v53 = vadd.f32 1e-08, %v2127_v29 }
 0x153   : > { %3410 = vpow2.f32 %v2448_v50  ;;  %v2445_v55 = vsub.f32 0.0, %v2441_v15  ;;  %v1901_v60 = vadd.f32 1e-08, %v1899_v24 }
 0x154   : > { %3181 = vmatmul.msk.f32.gmra.mxu3 %vm1030_vm0, %v1293_v2  ;;  %v1936_v2 = vsel %vm1793_vm2, %v4523_v62, 0.0  ;;  %v2094_v27 = vadd.f32 %v3401_v11, %v2093_v22  ;;  %3412 = vlog2.f32 %v1449_v48  ;;  %v1356_v62 = vld [vmem:[%s1015_s3] sm:$0xff] }
 0x155   : > { %v1938_v8 = vadd.f32 %v1937_v5, %v1936_v2  ;;  %v3403_v56 = vpop.eup %3402  ;;  %3414 = vlog2.f32 %v2105_v49  ;;  %v2450_v7 = vmul.f32 1.442695, %v2445_v55 }
 0x156   : > { %v2098_v28 = vsel %vm2097_vm11, %v3401_v11, %v2094_v27  ;;  %v3405_v61 = vpop.eup %3404  ;;  %3416 = vlog2.f32 %v1876_v34  ;;  %v2442_v27 = vld [vmem:[%s4299_s5 + $0x10] sm:$0xff] }
 0x157   : > { %1939 = vadd.xlane.f32.xlu1 %v1938_v8  ;;  %v2103_v35 = vsel %vm2100_vm12, %v2102_v25, %v2098_v28  ;;  %v3407_v2 = vpop.eup %3406  ;;  %3418 = vlog2.f32 %v2129_v53  ;;  %v1433_v14 = vmul.f32 0.6931472, %v3405_v61  ;;  %v2446_v41 = vsub.f32 0.0, %v2442_v27 }
 0x158   : > { %v2152_v30 = vsel %vm1793_vm2, %v2103_v35, 0.0  ;;  %v2128_v36 = vsub.f32 1.0, %v2103_v35  ;;  %v2106_v54 = vadd.f32 1e-08, %v2103_v35  ;;  %v3409_v4 = vpop.eup %3408 }
 0x159   : > { %v2153_v38 = vadd.f32 %v2152_v30, %v2151_v32  ;;  %v3411_v8 = vpop.eup %3410  ;;  %v1617_v32 = vmul.f32 0.6931472, %v3409_v4 }
 0x15a   : > { %v2167_v39 = vsel %vm1793_vm2, %v2128_v36, 0.0  ;;  %3420 = vlog2.f32 %v2106_v54  ;;  %v3413_v11 = vpop.eup %3412  ;;  %v4558_v20 = vadd.f32 1.0, %v3411_v8 }
 0x15b   : > { %v2168_v40 = vadd.f32 %v2167_v39, %v2166_v37  ;;  %3422 = vlog2.f32 %v1901_v60  ;;  %v3415_v16 = vpop.eup %3414  ;;  %v1451_v25 = vmul.f32 0.6931472, %v3413_v11 }
 0x15c   : > { %3182 = vmatmul.msk.f32.gmra.mxu3 %vm1030_vm0, %v1294_v26  ;;  %v1900_v26 = vsub.f32 1.0, %v4525_v1  ;;  %v2130_v1 = vadd.f32 1e-08, %v2128_v36  ;;  %v3417_v18 = vpop.eup %3416  ;;  %v1878_v36 = vmul.f32 0.6931472, %v3407_v2  ;;  %vm2465_vm15 = vweird.f32 %v4558_v20 }
 0x15d   : > { %2169 = vadd.xlane.f32.xlu2 %v2168_v40  ;;  %v3419_v21 = vpop.eup %3418  ;;  %v1880_v30 = vmul.f32 0.6931472, %v3417_v18  ;;  %v2108_v46 = vmul.f32 0.6931472, %v3415_v16 }
 0x15e   : > { %v1965_v23 = vsel %vm1793_vm2, %v1900_v26, 0.0  ;;  %v1902_v3 = vadd.f32 1e-08, %v1900_v26  ;;  %3424 = vlog2.f32 %v2130_v1  ;;  %v1600_v26 = vmul.f32 0.6931472, %v3403_v56 }
 0x15f   : > { %v1966_v33 = vadd.f32 %v1965_v23, %v1964_v31  ;;  %2154 = vadd.xlane.f32.xlu1 %v2153_v38  ;;  %v2132_v50 = vmul.f32 0.6931472, %v3419_v21  ;;  %v4573_v56 = vmul.f32 1.442695, %v2446_v41 }
 0x160   : > { %3426 = vlog2.f32 %v1902_v3  ;;  %v3421_v29 = vpop.eup %3420 }
 0x161   : > { %1967 = vadd.xlane.f32.xlu0 %v1966_v33  ;;  %3428 = vpow2.f32 %v2450_v7  ;;  %v3423_v33 = vpop.eup %3422  ;;  %v2110_v45 = vmul.f32 0.6931472, %v3421_v29 }
 0x162   : > { %v1904_v15 = vmul.f32 0.6931472, %v3423_v33 }
 0x164   : > { %v3425_v37 = vpop.eup %3424 }
 0x165   : > { %v2134_v54 = vmul.f32 0.6931472, %v3425_v37 }
 0x166   : > { %v3427_v42 = vpop.eup %3426 }
 0x167   : > { %v3429_v47 = vpop.eup %3428  ;;  %v4571_v55 = vmul.f32 0.6931472, %v3427_v42 }
 0x18e   : > { %v1329_v43 = vpop.f32.mrf.mxu3 }
 0x18f   : > { %v1355_v51 = vmul.f32 0.05, %v1329_v43 }
 0x191   : > { %v1549_v63 = vsub.f32 %v1355_v51, %v1548_v52  ;;  %v1357_v9 = vsub.f32 %v1355_v51, %v1356_v62 }
 0x193   : > { %v1553_v12 = vmul.f32 %v1549_v63, %v1549_v63  ;;  %v1362_v22 = vmul.f32 %v1357_v9, %v1357_v9  ;;  %v4576_v63 = vadd.f32 1.0, %v3429_v47 }
 0x195   : > { %vm2480_vm7 = vweird.f32 %v4576_v63 }
 0x196   : > { %v1352_v57 = vpop.f32.mrf.mxu3 }
 0x197   : > { %v1358_v0 = vmul.f32 0.05, %v1352_v57 }
 0x199   : > { %v1361_v5 = vsub.f32 %v1358_v0, %v3154_v58  ;;  %v1552_v6 = vsub.f32 %v1358_v0, %v3156_v59 }
 0x19b   : > { %v1554_v13 = vmul.f32 %v1552_v6, %v1552_v6  ;;  %v1363_v17 = vmul.f32 %v1361_v5, %v1361_v5 }
 0x19d   : > { %v4556_v19 = vadd.f32 %v1554_v13, %v1553_v12  ;;  %v4562_v35 = vadd.f32 %v1363_v17, %v1362_v22  ;;  %v3175_v22 = vld [vmem:[%s4275_s4 + $0x20] sm:$0xff] }
 0x19f   : > { %v1408_v24 = vpop.f32.mrf.mxu3  ;;  %3430 = vrsqrt.f32 %v4556_v19  ;;  %vm1563_vm13 = vcmp.eq.f32.partialorder %v4556_v19, inf  ;;  %vm1565_vm14 = vcmp.eq.f32.partialorder %v4556_v19, 0.0  ;;  %vm1372_vm3 = vcmp.eq.f32.partialorder %v4562_v35, inf }
 0x1a0   : > { %v1465_v31 = vsel %vm1377_vm8, %v1408_v24, 0.0  ;;  %v1447_v23 = vsub.f32 1.0, %v1408_v24  ;;  %v1434_v28 = vmul.f32 %v1433_v14, %v1408_v24  ;;  %3432 = vrcp.f32 %v4558_v20 }
 0x1a1   : > { %v1829_v10 = vpop.f32.mrf.mxu0  ;;  %1466 = vadd.xlane.f32.xlu1 %v1465_v31  ;;  %v1601_v51 = vmul.f32 %v1600_v26, %v1408_v24  ;;  %3434 = vrsqrt.f32 %v4562_v35  ;;  %v1566_v26 = vand.u32 2147483648, %v4556_v19  ;;  %vm1374_vm5 = vcmp.eq.f32.partialorder %v4562_v35, 0.0 }
 0x1a2   : > { %v1489_v38 = vsel %vm1377_vm8, %v1447_v23, 0.0  ;;  %v1435_v39 = vsel %vm1377_vm8, %v1434_v28, 0.0  ;;  %v2245_v40 = vpop.f32.mrf.mxu1  ;;  %v1897_v43 = vsub.f32 1.0, %v1829_v10  ;;  %v1452_v48 = vmul.f32 %v1451_v25, %v1447_v23 }
 0x1a3   : > { %1490 = vadd.xlane.f32.xlu2 %v1489_v38  ;;  %1436 = vadd.xlane.f32.xlu0 %v1435_v39  ;;  %v1923_v49 = vsel %vm1793_vm2, %v1829_v10, 0.0  ;;  %v1881_v52 = vmul.f32 %v1878_v36, %v1829_v10  ;;  %v2111_v62 = vmul.f32 %v2108_v46, %v1829_v10  ;;  %v2298_v5 = vmul.f32 0.05, %v2245_v40  ;;  %v2302_v10 = vld [vmem:[%s4275_s4] sm:$0xff] }
 0x1a4   : > { %v1951_v61 = vsel %vm1793_vm2, %v1897_v43, 0.0  ;;  %v1453_v2 = vsel %vm1377_vm8, %v1452_v48, 0.0  ;;  %v2135_v4 = vmul.f32 %v2132_v50, %v1897_v43  ;;  %v1602_v6 = vsel %vm1377_vm8, %v1601_v51, 0.0  ;;  %v2014_v46 = vld [vmem:[%s4273_s11] sm:$0xff] }
 0x1a5   : > { %v3431_v57 = vpop.eup %3430  ;;  %v1883_v7 = vsel %vm1793_vm2, %v1881_v52, 0.0  ;;  %v1907_v8 = vmul.f32 %v1904_v15, %v1897_v43  ;;  %v1618_v13 = vmul.f32 %v1617_v32, %v1447_v23  ;;  %v2113_v18 = vsel %vm1793_vm2, %v2111_v62, 0.0  ;;  %v2303_v62 = vld [vmem:[%s4275_s4 + $0x8] sm:$0xff] }
 0x1a6   : > { %v2286_v59 = vpop.f32.mrf.mxu2  ;;  %v4578_v0 = vpop.eup %3432  ;;  %v1557_v3 = vmul.f32 %v3431_v57, %v4556_v19  ;;  %v2137_v27 = vsel %vm1793_vm2, %v2135_v4, 0.0  ;;  %v2306_v29 = vsub.f32 %v2298_v5, %v2302_v10  ;;  %v2471_v50 = vand.u32 2147483648, %v4558_v20 }
 0x1a7   : > { %v1715_v58 = vpop.f32.mrf.mxu3  ;;  %v3435_v16 = vpop.eup %3434  ;;  %v2310_v17 = vmul.f32 0.05, %v2286_v59  ;;  %v2461_v21 = vmul.f32 %v4578_v0, %v4558_v20  ;;  %v4596_v23 = vsel %vm1793_vm2, %v1907_v8, 0.0  ;;  %v1619_v32 = vsel %vm1377_vm8, %v1618_v13, 0.0  ;;  %v3165_v13 = vld [vmem:[%s4273_s11 + $0x10] sm:$0xff] }
 0x1a8   : > { %v1558_v14 = vmul.f32 %v3431_v57, %v1557_v3  ;;  %v1366_v28 = vmul.f32 %v3435_v16, %v4562_v35  ;;  %v1750_v37 = vmul.f32 0.05, %v1715_v58  ;;  %vm2466_vm1 = vweird.f32 %v4578_v0 }
 0x1a9   : > { %v1832_v44 = vpop.f32.mrf.mxu0  ;;  %1454 = vadd.xlane.f32.xlu1 %v1453_v2  ;;  %v2462_v36 = vsub.f32 1.0, %v2461_v21  ;;  %v2319_v38 = vsub.f32 %v2310_v17, %v3175_v22  ;;  %v2323_v47 = vmul.f32 %v2306_v29, %v2306_v29  ;;  %v2469_v52 = vand.u32 2147483647, %v4558_v20  ;;  %vm4616_vm4 = vmor %vm2465_vm15, %vm2466_vm1 }
 0x1aa   : > { %v1924_v34 = vsel %vm1793_vm2, %v1832_v44, 0.0  ;;  %v1882_v53 = vmul.f32 %v1880_v30, %v1832_v44  ;;  %v1898_v1 = vsub.f32 1.0, %v1832_v44  ;;  %v2112_v9 = vmul.f32 %v2110_v45, %v1832_v44  ;;  %v2248_v11 = vpop.f32.mrf.mxu1  ;;  %v1752_v45 = vld [vmem:[%s4267_s17] sm:$0xff] }
 0x1ab   : > { %v1925_v60 = vadd.f32 %v1924_v34, %v1923_v49  ;;  %1603 = vadd.xlane.f32.xlu2 %v1602_v6  ;;  %v1559_v25 = vmul.f32 0.5, %v1558_v14  ;;  %v1367_v42 = vmul.f32 %v3435_v16, %v1366_v28  ;;  %v2463_v49 = vmul.f32 %v4578_v0, %v2462_v36  ;;  %v3176_v6 = vld [vmem:[%s4275_s4 + $0x28] sm:$0xff]  ;;  %v2304_v14 = vld [vmem:[%s4275_s4 + $0x10] sm:$0xff] }
 0x1ac   : > { %v1884_v12 = vsel %vm1793_vm2, %v1882_v53, 0.0  ;;  %v1952_v24 = vsel %vm1793_vm2, %v1898_v1, 0.0  ;;  %v2114_v30 = vsel %vm1793_vm2, %v2112_v9, 0.0  ;;  %v2136_v44 = vmul.f32 %v2134_v54, %v1898_v1 }
 0x1ad   : > { %1926 = vadd.xlane.f32.xlu0 %v1925_v60  ;;  %v1885_v31 = vadd.f32 %v1884_v12, %v1883_v7  ;;  %v1560_v33 = vsub.f32 1.5, %v1559_v25  ;;  %v1953_v41 = vadd.f32 %v1952_v24, %v1951_v61  ;;  %v1368_v48 = vmul.f32 0.5, %v1367_v42  ;;  %v3161_v12 = vld [vmem:[%s4267_s17 + $0x10] sm:$0xff] }
 0x1ae   : > { %v2289_v40 = vpop.f32.mrf.mxu2  ;;  %v2115_v51 = vadd.f32 %v2114_v30, %v2113_v18  ;;  %v1908_v34 = vmul.f32 %v4571_v55, %v1898_v1  ;;  %v2327_v53 = vmul.f32 %v2319_v38, %v2319_v38  ;;  %v2299_v54 = vmul.f32 0.05, %v2248_v11  ;;  %v3177_v42 = vld [vmem:[%s4275_s4 + $0x30] sm:$0xff] }
 0x1af   : > { %v1718_v39 = vpop.f32.mrf.mxu3  ;;  %v1561_v43 = vmul.f32 %v3431_v57, %v1560_v33  ;;  %v1369_v58 = vsub.f32 1.5, %v1368_v48  ;;  %v2464_v59 = vadd.f32 %v4578_v0, %v2463_v49  ;;  %v1754_v55 = vsub.f32 %v1750_v37, %v1752_v45  ;;  %v2443_v45 = vld [vmem:[%s4299_s5 + $0x18] sm:$0xff] }
 0x1b0   : > { %v2016_v61 = vsub.f32 %v1750_v37, %v2014_v46  ;;  %v2138_v2 = vsel %vm1793_vm2, %v2136_v44, 0.0  ;;  %v2311_v3 = vmul.f32 0.05, %v2289_v40  ;;  %v2472_v5 = vor.u32 1.1754944e-38, %v2471_v50 }
 0x1b1   : > { %1886 = vadd.xlane.f32.xlu1 %v1885_v31  ;;  %v1562_v15 = vmul.f32 %v1561_v43, %v4556_v19  ;;  %v1370_v4 = vmul.f32 %v3435_v16, %v1369_v58  ;;  %v2468_v8 = vsel %vm4616_vm4, %v4578_v0, %v2464_v59  ;;  %vm4632_vm6 = vcmp.eq.f32.partialorder %v2469_v52, 8.507059e+37  ;;  %v3162_v58 = vld [vmem:[%s4267_s17 + $0x18] sm:$0xff] }
 0x1b2   : > { %v2251_v57 = vpop.f32.mrf.mxu1  ;;  %3436 = vrcp.f32 %v4576_v63  ;;  %v4637_v10 = vadd.f32 %v2327_v53, %v2323_v47  ;;  %v2139_v16 = vadd.f32 %v2138_v2, %v2137_v27  ;;  %v1910_v17 = vsel %vm1793_vm2, %v1908_v34, 0.0  ;;  %v3166_v34 = vld [vmem:[%s4273_s11 + $0x18] sm:$0xff] }
 0x1b3   : > { %1954 = vadd.xlane.f32.xlu2 %v1953_v41  ;;  %v1564_v1 = vsel %vm1563_vm13, %v4556_v19, %v1562_v15  ;;  %v2300_v7 = vmul.f32 0.05, %v2251_v57  ;;  %v2307_v19 = vsub.f32 %v2299_v54, %v2303_v62  ;;  %v4643_v18 = vmul.f32 0.05, %v1718_v39 }
 0x1b4   : > { %v1567_v20 = vsel %vm1565_vm14, %v1566_v26, %v1564_v1  ;;  %v1371_v24 = vmul.f32 %v1370_v4, %v4562_v35  ;;  %v1763_v25 = vmul.f32 %v1754_v55, %v1754_v55  ;;  %v2015_v26 = vld [vmem:[%s4273_s11 + $0x8] sm:$0xff]  ;;  %v2320_v29 = vsub.f32 %v2311_v3, %v3176_v6 }
 0x1b5   : > { %1620 = vadd.xlane.f32.xlu0 %v1619_v32  ;;  %v1568_v22 = vsel %vm1377_vm8, %v1567_v20, 0.0  ;;  %v1375_v31 = vand.u32 2147483648, %v4562_v35  ;;  %v4651_v27 = vsel %vm4632_vm6, %v2472_v5, %v2468_v8  ;;  %v2023_v28 = vmul.f32 %v2016_v61, %v2016_v61  ;;  %v1753_v1 = vld [vmem:[%s4267_s17 + $0x8] sm:$0xff] }
 0x1b6   : > { %v2292_v21 = vpop.f32.mrf.mxu2  ;;  %v2308_v30 = vsub.f32 %v2300_v7, %v2304_v14  ;;  %3438 = vrsqrt.f32 %v4637_v10  ;;  %v2324_v36 = vmul.f32 %v2307_v19, %v2307_v19  ;;  %v1911_v38 = vadd.f32 %v1910_v17, %v4596_v23  ;;  %v2305_v14 = vld [vmem:[%s4275_s4 + $0x18] sm:$0xff] }
 0x1b7   : > { %v1744_v11 = vpop.f32.mrf.mxu3  ;;  %v2312_v37 = vmul.f32 0.05, %v2292_v21  ;;  %v2017_v40 = vsub.f32 %v4643_v18, %v2015_v26  ;;  %v1373_v43 = vsel %vm1372_vm3, %v4562_v35, %v1371_v24  ;;  %v2558_v44 = vsub.f32 1.0, %v4651_v27 }
 0x1b8   : > { %v1756_v0 = vmul.f32 0.05, %v1744_v11  ;;  %v4655_v39 = vpop.eup %3436  ;;  %v2328_v46 = vmul.f32 %v2320_v29, %v2320_v29  ;;  %3440 = vpow2.f32 %v4573_v56  ;;  %v2325_v49 = vmul.f32 %v2308_v30, %v2308_v30 }
 0x1b9   : > { %1569 = vadd.xlane.f32.xlu1 %v1568_v22  ;;  %v2476_v23 = vmul.f32 %v4655_v39, %v4576_v63  ;;  %v2520_v50 = vadd.f32 1e-08, %v4651_v27  ;;  %v2321_v15 = vsub.f32 %v2312_v37, %v3177_v42  ;;  %v1376_v52 = vsel %vm1374_vm5, %v1375_v31, %v1373_v43 }
 0x1ba   : > { %v1761_v32 = vsub.f32 %v1756_v0, %v3161_v12  ;;  %v2021_v33 = vsub.f32 %v1756_v0, %v3165_v13  ;;  %v2447_v54 = vsub.f32 0.0, %v2443_v45  ;;  %v2562_v56 = vadd.f32 1e-08, %v2558_v44  ;;  %v2254_v61 = vpop.f32.mrf.mxu1 }
 0x1bb   : > { %2116 = vadd.xlane.f32.xlu2 %v2115_v51  ;;  %v2477_v53 = vsub.f32 1.0, %v2476_v23  ;;  %vm2481_vm9 = vweird.f32 %v4655_v39  ;;  %v2486_v59 = vand.u32 2147483648, %v4576_v63  ;;  %v1378_v20 = vsel %vm1377_vm8, %v1376_v52, 0.0 }
 0x1bc   : > { %v2025_v41 = vmul.f32 %v2021_v33, %v2021_v33  ;;  %v1765_v47 = vmul.f32 %v1761_v32, %v1761_v32  ;;  %v4679_v60 = vpop.eup %3438  ;;  %v2454_v35 = vmul.f32 1.442695, %v2447_v54  ;;  %v2484_v4 = vand.u32 2147483647, %v4576_v63  ;;  %vm4693_vm10 = vmor %vm2480_vm7, %vm2481_vm9  ;;  %v3178_v63 = vld [vmem:[%s4275_s4 + $0x38] sm:$0xff] }
 0x1bd   : > { %2140 = vadd.xlane.f32.xlu0 %v2139_v16  ;;  %v2478_v62 = vmul.f32 %v4655_v39, %v2477_v53  ;;  %v2329_v6 = vmul.f32 %v2321_v15, %v2321_v15  ;;  %v2301_v11 = vmul.f32 0.05, %v2254_v61  ;;  %v1755_v13 = vsub.f32 %v4643_v18, %v1753_v1 }
 0x1be   : > { %v4667_v48 = vadd.f32 %v2025_v41, %v2023_v28  ;;  %v4681_v55 = vadd.f32 %v1765_v47, %v1763_v25  ;;  %v2295_v3 = vpop.f32.mrf.mxu2  ;;  %v3441_v5 = vpop.eup %3440  ;;  %v2487_v17 = vor.u32 1.1754944e-38, %v2486_v59  ;;  %v2024_v0 = vmul.f32 %v2017_v40, %v2017_v40 }
 0x1bf   : > { %v1747_v51 = vpop.f32.mrf.mxu3  ;;  %v2479_v8 = vadd.f32 %v4655_v39, %v2478_v62  ;;  %v4697_v12 = vadd.f32 1.0, %v3441_v5  ;;  %v2313_v16 = vmul.f32 0.05, %v2295_v3  ;;  %v4702_v21 = vadd.f32 %v2328_v46, %v2324_v36 }
 0x1c0   : > { %v1757_v57 = vmul.f32 0.05, %v1747_v51  ;;  %3442 = vrsqrt.f32 %v4667_v48  ;;  %vm2485_vm8 = vcmp.eq.f32.partialorder %v2484_v4, 8.507059e+37  ;;  %v4708_v25 = vadd.f32 %v2329_v6, %v2325_v49 }
 0x1c1   : > { %3444 = vlog2.f32 %v2520_v50  ;;  %v2483_v22 = vsel %vm4693_vm10, %v4655_v39, %v2479_v8  ;;  %v2309_v28 = vsub.f32 %v2301_v11, %v2305_v14  ;;  %v1764_v33 = vmul.f32 %v1755_v13, %v1755_v13 }
 0x1c2   : > { %v2022_v2 = vsub.f32 %v1757_v57, %v3166_v34  ;;  %v1762_v7 = vsub.f32 %v1757_v57, %v3162_v58  ;;  %3446 = vpow2.f32 %v2454_v35  ;;  %v2322_v30 = vsub.f32 %v2313_v16, %v3178_v63 }
 0x1c3   : > { %1912 = vadd.xlane.f32.xlu2 %v1911_v38  ;;  %3448 = vlog2.f32 %v2562_v56  ;;  %v4715_v36 = vsel %vm2485_vm8, %v2487_v17, %v2483_v22  ;;  %v2326_v43 = vmul.f32 %v2309_v28, %v2309_v28  ;;  %vm2495_vm11 = vweird.f32 %v4697_v12 }
 0x1c4   : > { %v2026_v19 = vmul.f32 %v2022_v2, %v2022_v2  ;;  %3450 = vrsqrt.f32 %v4681_v55  ;;  %v1766_v26 = vmul.f32 %v1762_v7, %v1762_v7  ;;  %v2559_v46 = vsub.f32 1.0, %v4715_v36 }
 0x1c5   : > { %1379 = vadd.xlane.f32.xlu0 %v1378_v20  ;;  %3452 = vrcp.f32 %v4697_v12  ;;  %v2330_v23 = vmul.f32 %v2322_v30, %v2322_v30  ;;  %v2521_v50 = vadd.f32 1e-08, %v4715_v36  ;;  %v2501_v53 = vand.u32 2147483648, %v4697_v12 }
 0x1c6   : > { %v3443_v24 = vpop.eup %3442  ;;  %v4713_v31 = vadd.f32 %v2026_v19, %v2024_v0  ;;  %3454 = vrsqrt.f32 %v4702_v21  ;;  %v4722_v40 = vadd.f32 %v1766_v26, %v1764_v33  ;;  %v4739_v54 = vmul.f32 %v4679_v60, %v4637_v10 }
 0x1c7   : > { %v4710_v29 = vpop.f32.mrf.mxu3  ;;  %v3445_v18 = vpop.eup %3444  ;;  %v2030_v37 = vmul.f32 %v3443_v24, %v4667_v48  ;;  %3456 = vrsqrt.f32 %v4708_v25  ;;  %v2563_v58 = vadd.f32 1e-08, %v2559_v46  ;;  %v2499_v59 = vand.u32 2147483647, %v4697_v12 }
 0x1c8   : > { %v3447_v32 = vpop.eup %3446  ;;  %v2525_v45 = vmul.f32 0.6931472, %v3445_v18  ;;  %3458 = vrsqrt.f32 %v4713_v31  ;;  %v2554_v15 = vsub.f32 1.0, %v4710_v29  ;;  %vm2036_vm13 = vcmp.eq.f32.partialorder %v4667_v48, inf }
 0x1c9   : > { %v3449_v38 = vpop.eup %3448  ;;  %v4724_v41 = vadd.f32 1.0, %v3447_v32  ;;  %v2031_v42 = vmul.f32 %v3443_v24, %v2030_v37  ;;  %v2039_v1 = vand.u32 2147483648, %v4667_v48  ;;  %v4753_v20 = vadd.f32 %v2330_v23, %v2326_v43 }
 0x1ca   : > { %v4719_v39 = vpop.eup %3450  ;;  %v2567_v49 = vmul.f32 0.6931472, %v3449_v38  ;;  %v4756_v4 = vmul.f32 %v2525_v45, %v4710_v29  ;;  %v2502_v9 = vor.u32 1.1754944e-38, %v2501_v53  ;;  %vm2038_vm15 = vcmp.eq.f32.partialorder %v4667_v48, 0.0 }
 0x1cb   : > { %v3453_v47 = vpop.eup %3452  ;;  %3460 = vrcp.f32 %v4724_v41  ;;  %v2032_v34 = vmul.f32 0.5, %v2031_v42  ;;  %v1770_v52 = vmul.f32 %v4719_v39, %v4681_v55  ;;  %vm2500_vm1 = vcmp.eq.f32.partialorder %v2499_v59, 8.507059e+37 }
 0x1cc   : > { %v2491_v51 = vmul.f32 %v3453_v47, %v4697_v12  ;;  %3462 = vrsqrt.f32 %v4722_v40  ;;  %v4741_v57 = vpop.eup %3454  ;;  %vm2496_vm12 = vweird.f32 %v3453_v47  ;;  %v4760_v5 = vmul.f32 %v2567_v49, %v2554_v15 }
 0x1cd   : > { %v4747_v61 = vpop.eup %3456  ;;  %3464 = vlog2.f32 %v2521_v50  ;;  %v2033_v35 = vsub.f32 1.5, %v2032_v34  ;;  %v1771_v2 = vmul.f32 %v4719_v39, %v1770_v52  ;;  %vm4765_vm14 = vmor %vm2495_vm11, %vm2496_vm12  ;;  %v2516_v0 = vand.u32 2147483648, %v4724_v41 }
 0x1ce   : > { %v2492_v56 = vsub.f32 1.0, %v2491_v51  ;;  %v3459_v3 = vpop.eup %3458  ;;  %3466 = vlog2.f32 %v2563_v58  ;;  %vm2510_vm3 = vweird.f32 %v4724_v41  ;;  %vm2048_vm4 = vcmp.eq.f32.partialorder %v4713_v31, inf }
 0x1cf   : > { %v4749_v62 = vpop.f32.mrf.mxu3  ;;  %v2034_v19 = vmul.f32 %v3443_v24, %v2033_v35  ;;  %v2042_v11 = vmul.f32 %v3459_v3, %v4713_v31  ;;  %v1772_v13 = vmul.f32 0.5, %v1771_v2  ;;  %v2514_v33 = vand.u32 2147483647, %v4724_v41 }
 0x1d0   : > { %v2493_v6 = vmul.f32 %v3453_v47, %v2492_v56  ;;  %vm2050_vm6 = vcmp.eq.f32.partialorder %v4713_v31, 0.0  ;;  %vm1776_vm7 = vcmp.eq.f32.partialorder %v4681_v55, inf  ;;  %v2051_v42 = vand.u32 2147483648, %v4713_v31 }
 0x1d1   : > { %v3461_v7 = vpop.eup %3460  ;;  %v2035_v12 = vmul.f32 %v2034_v19, %v4667_v48  ;;  %v2043_v63 = vmul.f32 %v3459_v3, %v2042_v11  ;;  %v1773_v22 = vsub.f32 1.5, %v1772_v13  ;;  %vm1778_vm10 = vcmp.eq.f32.partialorder %v4681_v55, 0.0 }
 0x1d2   : > { %v2494_v14 = vadd.f32 %v3453_v47, %v2493_v6  ;;  %v2506_v16 = vmul.f32 %v3461_v7, %v4724_v41  ;;  %v3463_v17 = vpop.eup %3462  ;;  %vm2511_vm5 = vweird.f32 %v3461_v7  ;;  %vm2515_vm8 = vcmp.eq.f32.partialorder %v2514_v33, 8.507059e+37 }
 0x1d3   : > { %v1782_v18 = vmul.f32 %v3463_v17, %v4722_v40  ;;  %v3465_v28 = vpop.eup %3464  ;;  %v2044_v30 = vmul.f32 0.5, %v2043_v63  ;;  %v1774_v43 = vmul.f32 %v4719_v39, %v1773_v22  ;;  %v2037_v23 = vsel %vm2036_vm13, %v4667_v48, %v2035_v12  ;;  %vm4796_vm9 = vmor %vm2510_vm3, %vm2511_vm5 }
 0x1d4   : > { %v2498_v24 = vsel %vm4765_vm14, %v3453_v47, %v2494_v14  ;;  %v2507_v26 = vsub.f32 1.0, %v2506_v16  ;;  %v2517_v47 = vor.u32 1.1754944e-38, %v2516_v0  ;;  %v3467_v50 = vpop.eup %3466  ;;  %v2527_v51 = vmul.f32 0.6931472, %v3465_v28 }
 0x1d5   : > { %v4779_v32 = vsel %vm2500_vm1, %v2502_v9, %v2498_v24  ;;  %v2045_v49 = vsub.f32 1.5, %v2044_v30  ;;  %v1783_v39 = vmul.f32 %v3463_v17, %v1782_v18  ;;  %v1779_v59 = vand.u32 2147483648, %v4681_v55 }
 0x1d6   : > { %v2522_v37 = vadd.f32 1e-08, %v4779_v32  ;;  %v2560_v38 = vsub.f32 1.0, %v4779_v32  ;;  %v2508_v45 = vmul.f32 %v3461_v7, %v2507_v26  ;;  %v2040_v35 = vsel %vm2038_vm15, %v2039_v1, %v2037_v23 }
 0x1d7   : > { %v4801_v53 = vpop.f32.mrf.mxu3  ;;  %v2046_v56 = vmul.f32 %v3459_v3, %v2045_v49  ;;  %v1775_v41 = vmul.f32 %v1774_v43, %v4681_v55  ;;  %v1784_v2 = vmul.f32 0.5, %v1783_v39  ;;  %v2555_v6 = vsub.f32 1.0, %v4749_v62 }
 0x1d8   : > { %3468 = vlog2.f32 %v2522_v37  ;;  %v2564_v34 = vadd.f32 1e-08, %v2560_v38  ;;  %v2509_v58 = vadd.f32 %v3461_v7, %v2508_v45  ;;  %vm1788_vm11 = vcmp.eq.f32.partialorder %v4722_v40, inf }
 0x1d9   : > { %v2047_v9 = vmul.f32 %v2046_v56, %v4713_v31  ;;  %v2533_v3 = vmul.f32 %v2527_v51, %v4749_v62  ;;  %v2569_v19 = vmul.f32 0.6931472, %v3467_v50  ;;  %v1785_v13 = vsub.f32 1.5, %v1784_v2 }
 0x1da   : > { %3470 = vlog2.f32 %v2564_v34  ;;  %v2513_v8 = vsel %vm4796_vm9, %v3461_v7, %v2509_v58  ;;  %v2053_v7 = vsel %vm1793_vm2, %v2040_v35, 0.0  ;;  %v1777_v12 = vsel %vm1776_vm7, %v4681_v55, %v1775_v41 }
 0x1db   : > { %v4813_v11 = vsel %vm2515_vm8, %v2517_v47, %v2513_v8  ;;  %v2049_v14 = vsel %vm2048_vm4, %v4713_v31, %v2047_v9  ;;  %v1786_v63 = vmul.f32 %v3463_v17, %v1785_v13  ;;  %v2337_v22 = vmul.f32 %v4679_v60, %v4739_v54 }
 0x1dc   : > { %v2523_v48 = vadd.f32 1e-08, %v4813_v11  ;;  %v2561_v1 = vsub.f32 1.0, %v4813_v11  ;;  %v2052_v0 = vsel %vm2050_vm6, %v2051_v42, %v2049_v14  ;;  %v2575_v31 = vmul.f32 %v2569_v19, %v2555_v6 }
 0x1dd   : > { %v2054_v18 = vsel %vm1793_vm2, %v2052_v0, 0.0  ;;  %v2556_v33 = vsub.f32 1.0, %v4801_v53  ;;  %v1787_v37 = vmul.f32 %v1786_v63, %v4722_v40  ;;  %v1780_v54 = vsel %vm1778_vm10, %v1779_v59, %v1777_v12 }
 0x1de   : > { %v3469_v16 = vpop.eup %3468  ;;  %3472 = vlog2.f32 %v2523_v48  ;;  %v2565_v26 = vadd.f32 1e-08, %v2561_v1  ;;  %v2055_v30 = vadd.f32 %v2054_v18, %v2053_v7  ;;  %v1791_v42 = vand.u32 2147483648, %v4722_v40 }
 0x1df   : > { %v2529_v24 = vmul.f32 0.6931472, %v3469_v16  ;;  %v1789_v45 = vsel %vm1788_vm11, %v4722_v40, %v1787_v37  ;;  %vm1790_vm12 = vcmp.eq.f32.partialorder %v4722_v40, 0.0  ;;  %v2348_v47 = vmul.f32 %v4741_v57, %v4702_v21  ;;  %v4848_v49 = vpop.f32.mrf.mxu3 }
 0x1e0   : > { %v3471_v28 = vpop.eup %3470  ;;  %3474 = vlog2.f32 %v2565_v26  ;;  %2056 = vadd.xlane.f32.xlu1 %v2055_v30  ;;  %v2536_v23 = vsel %vm1030_vm0, %v4756_v4, 0.0  ;;  %v2537_v55 = vsel %vm1030_vm0, %v2533_v3, 0.0  ;;  %v1792_v50 = vsel %vm1790_vm12, %v1791_v42, %v1789_v45 }
 0x1e1   : > { %v2571_v17 = vmul.f32 0.6931472, %v3471_v28  ;;  %v2534_v43 = vmul.f32 %v2529_v24, %v4801_v53  ;;  %v2338_v51 = vmul.f32 0.5, %v2337_v22  ;;  %v1794_v52 = vsel %vm1793_vm2, %v1780_v54, 0.0 }
 0x1e2   : > { %v1795_v39 = vsel %vm1793_vm2, %v1792_v50, 0.0  ;;  %v2349_v40 = vmul.f32 %v4741_v57, %v2348_v47  ;;  %v2578_v4 = vsel %vm1030_vm0, %v4760_v5, 0.0  ;;  %v2579_v59 = vsel %vm1030_vm0, %v2575_v31, 0.0 }
 0x1e3   : > { %v2576_v34 = vmul.f32 %v2571_v17, %v2556_v33  ;;  %v1796_v56 = vadd.f32 %v1795_v39, %v1794_v52  ;;  %v2360_v35 = vmul.f32 %v4747_v61, %v4708_v25  ;;  %v2557_v2 = vsub.f32 1.0, %v4848_v49 }
 0x1e4   : > { %v3473_v58 = vpop.eup %3472  ;;  %v2539_v8 = vsel %vm1030_vm0, %v2534_v43, 0.0  ;;  %v2350_v9 = vmul.f32 0.5, %v2349_v40  ;;  %v2538_v19 = vadd.f32 %v2537_v55, %v2536_v23  ;;  %v2339_v13 = vsub.f32 1.5, %v2338_v51 }
 0x1e5   : > { %v2531_v41 = vmul.f32 0.6931472, %v3473_v58  ;;  %1797 = vadd.xlane.f32.xlu0 %v1796_v56  ;;  %v2361_v48 = vmul.f32 %v4747_v61, %v2360_v35  ;;  %v2581_v7 = vsel %vm1030_vm0, %v2576_v34, 0.0  ;;  %v2580_v0 = vadd.f32 %v2579_v59, %v2578_v4 }
 0x1e6   : > { %v3475_v3 = vpop.eup %3474  ;;  %v2351_v16 = vsub.f32 1.5, %v2350_v9  ;;  %v2540_v12 = vadd.f32 %v2539_v8, %v2538_v19  ;;  %3476 = vrsqrt.f32 %v4753_v20  ;;  %v2340_v31 = vmul.f32 %v4679_v60, %v2339_v13  ;;  %v4901_v8 = vpop.xlane.xlu1 %1632 }
 0x1e7   : > { %v2535_v14 = vmul.f32 %v2531_v41, %v4848_v49  ;;  %v2573_v5 = vmul.f32 0.6931472, %v3475_v3  ;;  %v2362_v63 = vmul.f32 0.5, %v2361_v48  ;;  %v2582_v18 = vadd.f32 %v2581_v7, %v2580_v0 }
 0x1e8   : > { %v2352_v26 = vmul.f32 %v4741_v57, %v2351_v16  ;;  %v2632_v17 = vsel %vm1030_vm0, %v2554_v15, 0.0  ;;  %v2613_v43 = vsel %vm1030_vm0, %v4651_v27, 0.0  ;;  %v2633_v57 = vsel %vm1030_vm0, %v2555_v6, 0.0 }
 0x1e9   : > { %v2577_v22 = vmul.f32 %v2573_v5, %v2557_v2  ;;  %v2541_v24 = vsel %vm1030_vm0, %v2535_v14, 0.0  ;;  %v2363_v30 = vsub.f32 1.5, %v2362_v63  ;;  %v2614_v45 = vsel %vm1030_vm0, %v4715_v36, 0.0 }
 0x1ea   : > { %v2542_v28 = vadd.f32 %v2541_v24, %v2540_v12  ;;  %v2353_v60 = vmul.f32 %v2352_v26, %v4702_v21  ;;  %v2616_v47 = vsel %vm1030_vm0, %v4779_v32, 0.0  ;;  %v2341_v23 = vmul.f32 %v2340_v31, %v4637_v10 }
 0x1eb   : > { %v2583_v37 = vsel %vm1030_vm0, %v2577_v22, 0.0  ;;  %v2364_v42 = vmul.f32 %v4747_v61, %v2363_v30  ;;  %v2615_v61 = vadd.f32 %v2614_v45, %v2613_v43  ;;  %v2635_v6 = vsel %vm1030_vm0, %v2556_v33, 0.0  ;;  %v1502_v30 = vpop.xlane.xlu0 %1501 }
 0x1ec   : > { %v2584_v54 = vadd.f32 %v2583_v37, %v2582_v18  ;;  %2543 = vadd.xlane.f32.xlu1 %v2542_v28  ;;  %v3477_v15 = vpop.eup %3476  ;;  %v2618_v51 = vsel %vm1030_vm0, %v4813_v11, 0.0  ;;  %vm2354_vm2 = vcmp.eq.f32.partialorder %v4702_v21, inf  ;;  %v2634_v34 = vadd.f32 %v2633_v57, %v2632_v17 }
 0x1ed   : > { %v2365_v55 = vmul.f32 %v2364_v42, %v4708_v25  ;;  %v2372_v50 = vmul.f32 %v3477_v15, %v4753_v20  ;;  %v2617_v52 = vadd.f32 %v2616_v47, %v2615_v61  ;;  %vm2342_vm13 = vcmp.eq.f32.partialorder %v4637_v10, inf }
 0x1ee   : > { %2585 = vadd.xlane.f32.xlu2 %v2584_v54  ;;  %v2355_v39 = vsel %vm2354_vm2, %v4702_v21, %v2353_v60  ;;  %v2637_v58 = vsel %vm1030_vm0, %v2557_v2, 0.0  ;;  %v2357_v56 = vand.u32 2147483648, %v4702_v21  ;;  %vm2366_vm14 = vcmp.eq.f32.partialorder %v4708_v25, inf  ;;  %v4916_v26 = vpop.xlane.xlu1 %1939 }
 0x1ef   : > { %v2373_v40 = vmul.f32 %v3477_v15, %v2372_v50  ;;  %v2636_v4 = vadd.f32 %v2635_v6, %v2634_v34  ;;  %v2619_v33 = vadd.f32 %v2618_v51, %v2617_v52  ;;  %v2343_v59 = vsel %vm2342_vm13, %v4637_v10, %v2341_v23 }
 0x1f0   : > { %vm2356_vm15 = vcmp.eq.f32.partialorder %v4702_v21, 0.0  ;;  %v2367_v35 = vsel %vm2366_vm14, %v4708_v25, %v2365_v55  ;;  %v2345_v9 = vand.u32 2147483648, %v4637_v10  ;;  %v2369_v2 = vand.u32 2147483648, %v4708_v25 }
 0x1f1   : > { %v2374_v41 = vmul.f32 0.5, %v2373_v40  ;;  %v2358_v3 = vsel %vm2356_vm15, %v2357_v56, %v2355_v39  ;;  %v2638_v19 = vadd.f32 %v2637_v58, %v2636_v4  ;;  %vm2344_vm1 = vcmp.eq.f32.partialorder %v4637_v10, 0.0 }
 0x1f2   : > { %vm2368_vm3 = vcmp.eq.f32.partialorder %v4708_v25, 0.0  ;;  %v2346_v48 = vsel %vm2344_vm1, %v2345_v9, %v2343_v59  ;;  %v2384_v5 = vsel %vm1030_vm0, %v2358_v3, 0.0  ;;  %vm2378_vm4 = vcmp.eq.f32.partialorder %v4753_v20, inf }
 0x1f3   : > { %v2375_v13 = vsub.f32 1.5, %v2374_v41  ;;  %v2370_v14 = vsel %vm2368_vm3, %v2369_v2, %v2367_v35  ;;  %v2383_v16 = vsel %vm1030_vm0, %v2346_v48, 0.0  ;;  %v2381_v12 = vand.u32 2147483648, %v4753_v20  ;;  %v4940_v36 = vpop.xlane.xlu0 %1967 }
 0x1f4   : > { %2620 = vadd.xlane.f32.xlu1 %v2619_v33  ;;  %v2386_v0 = vsel %vm1030_vm0, %v2370_v14, 0.0  ;;  %v2385_v10 = vadd.f32 %v2384_v5, %v2383_v16  ;;  %vm2380_vm5 = vcmp.eq.f32.partialorder %v4753_v20, 0.0  ;;  %v2596_v28 = vsel %vm1030_vm0, %v4710_v29, 0.0 }
 0x1f5   : > { %v2376_v21 = vmul.f32 %v3477_v15, %v2375_v13  ;;  %v2597_v31 = vsel %vm1030_vm0, %v4749_v62, 0.0  ;;  %v2599_v37 = vsel %vm1030_vm0, %v4801_v53, 0.0  ;;  %v2650_v17 = vsel %vm1030_vm0, %v2559_v46, 0.0  ;;  %v1478_v53 = vpop.xlane.xlu2 %1477 }
 0x1f6   : > { %2639 = vadd.xlane.f32.xlu2 %v2638_v19  ;;  %v2387_v22 = vadd.f32 %v2386_v0, %v2385_v10  ;;  %v2598_v54 = vadd.f32 %v2597_v31, %v2596_v28  ;;  %v2601_v29 = vsel %vm1030_vm0, %v4848_v49, 0.0  ;;  %v2652_v62 = vsel %vm1030_vm0, %v2560_v38, 0.0  ;;  %v4935_v60 = vpop.xlane.xlu1 %2154 }
 0x1f7   : > { %v2377_v7 = vmul.f32 %v2376_v21, %v4753_v20  ;;  %v1479_v51 = vrot.slane %v1478_v53, 4  ;;  %v1503_v58 = vrot.slane %v1502_v30, 4  ;;  %v1634_v19 = vrot.slane %v4901_v8, 4 }
 0x1f8   : > { %v2600_v42 = vadd.f32 %v2599_v37, %v2598_v54 }
 0x1f9   : > { %v2379_v25 = vsel %vm2378_vm4, %v4753_v20, %v2377_v7  ;;  %v2649_v20 = vsel %vm1030_vm0, %v2558_v44, 0.0  ;;  %v2654_v44 = vsel %vm1030_vm0, %v2561_v1, 0.0  ;;  %v1480_v59 = vadd.f32 %v1479_v51, %v1478_v53 }
 0x1fa   : > { %v2382_v63 = vsel %vm2380_vm5, %v2381_v12, %v2379_v25  ;;  %v2651_v43 = vadd.f32 %v2650_v17, %v2649_v20  ;;  %v2602_v57 = vadd.f32 %v2601_v29, %v2600_v42  ;;  %v1504_v13 = vadd.f32 %v1503_v58, %v1502_v30 }
 0x1fb   : > { %v2388_v24 = vsel %vm1030_vm0, %v2382_v63, 0.0  ;;  %v1481_v16 = vrot.slane %v1480_v59, 2 }
 0x1fc   : > { %v2389_v18 = vadd.f32 %v2388_v24, %v2387_v22  ;;  %v2653_v27 = vadd.f32 %v2652_v62, %v2651_v43  ;;  %v1635_v22 = vadd.f32 %v1634_v19, %v4901_v8  ;;  %v1505_v24 = vrot.slane %v1504_v13, 2 }
 0x1fd   : > { %v1646_v49 = vpop.xlane.xlu2 %1645  ;;  %v1482_v54 = vadd.f32 %v1481_v16, %v1480_v59 }
 0x1fe   : > { %2390 = vadd.xlane.f32.xlu0 %v2389_v18  ;;  %v2655_v46 = vadd.f32 %v2654_v44, %v2653_v27  ;;  %v1647_v21 = vrot.slane %v1646_v49, 4  ;;  %v1506_v44 = vadd.f32 %v1505_v24, %v1504_v13 }
 0x200   : > { %v1648_v31 = vadd.f32 %v1647_v21, %v1646_v49 }
 0x205   : > { %v4942_v15 = vpop.xlane.xlu2 %2169 }
 0x206   : > { %2603 = vadd.xlane.f32.xlu0 %v2602_v57  ;;  %v1636_v57 = vrot.slane %v1635_v22, 2 }
 0x208   : > { %v1637_v51 = vadd.f32 %v1636_v57, %v1635_v22 }
 0x20a   : > { %v1638_v59 = vrot.slane %v1637_v51, 1 }
 0x20c   : > { %v1639_v19 = vadd.f32 %v1638_v59, %v1637_v51 }
 0x20e   : > { %2656 = vadd.xlane.f32.xlu0 %v2655_v46  ;;  %v1649_v46 = vrot.slane %v1648_v31, 2 }
 0x214   : > { %v1467_v45 = vpop.xlane.xlu1 %1466 }
 0x215   : > { %v1468_v6 = vrot.slane %v1467_v45, 4 }
 0x216   : > { %v1437_v47 = vpop.xlane.xlu0 %1436  ;;  %v1491_v55 = vpop.xlane.xlu2 %1490 }
 0x217   : > { %v1438_v50 = vrot.slane %v1437_v47, 4  ;;  %v1492_v52 = vrot.slane %v1491_v55, 4  ;;  %v1469_v4 = vadd.f32 %v1468_v6, %v1467_v45  ;;  %v1507_v6 = vrot.slane %v1506_v44, 1 }
 0x219   : > { %v1439_v39 = vadd.f32 %v1438_v50, %v1437_v47  ;;  %v1493_v41 = vadd.f32 %v1492_v52, %v1491_v55  ;;  %v1470_v5 = vrot.slane %v1469_v4, 2 }
 0x21b   : > { %v1440_v9 = vrot.slane %v1439_v39, 2  ;;  %v1494_v10 = vrot.slane %v1493_v41, 2  ;;  %v1471_v20 = vadd.f32 %v1470_v5, %v1469_v4 }
 0x21c   : > { %v1455_v32 = vpop.xlane.xlu1 %1454 }
 0x21d   : > { %v1456_v1 = vrot.slane %v1455_v32, 4  ;;  %v1441_v63 = vadd.f32 %v1440_v9, %v1439_v39  ;;  %v1495_v62 = vadd.f32 %v1494_v10, %v1493_v41  ;;  %v1472_v8 = vrot.slane %v1471_v20, 1 }
 0x21e   : > { %v1604_v40 = vpop.xlane.xlu2 %1603  ;;  %v1650_v39 = vadd.f32 %v1649_v46, %v1648_v31 }
 0x21f   : > { %v1457_v56 = vadd.f32 %v1456_v1, %v1455_v32  ;;  %v1605_v35 = vrot.slane %v1604_v40, 4  ;;  %v1442_v43 = vrot.slane %v1441_v63, 1  ;;  %v1483_v32 = vrot.slane %v1482_v54, 1 }
 0x220   : > { %v4944_v38 = vpop.xlane.xlu0 %1926  ;;  %v1496_v55 = vrot.slane %v1495_v62, 1  ;;  %v1651_v9 = vrot.slane %v1650_v39, 1 }
 0x221   : > { %v1458_v48 = vrot.slane %v1457_v56, 2  ;;  %v1606_v0 = vadd.f32 %v1605_v35, %v1604_v40  ;;  %v1484_v40 = vadd.f32 %v1483_v32, %v1482_v54  ;;  %v1928_v5 = vrot.slane %v4944_v38, 4 }
 0x222   : > { %v1652_v13 = vadd.f32 %v1651_v9, %v1650_v39 }
 0x223   : > { %v1459_v28 = vadd.f32 %v1458_v48, %v1457_v56  ;;  %v1607_v30 = vrot.slane %v1606_v0, 2  ;;  %v1497_v56 = vadd.f32 %v1496_v55, %v1495_v62  ;;  %v1929_v22 = vadd.f32 %v1928_v5, %v4944_v38 }
 0x224   : > { %v4946_v61 = vpop.xlane.xlu1 %1886 }
 0x225   : > { %v1460_v27 = vrot.slane %v1459_v28, 1  ;;  %v1608_v49 = vadd.f32 %v1607_v30, %v1606_v0  ;;  %v1930_v62 = vrot.slane %v1929_v22, 2 }
 0x226   : > { %v4952_v29 = vpop.xlane.xlu2 %1954 }
 0x227   : > { %v1461_v1 = vadd.f32 %v1460_v27, %v1459_v28  ;;  %v1609_v58 = vrot.slane %v1608_v49, 1  ;;  %v1931_v32 = vadd.f32 %v1930_v62, %v1929_v22 }
 0x228   : > { %v1621_v23 = vpop.xlane.xlu0 %1620 }
 0x229   : > { %v1622_v3 = vrot.slane %v1621_v23, 4 }
 0x22b   : > { %v1623_v25 = vadd.f32 %v1622_v3, %v1621_v23  ;;  %v1443_v23 = vadd.f32 %v1442_v43, %v1441_v63  ;;  %v1610_v3 = vadd.f32 %v1609_v58, %v1608_v49  ;;  %v2171_v43 = vrot.slane %v4942_v15, 4 }
 0x22c   : > { %v1570_v34 = vpop.xlane.xlu1 %1569  ;;  %v1932_v58 = vrot.slane %v1931_v32, 1 }
 0x22d   : > { %v1571_v33 = vrot.slane %v1570_v34, 4  ;;  %v1624_v42 = vrot.slane %v1623_v25, 2 }
 0x22e   : > { %v2117_v35 = vpop.xlane.xlu2 %2116 }
 0x22f   : > { %v1572_v7 = vadd.f32 %v1571_v33, %v1570_v34  ;;  %v1625_v50 = vadd.f32 %v1624_v42, %v1623_v25  ;;  %v1473_v34 = vadd.f32 %v1472_v8, %v1471_v20  ;;  %v1508_v33 = vadd.f32 %v1507_v6, %v1506_v44 }
 0x230   : > { %v4948_v11 = vpop.xlane.xlu0 %2140  ;;  %v1969_v25 = vrot.slane %v4940_v36, 4 }
 0x231   : > { %v1573_v37 = vrot.slane %v1572_v7, 2  ;;  %v1626_v4 = vrot.slane %v1625_v50, 1 }
 0x233   : > { %v1574_v45 = vadd.f32 %v1573_v37, %v1572_v7  ;;  %v1941_v7 = vrot.slane %v4916_v26, 4  ;;  %v2142_v37 = vrot.slane %v4948_v11, 4 }
 0x235   : > { %v1575_v52 = vrot.slane %v1574_v45, 1  ;;  %v1942_v24 = vadd.f32 %v1941_v7, %v4916_v26  ;;  %v2143_v27 = vadd.f32 %v2142_v37, %v4948_v11 }
 0x236   : > { %v1913_v48 = vpop.xlane.xlu2 %1912 }
 0x237   : > { %v1576_v41 = vadd.f32 %v1575_v52, %v1574_v45  ;;  %v1914_v21 = vrot.slane %v1913_v48, 4  ;;  %v1943_v38 = vrot.slane %v1942_v24, 2 }
 0x238   : > { %v1380_v2 = vpop.xlane.xlu0 %1379 }
 0x239   : > { %v1381_v14 = vrot.slane %v1380_v2, 4  ;;  %v1915_v63 = vadd.f32 %v1914_v21, %v1913_v48  ;;  %v1944_v55 = vadd.f32 %v1943_v38, %v1942_v24 }
 0x23b   : > { %v1382_v12 = vadd.f32 %v1381_v14, %v1380_v2  ;;  %v1627_v2 = vadd.f32 %v1626_v4, %v1625_v50  ;;  %v1888_v14 = vrot.slane %v4946_v61, 4  ;;  %v1916_v54 = vrot.slane %v1915_v63, 2 }
 0x23c   : > { %v2144_v50 = vrot.slane %v2143_v27, 2  ;;  %v1945_v4 = vrot.slane %v1944_v55, 1 }
 0x23d   : > { %v1383_v18 = vrot.slane %v1382_v12, 2  ;;  %v1889_v0 = vadd.f32 %v1888_v14, %v4946_v61  ;;  %v2156_v61 = vrot.slane %v4935_v60, 4 }
 0x23e   : > { %v2145_v9 = vadd.f32 %v2144_v50, %v2143_v27  ;;  %v1946_v14 = vadd.f32 %v1945_v4, %v1944_v55 }
 0x23f   : > { %v1384_v17 = vadd.f32 %v1383_v18, %v1382_v12  ;;  %v1956_v12 = vrot.slane %v4952_v29, 4  ;;  %v2118_v18 = vrot.slane %v2117_v35, 4  ;;  %v1890_v28 = vrot.slane %v1889_v0, 2 }
 0x240   : > { %v2157_v46 = vadd.f32 %v2156_v61, %v4935_v60 }
 0x241   : > { %v1385_v53 = vrot.slane %v1384_v17, 1  ;;  %v1957_v31 = vadd.f32 %v1956_v12, %v4952_v29  ;;  %v2119_v57 = vadd.f32 %v2118_v18, %v2117_v35  ;;  %v1891_v44 = vadd.f32 %v1890_v28, %v1889_v0 }
 0x242   : > { %v2146_v0 = vrot.slane %v2145_v9, 1 }
 0x243   : > { %v1386_v47 = vadd.f32 %v1385_v53, %v1384_v17  ;;  %v1970_v17 = vadd.f32 %v1969_v25, %v4940_v36  ;;  %v1958_v53 = vrot.slane %v1957_v31, 2  ;;  %v2172_v36 = vadd.f32 %v2171_v43, %v4942_v15 }
 0x244   : > { %v2120_v49 = vrot.slane %v2119_v57, 2  ;;  %v2147_v18 = vadd.f32 %v2146_v0, %v2145_v9 }
 0x245   : > { %3195 = vpush %v1386_v47  ;;  %v1971_v8 = vrot.slane %v1970_v17, 2  ;;  %v1917_v47 = vadd.f32 %v1916_v54, %v1915_v63  ;;  %v1959_v6 = vadd.f32 %v1958_v53, %v1957_v31 }
 0x246   : > { %3197 = vpush %v1443_v23 }
 0x247   : > { %3199 = vpush %v1461_v1  ;;  %v1892_v1 = vrot.slane %v1891_v44, 1  ;;  %v1918_v11 = vrot.slane %v1917_v47, 1  ;;  %v1972_v39 = vadd.f32 %v1971_v8, %v1970_v17  ;;  %v1960_v35 = vrot.slane %v1959_v6, 1 }
 0x248   : > { %3201 = vpush %v1473_v34  ;;  %v2158_v34 = vrot.slane %v2157_v46, 2 }
 0x249   : > { %3203 = vpush %v1484_v40  ;;  %v2173_v40 = vrot.slane %v2172_v36, 2  ;;  %v1893_v15 = vadd.f32 %v1892_v1, %v1891_v44  ;;  %v1961_v7 = vadd.f32 %v1960_v35, %v1959_v6 }
 0x24a   : > { %3205 = vpush %v1497_v56 }
 0x24b   : > { %3207 = vpush %v1508_v33  ;;  %v2121_v33 = vadd.f32 %v2120_v49, %v2119_v57  ;;  %v2174_v48 = vadd.f32 %v2173_v40, %v2172_v36 }
 0x24c   : > { %3209 = vpush %v1576_v41 }
 0x24d   : > { %3211 = vpush %v1610_v3  ;;  %v1919_v3 = vadd.f32 %v1918_v11, %v1917_v47  ;;  %v2122_v21 = vrot.slane %v2121_v33, 1  ;;  %v2175_v63 = vrot.slane %v2174_v48, 1 }
 0x24e   : > { %3213 = vpush %v1627_v2  ;;  %v1973_v2 = vrot.slane %v1972_v39, 1 }
 0x24f   : > { %3215 = vpush %v1639_v19  ;;  %v2159_v19 = vadd.f32 %v2158_v34, %v2157_v46  ;;  %v2123_v22 = vadd.f32 %v2122_v21, %v2121_v33 }
 0x250   : > { %3217 = vpush %v1652_v13  ;;  %v1933_v13 = vadd.f32 %v1932_v58, %v1931_v32 }
 0x251   : > { %v2160_v25 = vrot.slane %v2159_v19, 1 }
 0x253   : > { %v2057_v16 = vpop.xlane.xlu1 %2056  ;;  %v2161_v31 = vadd.f32 %v2160_v25, %v2159_v19 }
 0x254   : > { %v2058_v10 = vrot.slane %v2057_v16, 4 }
 0x256   : > { %v2059_v20 = vadd.f32 %v2058_v10, %v2057_v16  ;;  %v1974_v10 = vadd.f32 %v1973_v2, %v1972_v39 }
 0x258   : > { %v1798_v30 = vpop.xlane.xlu0 %1797  ;;  %v2060_v29 = vrot.slane %v2059_v20, 2 }
 0x259   : > { %v1799_v42 = vrot.slane %v1798_v30, 4 }
 0x25a   : > { %v2061_v51 = vadd.f32 %v2060_v29, %v2059_v20  ;;  %v2176_v20 = vadd.f32 %v2175_v63, %v2174_v48  ;;  %v1307_v63 = vlaneseq }
 0x25b   : > { %v1800_v26 = vadd.f32 %v1799_v42, %v1798_v30 }
 0x25c   : > { %v2062_v41 = vrot.slane %v2061_v51, 1 }
 0x25d   : > { %v1801_v45 = vrot.slane %v1800_v26, 2 }
 0x25e   : > { %v2063_v16 = vadd.f32 %v2062_v41, %v2061_v51 }
 0x25f   : > { %v1802_v23 = vadd.f32 %v1801_v45, %v1800_v26  ;;  %v2544_v60 = vpop.xlane.xlu1 %2543 }
 0x260   : > { %v2545_v5 = vrot.slane %v2544_v60, 4 }
 0x261   : > { %v1803_v52 = vrot.slane %v1802_v23, 1  ;;  %v2586_v59 = vpop.xlane.xlu2 %2585 }
 0x262   : > { %v2587_v12 = vrot.slane %v2586_v59, 4  ;;  %v2546_v24 = vadd.f32 %v2545_v5, %v2544_v60 }
 0x263   : > { %v1804_v56 = vadd.f32 %v1803_v52, %v1802_v23 }
 0x264   : > { %v2588_v28 = vadd.f32 %v2587_v12, %v2586_v59  ;;  %v2547_v61 = vrot.slane %v2546_v24, 2 }
 0x265   : > { %3219 = vpush %v1804_v56 }
 0x266   : > { %3221 = vpush %v1893_v15  ;;  %v2589_v54 = vrot.slane %v2588_v28, 2  ;;  %v2548_v57 = vadd.f32 %v2547_v61, %v2546_v24 }
 0x267   : > { %3223 = vpush %v1919_v3  ;;  %v2621_v37 = vpop.xlane.xlu1 %2620 }
 0x268   : > { %3225 = vpush %v1933_v13  ;;  %v2622_v17 = vrot.slane %v2621_v37, 4  ;;  %v2590_v27 = vadd.f32 %v2589_v54, %v2588_v28  ;;  %v2549_v46 = vrot.slane %v2548_v57, 1 }
 0x269   : > { %3227 = vpush %v1946_v14  ;;  %v2640_v30 = vpop.xlane.xlu2 %2639 }
 0x26a   : > { %3229 = vpush %v1961_v7  ;;  %v2641_v42 = vrot.slane %v2640_v30, 4  ;;  %v2623_v38 = vadd.f32 %v2622_v17, %v2621_v37  ;;  %v2591_v47 = vrot.slane %v2590_v27, 1  ;;  %v2550_v55 = vadd.f32 %v2549_v46, %v2548_v57 }
 0x26b   : > { %3231 = vpush %v1974_v10 }
 0x26c   : > { %3233 = vpush %v2063_v16  ;;  %v2642_v53 = vadd.f32 %v2641_v42, %v2640_v30  ;;  %v2624_v44 = vrot.slane %v2623_v38, 2  ;;  %v2592_v51 = vadd.f32 %v2591_v47, %v2590_v27 }
 0x26d   : > { %3235 = vpush %v2123_v22 }
 0x26e   : > { %3237 = vpush %v2147_v18  ;;  %v2643_v8 = vrot.slane %v2642_v53, 2  ;;  %v2625_v23 = vadd.f32 %v2624_v44, %v2623_v38  ;;  %v5015_v18 = vand.u32 127, %v1307_v63 }
 0x26f   : > { %3239 = vpush %v2161_v31 }
 0x270   : > { %3241 = vpush %v2176_v20  ;;  %v2644_v50 = vadd.f32 %v2643_v8, %v2642_v53  ;;  %v2626_v52 = vrot.slane %v2625_v23, 1  ;;  %vm1544_vm0 = vcmp.eq.s32.totalorder %v5015_v18, 0  ;;  %vm1688_vm6 = vcmp.eq.s32.totalorder %v5015_v18, 1 }
 0x271   : > { %v2391_v43 = vpop.xlane.xlu0 %2390  ;;  %vm2010_vm7 = vcmp.eq.s32.totalorder %v5015_v18, 2  ;;  %vm2212_vm12 = vcmp.eq.s32.totalorder %v5015_v18, 3  ;;  %vm2699_vm2 = vcmp.eq.s32.totalorder %v5015_v18, 4 }
 0x272   : > { %v2392_v62 = vrot.slane %v2391_v43, 4  ;;  %v2645_v39 = vrot.slane %v2644_v50, 1  ;;  %v2627_v56 = vadd.f32 %v2626_v52, %v2625_v23 }
 0x274   : > { %v2393_v26 = vadd.f32 %v2392_v62, %v2391_v43  ;;  %v2646_v59 = vadd.f32 %v2645_v39, %v2644_v50 }
 0x276   : > { %v2394_v29 = vrot.slane %v2393_v26, 2  ;;  %s4970_s17 = spop %3195 }
 0x277   : > { %s4972_s11 = spop %3197  ;;  %v1545_v20 = vstv %s4970_s17 }
 0x278   : > { %v2395_v45 = vadd.f32 %v2394_v29, %v2393_v26  ;;  %s4974_s4 = spop %3199  ;;  %v1546_v57 = vsel %vm1544_vm0, %v1545_v20, 0.0  ;;  %v1445_v27 = vstv %s4972_s11 }
 0x279   : > { %v2604_v36 = vpop.xlane.xlu0 %2603  ;;  %s4976_s5 = spop %3201  ;;  %v1463_v8 = vstv %s4974_s4 }
 0x27a   : > { %v2605_v32 = vrot.slane %v2604_v36, 4  ;;  %v2396_v49 = vrot.slane %v2395_v45, 1  ;;  %s3204_s19 = spop %3203  ;;  %v1475_v9 = vstv %s4976_s5 }
 0x27b   : > { %s3206_s12 = spop %3205  ;;  %v1486_v3 = vstv %s3204_s19 }
 0x27c   : > { %v2606_v1 = vadd.f32 %v2605_v32, %v2604_v36  ;;  %v2397_v6 = vadd.f32 %v2396_v49, %v2395_v45  ;;  %s3208_s26 = spop %3207  ;;  %v1499_v2 = vstv %s3206_s12  ;;  %v1487_v48 = vadd.f32 %v1486_v3, %v1475_v9 }
 0x27d   : > { %s4978_s23 = spop %3209  ;;  %v1510_v19 = vstv %s3208_s26 }
 0x27e   : > { %v2607_v34 = vrot.slane %v2606_v1, 2  ;;  %3243 = vpush %v2397_v6  ;;  %s4980_s15 = spop %3211  ;;  %v1511_v14 = vadd.f32 %v1510_v19, %v1499_v2  ;;  %v4985_v5 = vadd.f32 1e-08, %v1487_v48  ;;  %v1689_v26 = vstv %s4978_s23  ;;  %s5449_s23 = sld [smem:[#allocation55_spill]] }
 0x27f   : > { %3245 = vpush %v2550_v55  ;;  %s4983_s30 = spop %3213  ;;  %v1690_v49 = vsel %vm1688_vm6, %v1689_v26, %v1546_v57 }
 0x280   : > { %3247 = vpush %v2592_v51  ;;  %v2608_v11 = vadd.f32 %v2607_v34, %v2606_v1  ;;  %s3216_s21 = spop %3215  ;;  %v4987_v16 = vadd.f32 1e-08, %v1511_v14  ;;  %3478 = vrcp.f32 %v4985_v5  ;;  %v1522_v45 = vand.u32 2147483647, %v4985_v5 }
 0x281   : > { %v2657_v40 = vpop.xlane.xlu0 %2656  ;;  %s3218_s0 = spop %3217  ;;  %v1641_v21 = vstv %s3216_s21  ;;  %vm1518_vm9 = vweird.f32 %v4985_v5  ;;  %v1524_v55 = vand.u32 2147483648, %v4985_v5 }
 0x282   : > { %v2658_v58 = vrot.slane %v2657_v40, 4  ;;  %v2609_v60 = vrot.slane %v2608_v11, 1  ;;  %v1654_v7 = vstv %s3218_s0  ;;  %v1642_v0 = vadd.f32 %v1641_v21, %v1475_v9  ;;  %s993_s0 = scalar_lea.vmem [#allocation22], %s4255_s16 }
 0x283   : > { %v1655_v12 = vadd.f32 %v1654_v7, %v1499_v2  ;;  %3480 = vrcp.f32 %v4987_v16  ;;  %vm5062_vm8 = vcmp.eq.f32.partialorder %v1522_v45, 8.507059e+37  ;;  %v1539_v39 = vand.u32 2147483648, %v4987_v16 }
 0x284   : > { %v2659_v4 = vadd.f32 %v2658_v58, %v2657_v40  ;;  %v2610_v33 = vadd.f32 %v2609_v60, %v2608_v11  ;;  %v4995_v10 = vadd.f32 1e-08, %v1642_v0  ;;  %s2718_s21 = scalar_lea.hbm %s5449_s23, %s5426_s28  ;;  %vm1533_vm14 = vweird.f32 %v4987_v16  ;;  %s3818_s17 = scalar_lea.hbm %s5449_s23, 2 }
 0x285   : > { %v5001_v25 = vadd.f32 1e-08, %v1655_v12  ;;  %v1537_v9 = vand.u32 2147483647, %v4987_v16  ;;  %v1540_v3 = vor.u32 1.1754944e-38, %v1539_v39 }
 0x286   : > { %v2660_v15 = vrot.slane %v2659_v4, 2  ;;  %3249 = vpush %v2610_v33  ;;  %3482 = vrcp.f32 %v4995_v10  ;;  %v5008_v22 = vpop.eup %3478  ;;  %vm1662_vm5 = vweird.f32 %v4995_v10  ;;  %v1666_v63 = vand.u32 2147483647, %v4995_v10 }
 0x287   : > { %3251 = vpush %v2627_v56  ;;  %3484 = vrcp.f32 %v5001_v25  ;;  %v1514_v28 = vmul.f32 %v5008_v22, %v4985_v5  ;;  %vm1519_vm10 = vweird.f32 %v5008_v22  ;;  %vm5125_vm4 = vcmp.eq.f32.partialorder %v1537_v9, 8.507059e+37 }
 0x288   : > { %v2661_v35 = vadd.f32 %v2660_v15, %v2659_v4  ;;  %3253 = vpush %v2646_v59  ;;  %vm5092_vm13 = vmor %vm1518_vm9, %vm1519_vm10 }
 0x289   : > { %v5012_v24 = vpop.eup %3480  ;;  %v1515_v43 = vsub.f32 1.0, %v1514_v28 }
 0x28a   : > { %v2662_v41 = vrot.slane %v2661_v35, 1  ;;  %v1529_v31 = vmul.f32 %v5012_v24, %v4987_v16  ;;  %vm1534_vm11 = vweird.f32 %v5012_v24 }
 0x28b   : > { %v1516_v36 = vmul.f32 %v5008_v22, %v1515_v43  ;;  %vm5103_vm15 = vmor %vm1533_vm14, %vm1534_vm11 }
 0x28c   : > { %v2663_v13 = vadd.f32 %v2662_v41, %v2661_v35  ;;  %v5025_v37 = vpop.eup %3482  ;;  %v1530_v62 = vsub.f32 1.0, %v1529_v31  ;;  %v1525_v41 = vor.u32 1.1754944e-38, %v1524_v55 }
 0x28d   : > { %v5031_v17 = vpop.eup %3484  ;;  %v1658_v38 = vmul.f32 %v5025_v37, %v4995_v10  ;;  %v1517_v40 = vadd.f32 %v5008_v22, %v1516_v36  ;;  %vm1663_vm1 = vweird.f32 %v5025_v37 }
 0x28e   : > { %3255 = vpush %v2663_v13  ;;  %v1673_v29 = vmul.f32 %v5031_v17, %v5001_v25  ;;  %v1531_v32 = vmul.f32 %v5012_v24, %v1530_v62  ;;  %v1668_v13 = vand.u32 2147483648, %v4995_v10  ;;  %vm1678_vm3 = vweird.f32 %v5031_v17 }
 0x28f   : > { %v1659_v23 = vsub.f32 1.0, %v1658_v38  ;;  %v1521_v2 = vsel %vm5092_vm13, %v5008_v22, %v1517_v40  ;;  %v1683_v22 = vand.u32 2147483648, %v5001_v25 }
 0x290   : > { %v1674_v6 = vsub.f32 1.0, %v1673_v29  ;;  %v1532_v58 = vadd.f32 %v5012_v24, %v1531_v32 }
 0x291   : > { %v1660_v60 = vmul.f32 %v5025_v37, %v1659_v23 }
 0x292   : > { %v1675_v59 = vmul.f32 %v5031_v17, %v1674_v6  ;;  %v1536_v21 = vsel %vm5103_vm15, %v5012_v24, %v1532_v58 }
 0x293   : > { %v1661_v7 = vadd.f32 %v5025_v37, %v1660_v60 }
 0x294   : > { %v1676_v16 = vadd.f32 %v5031_v17, %v1675_v59 }
 0x296   : > { %s4989_s7 = spop %3219 }
 0x297   : > { %s4992_s13 = spop %3221  ;;  %v2011_v51 = vstv %s4989_s7  ;;  %s5079_s7 = sshll.u32 %s993_s0, 4  ;;  %s2721_s7 = int_to_ptr.vmem [resolvable:$true] %s5079_s7 }
 0x298   : > { %s4997_s9 = spop %3223  ;;  %v2012_v56 = vsel %vm2010_vm7, %v2011_v51, %v1690_v49 }
 0x299   : > { %s4999_s20 = spop %3225 }
 0x29a   : > { %s5003_s10 = spop %3227  ;;  %v1935_v30 = vstv %s4999_s20  ;;  %s5081_s20 = sshll.u32 %s2718_s21, 4  ;;  %s2723_s20 = int_to_ptr.hbm [resolvable:$true] %s5081_s20 }
 0x29b   : > { %s5005_s22 = spop %3229  ;;  %v1948_v61 = vstv %s5003_s10 }
 0x29c   : > { %s3232_s8 = spop %3231  ;;  %v1963_v54 = vstv %s5005_s22  ;;  %v1949_v53 = vadd.f32 %v1948_v61, %v1935_v30  ;;  %s2706_s22 = scalar_lea.sflag [#allocation7], %s4255_s16 }
 0x29d   : > { %s5010_s18 = spop %3233  ;;  %v1976_v42 = vstv %s3232_s8  ;;  %s3812_s8 = sshra.s32 %s2723_s20, 4  ;;  %s3813_s8 = int_to_ptr.hbm [resolvable:$true] %s3812_s8 }
 0x29e   : > { %s5017_s3 = spop %3235  ;;  %v1977_v44 = vadd.f32 %v1976_v42, %v1963_v54  ;;  %v5052_v50 = vadd.f32 1e-08, %v1949_v53  ;;  %v2213_v4 = vstv %s5010_s18  ;;  %s3814_s18 = scalar_lea.hbm %s3813_s8, 1 }
 0x29f   : > { %s5023_s5 = spop %3237  ;;  %v2214_v48 = vsel %vm2212_vm12, %v2213_v4, %v2012_v56  ;;  %p3815_p8 = scmp.ne.s32.totalorder %s3813_s8, %s3814_s18 }
 0x2a0   : > { %s3240_s19 = spop %3239  ;;  %v5055_v34 = vadd.f32 1e-08, %v1977_v44  ;;  %3486 = vrcp.f32 %v5052_v50  ;;  %p3819_p11 = scmp.lt.s32.totalorder %s3813_s8, %s5449_s23 }
 0x2a1   : > { %s3242_s12 = spop %3241  ;;  %v2163_v46 = vstv %s3240_s19  ;;  %p3816_p9 = pnand %p3815_p8, %p4176_p0 }
 0x2a2   : > { %v2178_v47 = vstv %s3242_s12  ;;  %v2164_v1 = vadd.f32 %v2163_v46, %v1935_v30  ;;  %3488 = vrcp.f32 %v5055_v34  ;;  %p3820_p12 = scmp.lt.s32.totalorder %s3818_s17, %s3814_s18 }
 0x2a3   : > { %v2179_v52 = vadd.f32 %v2178_v47, %v1963_v54  ;;  %p3817_p10 = pneg %p3816_p9 }
 0x2a4   : > { %v5076_v33 = vadd.f32 1e-08, %v2164_v1  ;;  %p3821_p13 = por %p3820_p12, %p3819_p11 }
 0x2a5   : > { %v5085_v15 = vadd.f32 1e-08, %v2179_v52 }
 0x2a6   : > { %3490 = vrcp.f32 %v5076_v33  ;;  %v5123_v0 = vpop.eup %3486  ;;  %p3822_p3 = pnand %p3821_p13, %p3817_p10 }
 0x2a7   : > { %3492 = vrcp.f32 %v5085_v15 }
 0x2af   : > { %s3244_s10 = spop %3243 }
 0x2b0   : > { %v2700_v14 = vstv %s3244_s10 }
 0x2b1   : > { %v2701_v5 = vsel %vm2699_vm2, %v2700_v14, %v2214_v48 }
 0x2b2   : > { %2703 = vst [vmem:[%s993_s0] sm:$0x1] %v2701_v5 }
 0x2b3   : > { %3825 = shalt.err (!%p3822_p3)
}
 0x2b4   : > { %3279 = dma.vmem_to_hbm [thread:$0]  (%p4176_p0), %s2721_s7, 16, %s2723_s20, %s2706_s22   ;;  %v5149_v24 = vpop.eup %3488  ;;  %v1526_v28 = vsel %vm5062_vm8, %v1525_v41, %v1521_v2  ;;  %v1541_v31 = vsel %vm5125_vm4, %v1540_v3, %v1536_v21  ;;  %vm5159_vm9 = vmor %vm1662_vm5, %vm1663_vm1  ;;  %vm1677_vm10 = vweird.f32 %v5001_v25  ;;  %v1681_v30 = vand.u32 2147483647, %v5001_v25 }
 0x2b5   : > { %s5165_s0 = spop %3245  ;;  %v1446_v61 = vsub.f32 0.0, %v1445_v27  ;;  %v1464_v54 = vsub.f32 0.0, %v1463_v8  ;;  %v1612_v42 = vstv %s4980_s15  ;;  %v1629_v43 = vstv %s4983_s30  ;;  %vm5175_vm8 = vmor %vm1677_vm10, %vm1678_vm3  ;;  %v5189_v26 = vpop.eup %3490  ;;  %s999_s20 = scalar_lea.vmem [#allocation23], %s4255_s16 }
 0x2b6   : > { %v1665_v62 = vsel %vm5159_vm9, %v5025_v37, %v1661_v7  ;;  %v1669_v38 = vor.u32 1.1754944e-38, %v1668_v13  ;;  %v1680_v25 = vsel %vm5175_vm8, %v5031_v17, %v1676_v16  ;;  %v1980_v57 = vmul.f32 %v5123_v0, %v5052_v50  ;;  %s5187_s11 = spop %3247  ;;  %v5193_v37 = vpop.eup %3492  ;;  %s2710_s22 = scalar_lea.sflag [#allocation24], %s4255_s16 }
 0x2b7   : > { %v1527_v53 = vmul.f32 %v1526_v28, %v1446_v61  ;;  %v1542_v27 = vmul.f32 %v1541_v31, %v1464_v54  ;;  %v1684_v29 = vor.u32 1.1754944e-38, %v1683_v22  ;;  %v1995_v44 = vmul.f32 %v5149_v24, %v5055_v34  ;;  %s3250_s4 = spop %3249 }
 0x2b8   : > { %vm1667_vm11 = vcmp.eq.f32.partialorder %v1666_v63, 8.507059e+37  ;;  %vm1682_vm13 = vcmp.eq.f32.partialorder %v1681_v30, 8.507059e+37  ;;  %v2612_v46 = vstv %s3250_s4  ;;  %s3252_s15 = spop %3251  ;;  %v1613_v17 = vsub.f32 0.0, %v1612_v42 }
 0x2b9   : > { %v1670_v8 = vsel %vm1667_vm11, %v1669_v38, %v1665_v62  ;;  %v1685_v45 = vsel %vm1682_vm13, %v1684_v29, %v1680_v25  ;;  %v2629_v47 = vstv %s3252_s15  ;;  %v1630_v36 = vsub.f32 0.0, %v1629_v43  ;;  %s3254_s30 = spop %3253 }
 0x2ba   : > { %v1981_v32 = vsub.f32 1.0, %v1980_v57  ;;  %v2182_v49 = vmul.f32 %v5189_v26, %v5076_v33  ;;  %v2630_v23 = vadd.f32 %v2629_v47, %v2612_v46  ;;  %v1996_v55 = vsub.f32 1.0, %v1995_v44 }
 0x2bb   : > { %v2197_v1 = vmul.f32 %v5193_v37, %v5085_v15  ;;  %v1543_v6 = vadd.f32 %v1542_v27, %v1527_v53  ;;  %v1671_v51 = vmul.f32 %v1670_v8, %v1613_v17  ;;  %v1686_v52 = vmul.f32 %v1685_v45, %v1630_v36 }
 0x2bc   : > { %v5199_v11 = vadd.f32 1e-08, %v2630_v23  ;;  %v1895_v39 = vstv %s4992_s13  ;;  %v1921_v40 = vstv %s4997_s9  ;;  %v1982_v58 = vmul.f32 %v5123_v0, %v1981_v32 }
 0x2bd   : > { %v2183_v60 = vsub.f32 1.0, %v2182_v49  ;;  %v1997_v56 = vmul.f32 %v5149_v24, %v1996_v55  ;;  %v2198_v4 = vsub.f32 1.0, %v2197_v1  ;;  %v5208_v59 = vsel %vm1544_vm0, %v1543_v6, 0.0 }
 0x2be   : > { %3494 = vrcp.f32 %v5199_v11  ;;  %v1896_v35 = vsub.f32 0.0, %v1895_v39  ;;  %v2648_v41 = vstv %s3254_s30  ;;  %v5210_v3 = vadd.f32 %v1686_v52, %v1671_v51 }
 0x2bf   : > { %s3256_s7 = spop %3255  ;;  %v1922_v2 = vsub.f32 0.0, %v1921_v40  ;;  %vm1984_vm14 = vweird.f32 %v5052_v50  ;;  %v2125_v19 = vstv %s5017_s3  ;;  %v1983_v48 = vadd.f32 %v5123_v0, %v1982_v58  ;;  %s5470_s3 = sld [smem:[#allocation56_spill]] }
 0x2c0   : > { %v2665_v9 = vstv %s3256_s7  ;;  %vm1985_vm15 = vweird.f32 %v5123_v0  ;;  %v1988_v14 = vand.u32 2147483647, %v5052_v50  ;;  %v2184_v21 = vmul.f32 %v5189_v26, %v2183_v60 }
 0x2c1   : > { %v2666_v13 = vadd.f32 %v2665_v9, %v2648_v41  ;;  %v1998_v5 = vadd.f32 %v5149_v24, %v1997_v56  ;;  %vm2000_vm0 = vweird.f32 %v5149_v24  ;;  %v2199_v7 = vmul.f32 %v5193_v37, %v2198_v4  ;;  %vm5231_vm3 = vmor %vm1984_vm14, %vm1985_vm15 }
 0x2c2   : > { %v1990_v63 = vand.u32 2147483648, %v5052_v50  ;;  %vm1999_vm1 = vweird.f32 %v5055_v34  ;;  %v2003_v22 = vand.u32 2147483647, %v5055_v34  ;;  %v2005_v28 = vand.u32 2147483648, %v5055_v34 }
 0x2c3   : > { %v5221_v16 = vadd.f32 1e-08, %v2666_v13  ;;  %v2190_v20 = vand.u32 2147483647, %v5076_v33  ;;  %v2192_v30 = vand.u32 2147483648, %v5076_v33  ;;  %v1987_v54 = vsel %vm5231_vm3, %v5123_v0, %v1983_v48  ;;  %vm5243_vm4 = vmor %vm1999_vm1, %vm2000_vm0 }
 0x2c4   : > { %v5223_v12 = vpop.eup %3494  ;;  %v2185_v50 = vadd.f32 %v5189_v26, %v2184_v21  ;;  %vm2187_vm5 = vweird.f32 %v5189_v26  ;;  %v2205_v42 = vand.u32 2147483647, %v5085_v15  ;;  %v2002_v43 = vsel %vm5243_vm4, %v5149_v24, %v1998_v5 }
 0x2c5   : > { %v2669_v61 = vmul.f32 %v5223_v12, %v5199_v11  ;;  %3496 = vrcp.f32 %v5221_v16  ;;  %v2200_v10 = vadd.f32 %v5193_v37, %v2199_v7  ;;  %vm2202_vm9 = vweird.f32 %v5193_v37  ;;  %s3846_s17 = scalar_lea.hbm %s5470_s3, 2 }
 0x2c6   : > { %v1991_v62 = vor.u32 1.1754944e-38, %v1990_v63  ;;  %v2006_v38 = vor.u32 1.1754944e-38, %v2005_v28  ;;  %vm2186_vm10 = vweird.f32 %v5076_v33  ;;  %v2207_v25 = vand.u32 2147483648, %v5085_v15 }
 0x2c7   : > { %v2670_v0 = vsub.f32 1.0, %v2669_v61  ;;  %vm1989_vm8 = vcmp.eq.f32.partialorder %v1988_v14, 8.507059e+37  ;;  %vm2004_vm11 = vcmp.eq.f32.partialorder %v2003_v22, 8.507059e+37  ;;  %vm5257_vm13 = vmor %vm2186_vm10, %vm2187_vm5  ;;  %vm2201_vm14 = vweird.f32 %v5085_v15 }
 0x2c8   : > { %v1992_v53 = vsel %vm1989_vm8, %v1991_v62, %v1987_v54  ;;  %v2007_v27 = vsel %vm2004_vm11, %v2006_v38, %v2002_v43  ;;  %v2149_v29 = vstv %s5023_s5  ;;  %v2189_v44 = vsel %vm5257_vm13, %v5189_v26, %v2185_v50  ;;  %vm2203_vm15 = vmor %vm2201_vm14, %vm2202_vm9  ;;  %s2731_s5 = scalar_lea.hbm %s5470_s3, %s5426_s28  ;;  %s2733_s28 = sshll.u32 %s999_s20, 4  ;;  %s2734_s28 = int_to_ptr.vmem [resolvable:$true] %s2733_s28 }
 0x2c9   : > { %v2671_v24 = vmul.f32 %v5223_v12, %v2670_v0  ;;  %vm2191_vm0 = vcmp.eq.f32.partialorder %v2190_v20, 8.507059e+37  ;;  %v2193_v46 = vor.u32 1.1754944e-38, %v2192_v30  ;;  %v2204_v17 = vsel %vm2203_vm15, %v5193_v37, %v2200_v10  ;;  %s2735_s10 = sshll.u32 %s2731_s5, 4  ;;  %s2736_s10 = int_to_ptr.hbm [resolvable:$true] %s2735_s10 }
 0x2ca   : > { %vm2206_vm1 = vcmp.eq.f32.partialorder %v2205_v42, 8.507059e+37  ;;  %v2208_v15 = vor.u32 1.1754944e-38, %v2207_v25  ;;  %vm2674_vm3 = vweird.f32 %v5223_v12  ;;  %v1993_v47 = vmul.f32 %v1992_v53, %v1896_v35  ;;  %s3840_s8 = sshra.s32 %s2736_s10, 4  ;;  %s3841_s8 = int_to_ptr.hbm [resolvable:$true] %s3840_s8 }
 0x2cb   : > { %v3497_v33 = vpop.eup %3496  ;;  %v2672_v8 = vadd.f32 %v5223_v12, %v2671_v24  ;;  %v2008_v36 = vmul.f32 %v2007_v27, %v1922_v2  ;;  %v2194_v26 = vsel %vm2191_vm0, %v2193_v46, %v2189_v44  ;;  %v2679_v32 = vand.u32 2147483648, %v5199_v11  ;;  %s3842_s18 = scalar_lea.hbm %s3841_s8, 1  ;;  %p3847_p7 = scmp.lt.s32.totalorder %s3841_s8, %s5470_s3 }
 0x2cc   : > { %v2684_v45 = vmul.f32 %v3497_v33, %v5221_v16  ;;  %v2209_v49 = vsel %vm2206_vm1, %v2208_v15, %v2204_v17  ;;  %vm2673_vm4 = vweird.f32 %v5199_v11  ;;  %v2677_v37 = vand.u32 2147483647, %v5199_v11  ;;  %p3843_p5 = scmp.ne.s32.totalorder %s3841_s8, %s3842_s18  ;;  %p3848_p8 = scmp.lt.s32.totalorder %s3846_s17, %s3842_s18 }
 0x2cd   : > { %v2126_v55 = vsub.f32 0.0, %v2125_v19  ;;  %v2150_v1 = vsub.f32 0.0, %v2149_v29  ;;  %v2552_v6 = vstv %s5165_s0  ;;  %vm5277_vm5 = vmor %vm2673_vm4, %vm2674_vm3  ;;  %v2694_v52 = vand.u32 2147483648, %v5221_v16 }
 0x2ce   : > { %v2685_v23 = vsub.f32 1.0, %v2684_v45  ;;  %vm2689_vm9 = vweird.f32 %v3497_v33  ;;  %v2692_v40 = vand.u32 2147483647, %v5221_v16  ;;  %v2676_v58 = vsel %vm5277_vm5, %v5223_v12, %v2672_v8  ;;  %p3844_p1 = pnand %p3843_p5, %p4176_p0  ;;  %p3849_p9 = por %p3848_p8, %p3847_p7 }
 0x2cf   : > { %v2594_v11 = vstv %s5187_s11  ;;  %v2680_v60 = vor.u32 1.1754944e-38, %v2679_v32  ;;  %v2195_v56 = vmul.f32 %v2194_v26, %v2126_v55  ;;  %v2210_v4 = vmul.f32 %v2209_v49, %v2150_v1 }
 0x2d0   : > { %v2686_v39 = vmul.f32 %v3497_v33, %v2685_v23  ;;  %vm2678_vm10 = vcmp.eq.f32.partialorder %v2677_v37, 8.507059e+37  ;;  %vm2688_vm8 = vweird.f32 %v5221_v16  ;;  %v2009_v41 = vadd.f32 %v2008_v36, %v1993_v47  ;;  %p3845_p6 = pneg %p3844_p1 }
 0x2d1   : > { %vm2690_vm11 = vmor %vm2688_vm8, %vm2689_vm9  ;;  %v2695_v9 = vor.u32 1.1754944e-38, %v2694_v52  ;;  %v2681_v2 = vsel %vm2678_vm10, %v2680_v60, %v2676_v58  ;;  %v2553_v19 = vsub.f32 0.0, %v2552_v6  ;;  %v2595_v13 = vsub.f32 0.0, %v2594_v11 }
 0x2d2   : > { %v2687_v35 = vadd.f32 %v3497_v33, %v2686_v39  ;;  %vm2693_vm13 = vcmp.eq.f32.partialorder %v2692_v40, 8.507059e+37  ;;  %v1691_v14 = vsel %vm1688_vm6, %v5210_v3, %v5208_v59  ;;  %v2211_v21 = vadd.f32 %v2210_v4, %v2195_v56  ;;  %p3850_p10 = pnand %p3849_p9, %p3845_p6 }
 0x2d3   : > { %v2013_v7 = vsel %vm2010_vm7, %v2009_v41, %v1691_v14  ;;  %v2682_v16 = vmul.f32 %v2681_v2, %v2553_v19 }
 0x2d4   : > { %v2691_v48 = vsel %vm2690_vm11, %v3497_v33, %v2687_v35  ;;  %v2215_v22 = vsel %vm2212_vm12, %v2211_v21, %v2013_v7 }
 0x2d5   : > { %v2696_v5 = vsel %vm2693_vm13, %v2695_v9, %v2691_v48 }
 0x2d6   : > { %v2697_v12 = vmul.f32 %v2696_v5, %v2595_v13 }
 0x2d8   : > { %v2698_v63 = vadd.f32 %v2697_v12, %v2682_v16 }
 0x2da   : > { %v2702_v59 = vsel %vm2699_vm2, %v2698_v63, %v2215_v22 }
 0x2db   : > { %2704 = vst [vmem:[%s999_s20] sm:$0x1] %v2702_v59 }
 0x2dc   : > { %3853 = shalt.err (!%p3850_p10)
}
 0x2dd   : > { %3280 = dma.vmem_to_hbm [thread:$0]  (%p4176_p0), %s2734_s28, 16, %s2736_s10, %s2710_s22  }
 0x2de PF: > { %s2747_s16 = sand.u32 1, %s3912_s24   ;;  %p3316_p11 = pnand %p3084_p4, %p4180_p2 }
 0x2df   : > { %s2748_s0 = scalar_lea.sflag [#allocation7], %s2747_s16 }
 0x2e0   : > { %p3317_p12 = pneg %p3316_p11 }
 0x2e2   : > { %3903 = dma.done.wait (%p3317_p12), %s2748_s0, 16  }
 0x2e3   : > { %3905 = vsyncadd (%p3317_p12), %s2748_s0, 4294967280  ;;  %s2757_s11 = scalar_lea.sflag [#allocation24], %s2747_s16 }
 0x2e4   : > { %3907 = dma.done.wait (%p3317_p12), %s2757_s11, 16  }
 0x2e5   : > { %3909 = vsyncadd (%p3317_p12), %s2757_s11, 4294967280  ;;  %s50_s29 = sadd.s32 1, %s3932_s29   ;;  %s5471_s27 = sld [smem:[#allocation33_spill]] }
 0x2e6   : > { %p47_p13 = scmp.ge.s32.totalorder %s50_s29, 4   ;;  %s5472_s26 = sld [smem:[#allocation37_spill]] }
 0x2e7   : > { %s5473_s4 = sld [smem:[#allocation35_spill]]  ;;  %s5475_s24 = smov %s3916_s25 }
 0x2e8   : > { %s5474_s28 = sld [smem:[#allocation36_spill]] }
 0x2e9   :  { %49 = sbr.rel (!%p47_p13) target bundleno = 36 (0x24), region = 272 }
 0x2eb   : > { %s5476_s25 = smov %s5471_s27 }
 0x2ed   : > { %s5477_s27 = smov %s5473_s4 }
 0x2ee   :  { %2762 = vsyncpa [#allocation6], 1 }
 0x2ef   :  { %2764 = vsyncpa [#allocation6 + $0x1], 1 }
 0x2f0   :  { %2765 = vsyncpa [#allocation9], 1 }
 0x2f1   :  { %2767 = vsyncpa [#allocation9 + $0x1], 1 }
 0x2f2   :  { %2768 = vsyncpa [#allocation12], 1 }
 0x2f3   :  { %2770 = vsyncpa [#allocation12 + $0x1], 1 }
 0x2f4   :  { %2771 = vsyncpa [#allocation15], 1 }
 0x2f5   :  { %2773 = vsyncpa [#allocation15 + $0x1], 1 }
 0x2f6   :  { %2774 = vsyncpa [#allocation18], 1 }
 0x2f7   :  { %2776 = vsyncpa [#allocation18 + $0x1], 1 }
 0x2f8   :  { %2777 = vsyncpa [#allocation21], 1 }
 0x2f9   :  { %2778 = vsyncpa [#allocation7], 1 }
 0x2fa   :  { %2780 = vsyncpa [#allocation7 + $0x1], 1 }
 0x2fb   :  { %2781 = vsyncpa [#allocation24], 1 }
 0x2fc   :  { %2783 = vsyncpa [#allocation24 + $0x1], 1 }

</bundles_post_ra>
